<compile_context>
chip_gen: v7x
topology: tpu7x:2x2x1
jax: 0.10.0
libtpu: 0.0.40
codegen_flags: <defaults>
</compile_context>

<pallas_src>
import functools
import math

import jax
import jax.numpy as jnp
from jax.experimental import pallas as pl
from jax.experimental.pallas import tpu as pltpu


def _round_up(x, m):
    return ((x + m - 1) // m) * m


# ----------------------------------------------------------------------------
# Fused forward kernel (one grid step per block of `block_b` batch elements)
# ----------------------------------------------------------------------------
def _fused_forward_kernel(x_ref, pe_ref, w_in_ref, b_in_ref,
                          wqkv_ref, bqkv_ref, wo_ref, bo_ref,
                          g1_ref, be1_ref, w1_ref, b1_ref,
                          w2_ref, b2_ref, g2_ref, be2_ref,
                          w_out_ref, b_out_ref,
                          o_ref, *, nhead):
    bf16 = jnp.bfloat16
    f32 = jnp.float32

    x = x_ref[...]                                  # [Bb, T, Din]  f32
    Bb, T, _ = x.shape
    D = w_in_ref.shape[1]
    hd = D // nhead
    M = Bb * T
    num_layers = wqkv_ref.shape[0]

    # ---- input projection + positional encoding (bf16 matmul, f32 acc) ----
    h = jnp.dot(x.astype(bf16), w_in_ref[...],
                preferred_element_type=f32)          # [Bb, T, D]
    h = h + b_in_ref[...] + pe_ref[...]              # [Bb,T,D] + [1,D] + [T,D]
    h = h.reshape(M, D)                              # flatten batch*time rows

    def encoder_layer(l, h):
        hb = h.astype(bf16)

        # ---- fused QKV: one lane-dense [D, 3D] matmul over all M rows ----
        qkv = jnp.dot(hb, wqkv_ref[l],
                      preferred_element_type=f32) + bqkv_ref[l]   # [M, 3D]
        # 128-lane-aligned slices; Q already carries the 1/sqrt(hd) scale.
        q3 = qkv[:, 0 * D:1 * D].reshape(Bb, T, D)
        k3 = qkv[:, 1 * D:2 * D].reshape(Bb, T, D)
        v3 = qkv[:, 2 * D:3 * D].reshape(Bb, T, D)

        # ---- attention per head (static unroll), batched over the block ----
        ctx_heads = []
        for hh in range(nhead):
            sl = slice(hh * hd, (hh + 1) * hd)
            qh = q3[:, :, sl].astype(bf16)           # [Bb, T, hd]
            kh = k3[:, :, sl].astype(bf16)
            vh = v3[:, :, sl].astype(bf16)
            s = jnp.einsum("bqd,bkd->bqk", qh, kh,
                           preferred_element_type=f32)            # [Bb, T, T]
            s = s - jnp.max(s, axis=-1, keepdims=True)
            p = jnp.exp(s)
            p = p / jnp.sum(p, axis=-1, keepdims=True)            # exact softmax
            ctx_heads.append(jnp.einsum("bqk,bkd->bqd", p.astype(bf16), vh,
                                        preferred_element_type=f32))
        ctx = jnp.concatenate(ctx_heads, axis=-1).reshape(M, D)   # concat heads

        # ---- output projection of attention: ONE full-depth [D, D] matmul ----
        attn = jnp.dot(ctx.astype(bf16), wo_ref[l],
                       preferred_element_type=f32) + bo_ref[l]    # [M, D]

        # ---- residual + LayerNorm 1 (f32) ----
        h1 = h + attn
        mu1 = jnp.mean(h1, axis=-1, keepdims=True)
        var1 = jnp.mean((h1 - mu1) ** 2, axis=-1, keepdims=True)
        h1 = (h1 - mu1) * jax.lax.rsqrt(var1 + 1e-5) * g1_ref[l] + be1_ref[l]

        # ---- feed-forward (ReLU), bf16 matmuls / f32 acc ----
        f = jnp.dot(h1.astype(bf16), w1_ref[l],
                    preferred_element_type=f32) + b1_ref[l]
        f = jnp.maximum(f, 0.0)
        f = jnp.dot(f.astype(bf16), w2_ref[l],
                    preferred_element_type=f32) + b2_ref[l]

        # ---- residual + LayerNorm 2 (f32) ----
        h2 = h1 + f
        mu2 = jnp.mean(h2, axis=-1, keepdims=True)
        var2 = jnp.mean((h2 - mu2) ** 2, axis=-1, keepdims=True)
        return (h2 - mu2) * jax.lax.rsqrt(var2 + 1e-5) * g2_ref[l] + be2_ref[l]

    # Short static unroll over layers (activations stay resident in VMEM).
    for l in range(num_layers):
        h = encoder_layer(l, h)

    # ---- last-token gather + f32 output projection (lane-dense padded) ----
    last = h.reshape(Bb, T, D)[:, T - 1, :]                       # [Bb, D]
    out = jnp.dot(last, w_out_ref[...],
                  preferred_element_type=f32) + b_out_ref[...]    # [Bb, OP] f32
    o_ref[...] = out[:, None, :]


# ----------------------------------------------------------------------------
# Wrapper
# ----------------------------------------------------------------------------
def bayesian_transformer_quantile_forward(x, params, nhead, out_len, K,
                                          block_b=None):
    B, T, Din = x.shape
    D = params["w_in"].shape[1]
    OP = params["w_out"].shape[1]

    if block_b is None:
        # Largest divisor of B that keeps >= 2 grid steps (v7x megacore).
        cap = max(1, min(16, B // 2))
        block_b = max(d for d in range(1, cap + 1) if B % d == 0)
    assert B % block_b == 0, "batch must be divisible by block_b"
    grid = (B // block_b,)

    def const_spec(shape):
        n = len(shape)
        return pl.BlockSpec(shape, lambda b, _n=n: (0,) * _n)

    in_specs = [
        pl.BlockSpec((block_b, T, Din), lambda b: (b, 0, 0)),   # x: batch block
        pl.BlockSpec((T, D), lambda b: (0, 0)),                 # pe: first T rows
        const_spec(params["w_in"].shape),
        const_spec(params["b_in"].shape),
        const_spec(params["wqkv"].shape),
        const_spec(params["bqkv"].shape),
        const_spec(params["wo"].shape),
        const_spec(params["bo"].shape),
        const_spec(params["g1"].shape),
        const_spec(params["be1"].shape),
        const_spec(params["w1"].shape),
        const_spec(params["b1"].shape),
        const_spec(params["w2"].shape),
        const_spec(params["b2"].shape),
        const_spec(params["g2"].shape),
        const_spec(params["be2"].shape),
        const_spec(params["w_out"].shape),
        const_spec(params["b_out"].shape),
    ]

    out = pl.pallas_call(
        functools.partial(_fused_forward_kernel, nhead=nhead),
        out_shape=jax.ShapeDtypeStruct((B, 1, OP), jnp.float32),
        grid=grid,
        in_specs=in_specs,
        out_specs=pl.BlockSpec((block_b, 1, OP), lambda b: (b, 0, 0)),
        compiler_params=pltpu.CompilerParams(
            dimension_semantics=("parallel",),
            vmem_limit_bytes=32 * 1024 * 1024),
    )(x, params["pe"], params["w_in"], params["b_in"],
      params["wqkv"], params["bqkv"], params["wo"], params["bo"],
      params["g1"], params["be1"], params["w1"], params["b1"],
      params["w2"], params["b2"], params["g2"], params["be2"],
      params["w_out"], params["b_out"])

    o_real = out_len * K
    return out.reshape(B, OP)[:, :o_real].reshape(B, out_len, K)


# ----------------------------------------------------------------------------
# Parameter construction (deterministic, synthetic)
# ----------------------------------------------------------------------------
def init_params(key, input_size, d_model, nhead, num_layers, out_len, K,
                dim_feedforward, max_len=5000):
    assert d_model % nhead == 0
    hd = d_model // nhead
    L = num_layers
    o_real = out_len * K
    OP = max(128, _round_up(o_real, 128))            # lane-dense output pad
    scale = 1.0 / math.sqrt(hd)

    ks = iter(jax.random.split(key, 20))

    def nrm(shape, std=0.05):
        return (std * jax.random.normal(next(ks), shape)).astype(jnp.float32)

    bf16 = jnp.bfloat16

    # Fused QKV weights [L, D, 3D]; columns [0:D]=Q | [D:2D]=K | [2D:3D]=V,
    # each block head-major (column = h*hd + d), matching nn.MultiheadAttention.
    wqkv = nrm((L, d_model, 3 * d_model))
    bqkv = nrm((L, 1, 3 * d_model))
    # Fold the 1/sqrt(head_dim) attention scale into the Q weight AND bias.
    wqkv = wqkv.at[:, :, :d_model].multiply(scale)
    bqkv = bqkv.at[:, :, :d_model].multiply(scale)

    # Final projection kept in f32 (precision of the quantile head), padded to
    # OP lanes; padded columns are zero and sliced off outside the kernel.
    w_out = jnp.zeros((d_model, OP), jnp.float32).at[:, :o_real].set(
        nrm((d_model, o_real)))
    b_out = jnp.zeros((1, OP), jnp.float32).at[:, :o_real].set(
        nrm((1, o_real)))

    params = {
        # matmul weights stored in bf16 (f32 accumulation in-kernel)
        "w_in": nrm((input_size, d_model)).astype(bf16),
        "b_in": nrm((1, d_model)),
        # learnable positional-encoding table (trunc_normal-ish, std=0.02)
        "pe": nrm((max_len, d_model), std=0.02),
        "wqkv": wqkv.astype(bf16),
        "bqkv": bqkv,
        # attention output projection [L, D, D] (rows = concat'd heads)
        "wo": nrm((L, d_model, d_model)).astype(bf16),
        "bo": nrm((L, 1, d_model)),
        "g1": jnp.ones((L, 1, d_model), jnp.float32),
        "be1": jnp.zeros((L, 1, d_model), jnp.float32),
        "w1": nrm((L, d_model, dim_feedforward)).astype(bf16),
        "b1": nrm((L, 1, dim_feedforward)),
        "w2": nrm((L, dim_feedforward, d_model)).astype(bf16),
        "b2": nrm((L, 1, d_model)),
        "g2": jnp.ones((L, 1, d_model), jnp.float32),
        "be2": jnp.zeros((L, 1, d_model), jnp.float32),
        "w_out": w_out,
        "b_out": b_out,
    }
    return params


if __name__ == "__main__":
    # Small shapes consistent with the module; d_model / dim_feedforward are
    # lane-aligned (dim_feedforward=256 is the module default).
    B, T, input_size = 4, 8, 4
    d_model, nhead, num_layers = 128, 4, 2
    dim_feedforward = 256
    out_len, K = 4, 3                     # quantiles = [0.1, 0.5, 0.9]
    block_b = 2                           # grid = (2,) -> 2 parallel steps

    key = jax.random.PRNGKey(0)
    kx, kp = jax.random.split(key)
    x = jax.random.normal(kx, (B, T, input_size), dtype=jnp.float32)
    params = init_params(kp, input_size, d_model, nhead, num_layers,
                         out_len, K, dim_feedforward)

    fwd = jax.jit(functools.partial(bayesian_transformer_quantile_forward,
                                    nhead=nhead, out_len=out_len, K=K,
                                    block_b=block_b))
    out = fwd(x, params)
    out = jax.block_until_ready(out)
    assert out.shape == (B, out_len, K), out.shape
    assert out.dtype == jnp.float32
    print("KERNEL_OK")
</pallas_src>

<mosaic_0001>
module attributes {stable_mosaic.version = 11 : i64} {
  func.func @_fused_forward_kernel(%arg0: i32, %arg1: memref<2x8x4xf32, #tpu.memory_space<vmem>>, %arg2: memref<8x128xf32, #tpu.memory_space<vmem>>, %arg3: memref<4x128xbf16, #tpu.memory_space<vmem>>, %arg4: memref<1x128xf32, #tpu.memory_space<vmem>>, %arg5: memref<2x128x384xbf16, #tpu.memory_space<vmem>>, %arg6: memref<2x1x384xf32, #tpu.memory_space<vmem>>, %arg7: memref<2x128x128xbf16, #tpu.memory_space<vmem>>, %arg8: memref<2x1x128xf32, #tpu.memory_space<vmem>>, %arg9: memref<2x1x128xf32, #tpu.memory_space<vmem>>, %arg10: memref<2x1x128xf32, #tpu.memory_space<vmem>>, %arg11: memref<2x128x256xbf16, #tpu.memory_space<vmem>>, %arg12: memref<2x1x256xf32, #tpu.memory_space<vmem>>, %arg13: memref<2x256x128xbf16, #tpu.memory_space<vmem>>, %arg14: memref<2x1x128xf32, #tpu.memory_space<vmem>>, %arg15: memref<2x1x128xf32, #tpu.memory_space<vmem>>, %arg16: memref<2x1x128xf32, #tpu.memory_space<vmem>>, %arg17: memref<128x128xf32, #tpu.memory_space<vmem>>, %arg18: memref<1x128xf32, #tpu.memory_space<vmem>>, %arg19: memref<2x1x128xf32, #tpu.memory_space<vmem>>) attributes {dimension_semantics = [#tpu.dimension_semantics<parallel>], iteration_bounds = array<i64: 2>, scalar_prefetch = 0 : i64, scratch_operands = 0 : i64, tpu.core_type = #tpu.core_type<tc>, window_params = [{transform_indices = @transform_0, window_bounds = array<i64: 2, 8, 4>}, {transform_indices = @transform_1, window_bounds = array<i64: 8, 128>}, {pipeline_mode = #tpu.pipeline_mode<synchronous>, transform_indices = @transform_2, window_bounds = array<i64: 4, 128>}, {pipeline_mode = #tpu.pipeline_mode<synchronous>, transform_indices = @transform_3, window_bounds = array<i64: 1, 128>}, {pipeline_mode = #tpu.pipeline_mode<synchronous>, transform_indices = @transform_4, window_bounds = array<i64: 2, 128, 384>}, {pipeline_mode = #tpu.pipeline_mode<synchronous>, transform_indices = @transform_5, window_bounds = array<i64: 2, 1, 384>}, {pipeline_mode = #tpu.pipeline_mode<synchronous>, transform_indices = @transform_6, window_bounds = array<i64: 2, 128, 128>}, {pipeline_mode = #tpu.pipeline_mode<synchronous>, transform_indices = @transform_7, window_bounds = array<i64: 2, 1, 128>}, {pipeline_mode = #tpu.pipeline_mode<synchronous>, transform_indices = @transform_8, window_bounds = array<i64: 2, 1, 128>}, {pipeline_mode = #tpu.pipeline_mode<synchronous>, transform_indices = @transform_9, window_bounds = array<i64: 2, 1, 128>}, {pipeline_mode = #tpu.pipeline_mode<synchronous>, transform_indices = @transform_10, window_bounds = array<i64: 2, 128, 256>}, {pipeline_mode = #tpu.pipeline_mode<synchronous>, transform_indices = @transform_11, window_bounds = array<i64: 2, 1, 256>}, {pipeline_mode = #tpu.pipeline_mode<synchronous>, transform_indices = @transform_12, window_bounds = array<i64: 2, 256, 128>}, {pipeline_mode = #tpu.pipeline_mode<synchronous>, transform_indices = @transform_13, window_bounds = array<i64: 2, 1, 128>}, {pipeline_mode = #tpu.pipeline_mode<synchronous>, transform_indices = @transform_14, window_bounds = array<i64: 2, 1, 128>}, {pipeline_mode = #tpu.pipeline_mode<synchronous>, transform_indices = @transform_15, window_bounds = array<i64: 2, 1, 128>}, {pipeline_mode = #tpu.pipeline_mode<synchronous>, transform_indices = @transform_16, window_bounds = array<i64: 128, 128>}, {pipeline_mode = #tpu.pipeline_mode<synchronous>, transform_indices = @transform_17, window_bounds = array<i64: 1, 128>}, {transform_indices = @transform_18, window_bounds = array<i64: 2, 1, 128>}]} {
    %c0 = arith.constant 0 : index
    %c0_0 = arith.constant 0 : index
    %c0_1 = arith.constant 0 : index
    %0 = vector.load %arg1[%c0, %c0_0, %c0_1] : memref<2x8x4xf32, #tpu.memory_space<vmem>>, vector<2x8x4xf32>
    %1 = arith.truncf %0 : vector<2x8x4xf32> to vector<2x8x4xbf16>
    %c0_2 = arith.constant 0 : index
    %c0_3 = arith.constant 0 : index
    %2 = vector.load %arg3[%c0_2, %c0_3] : memref<4x128xbf16, #tpu.memory_space<vmem>>, vector<4x128xbf16>
    %cst = arith.constant dense<0.000000e+00> : vector<2x8x128xf32>
    %3 = tpu.matmul %1, %2, %cst {dimension_numbers = #tpu.dot_dimension_numbers<[2], [0], [0, 1], [1], [0, 0, 0, 1, 1, 1], [], []>} : vector<2x8x4xbf16>, vector<4x128xbf16>, vector<2x8x128xf32> -> vector<2x8x128xf32>
    %c0_4 = arith.constant 0 : index
    %c0_5 = arith.constant 0 : index
    %4 = vector.load %arg4[%c0_4, %c0_5] : memref<1x128xf32, #tpu.memory_space<vmem>>, vector<1x128xf32>
    %5 = vector.shape_cast %4 : vector<1x128xf32> to vector<1x1x128xf32>
    %6 = vector.broadcast %5 : vector<1x1x128xf32> to vector<2x8x128xf32>
    %7 = arith.addf %3, %6 : vector<2x8x128xf32>
    %c0_6 = arith.constant 0 : index
    %c0_7 = arith.constant 0 : index
    %8 = vector.load %arg2[%c0_6, %c0_7] : memref<8x128xf32, #tpu.memory_space<vmem>>, vector<8x128xf32>
    %9 = vector.shape_cast %8 : vector<8x128xf32> to vector<1x8x128xf32>
    %10 = vector.broadcast %9 : vector<1x8x128xf32> to vector<2x8x128xf32>
    %11 = arith.addf %7, %10 : vector<2x8x128xf32>
    %12 = vector.shape_cast %11 : vector<2x8x128xf32> to vector<16x128xf32>
    %13 = arith.truncf %12 : vector<16x128xf32> to vector<16x128xbf16>
    %c0_8 = arith.constant 0 : index
    %c0_9 = arith.constant 0 : index
    %c0_10 = arith.constant 0 : index
    %14 = vector.load %arg5[%c0_8, %c0_9, %c0_10] : memref<2x128x384xbf16, #tpu.memory_space<vmem>>, vector<1x128x384xbf16>
    %15 = vector.shape_cast %14 : vector<1x128x384xbf16> to vector<128x384xbf16>
    %cst_11 = arith.constant dense<0.000000e+00> : vector<16x384xf32>
    %16 = tpu.matmul %13, %15, %cst_11 {dimension_numbers = #tpu.dot_dimension_numbers<[1], [0], [0], [1], [0, 0, 1, 1], [], []>} : vector<16x128xbf16>, vector<128x384xbf16>, vector<16x384xf32> -> vector<16x384xf32>
    %c0_12 = arith.constant 0 : index
    %c0_13 = arith.constant 0 : index
    %c0_14 = arith.constant 0 : index
    %17 = vector.load %arg6[%c0_12, %c0_13, %c0_14] : memref<2x1x384xf32, #tpu.memory_space<vmem>>, vector<1x1x384xf32>
    %18 = vector.shape_cast %17 : vector<1x1x384xf32> to vector<1x384xf32>
    %19 = vector.broadcast %18 : vector<1x384xf32> to vector<16x384xf32>
    %20 = arith.addf %16, %19 : vector<16x384xf32>
    %21 = vector.extract_strided_slice %20 {offsets = [0, 0], sizes = [16, 128], strides = [1, 1]} : vector<16x384xf32> to vector<16x128xf32>
    %22 = vector.shape_cast %21 : vector<16x128xf32> to vector<2x8x128xf32>
    %23 = vector.extract_strided_slice %20 {offsets = [0, 128], sizes = [16, 128], strides = [1, 1]} : vector<16x384xf32> to vector<16x128xf32>
    %24 = vector.shape_cast %23 : vector<16x128xf32> to vector<2x8x128xf32>
    %25 = vector.extract_strided_slice %20 {offsets = [0, 256], sizes = [16, 128], strides = [1, 1]} : vector<16x384xf32> to vector<16x128xf32>
    %26 = vector.shape_cast %25 : vector<16x128xf32> to vector<2x8x128xf32>
    %27 = vector.extract_strided_slice %22 {offsets = [0, 0, 0], sizes = [2, 8, 32], strides = [1, 1, 1]} : vector<2x8x128xf32> to vector<2x8x32xf32>
    %28 = arith.truncf %27 : vector<2x8x32xf32> to vector<2x8x32xbf16>
    %29 = vector.extract_strided_slice %24 {offsets = [0, 0, 0], sizes = [2, 8, 32], strides = [1, 1, 1]} : vector<2x8x128xf32> to vector<2x8x32xf32>
    %30 = arith.truncf %29 : vector<2x8x32xf32> to vector<2x8x32xbf16>
    %31 = vector.extract_strided_slice %26 {offsets = [0, 0, 0], sizes = [2, 8, 32], strides = [1, 1, 1]} : vector<2x8x128xf32> to vector<2x8x32xf32>
    %32 = arith.truncf %31 : vector<2x8x32xf32> to vector<2x8x32xbf16>
    "tpu.trace_start"() <{level = 10 : i32, message = "bqd,bkd->bqk"}> : () -> ()
    %cst_15 = arith.constant dense<0.000000e+00> : vector<2x8x8xf32>
    %33 = tpu.matmul %28, %30, %cst_15 {dimension_numbers = #tpu.dot_dimension_numbers<[2], [2], [1], [1], [0, 0, 0, 1, 1, 1], [0], [0]>} : vector<2x8x32xbf16>, vector<2x8x32xbf16>, vector<2x8x8xf32> -> vector<2x8x8xf32>
    "tpu.trace_stop"() : () -> ()
    %cst_16 = arith.constant dense<0xFF800000> : vector<2x8xf32>
    %34 = vector.multi_reduction <maximumf>, %33, %cst_16 [2] : vector<2x8x8xf32> to vector<2x8xf32>
    %35 = vector.shape_cast %34 : vector<2x8xf32> to vector<2x8x1xf32>
    %36 = vector.broadcast %35 : vector<2x8x1xf32> to vector<2x8x8xf32>
    %37 = arith.subf %33, %36 : vector<2x8x8xf32>
    %38 = math.exp %37 : vector<2x8x8xf32>
    %cst_17 = arith.constant dense<0.000000e+00> : vector<2x8xf32>
    %39 = vector.multi_reduction <add>, %38, %cst_17 [2] : vector<2x8x8xf32> to vector<2x8xf32>
    %40 = vector.shape_cast %39 : vector<2x8xf32> to vector<2x8x1xf32>
    %41 = vector.broadcast %40 : vector<2x8x1xf32> to vector<2x8x8xf32>
    %42 = arith.divf %38, %41 : vector<2x8x8xf32>
    %43 = arith.truncf %42 : vector<2x8x8xf32> to vector<2x8x8xbf16>
    "tpu.trace_start"() <{level = 10 : i32, message = "bqk,bkd->bqd"}> : () -> ()
    %cst_18 = arith.constant dense<0.000000e+00> : vector<2x8x32xf32>
    %44 = tpu.matmul %43, %32, %cst_18 {dimension_numbers = #tpu.dot_dimension_numbers<[2], [1], [1], [2], [0, 0, 0, 1, 1, 2], [0], [0]>} : vector<2x8x8xbf16>, vector<2x8x32xbf16>, vector<2x8x32xf32> -> vector<2x8x32xf32>
    "tpu.trace_stop"() : () -> ()
    %45 = vector.extract_strided_slice %22 {offsets = [0, 0, 32], sizes = [2, 8, 32], strides = [1, 1, 1]} : vector<2x8x128xf32> to vector<2x8x32xf32>
    %46 = arith.truncf %45 : vector<2x8x32xf32> to vector<2x8x32xbf16>
    %47 = vector.extract_strided_slice %24 {offsets = [0, 0, 32], sizes = [2, 8, 32], strides = [1, 1, 1]} : vector<2x8x128xf32> to vector<2x8x32xf32>
    %48 = arith.truncf %47 : vector<2x8x32xf32> to vector<2x8x32xbf16>
    %49 = vector.extract_strided_slice %26 {offsets = [0, 0, 32], sizes = [2, 8, 32], strides = [1, 1, 1]} : vector<2x8x128xf32> to vector<2x8x32xf32>
    %50 = arith.truncf %49 : vector<2x8x32xf32> to vector<2x8x32xbf16>
    "tpu.trace_start"() <{level = 10 : i32, message = "bqd,bkd->bqk"}> : () -> ()
    %cst_19 = arith.constant dense<0.000000e+00> : vector<2x8x8xf32>
    %51 = tpu.matmul %46, %48, %cst_19 {dimension_numbers = #tpu.dot_dimension_numbers<[2], [2], [1], [1], [0, 0, 0, 1, 1, 1], [0], [0]>} : vector<2x8x32xbf16>, vector<2x8x32xbf16>, vector<2x8x8xf32> -> vector<2x8x8xf32>
    "tpu.trace_stop"() : () -> ()
    %cst_20 = arith.constant dense<0xFF800000> : vector<2x8xf32>
    %52 = vector.multi_reduction <maximumf>, %51, %cst_20 [2] : vector<2x8x8xf32> to vector<2x8xf32>
    %53 = vector.shape_cast %52 : vector<2x8xf32> to vector<2x8x1xf32>
    %54 = vector.broadcast %53 : vector<2x8x1xf32> to vector<2x8x8xf32>
    %55 = arith.subf %51, %54 : vector<2x8x8xf32>
    %56 = math.exp %55 : vector<2x8x8xf32>
    %cst_21 = arith.constant dense<0.000000e+00> : vector<2x8xf32>
    %57 = vector.multi_reduction <add>, %56, %cst_21 [2] : vector<2x8x8xf32> to vector<2x8xf32>
    %58 = vector.shape_cast %57 : vector<2x8xf32> to vector<2x8x1xf32>
    %59 = vector.broadcast %58 : vector<2x8x1xf32> to vector<2x8x8xf32>
    %60 = arith.divf %56, %59 : vector<2x8x8xf32>
    %61 = arith.truncf %60 : vector<2x8x8xf32> to vector<2x8x8xbf16>
    "tpu.trace_start"() <{level = 10 : i32, message = "bqk,bkd->bqd"}> : () -> ()
    %cst_22 = arith.constant dense<0.000000e+00> : vector<2x8x32xf32>
    %62 = tpu.matmul %61, %50, %cst_22 {dimension_numbers = #tpu.dot_dimension_numbers<[2], [1], [1], [2], [0, 0, 0, 1, 1, 2], [0], [0]>} : vector<2x8x8xbf16>, vector<2x8x32xbf16>, vector<2x8x32xf32> -> vector<2x8x32xf32>
    "tpu.trace_stop"() : () -> ()
    %63 = vector.extract_strided_slice %22 {offsets = [0, 0, 64], sizes = [2, 8, 32], strides = [1, 1, 1]} : vector<2x8x128xf32> to vector<2x8x32xf32>
    %64 = arith.truncf %63 : vector<2x8x32xf32> to vector<2x8x32xbf16>
    %65 = vector.extract_strided_slice %24 {offsets = [0, 0, 64], sizes = [2, 8, 32], strides = [1, 1, 1]} : vector<2x8x128xf32> to vector<2x8x32xf32>
    %66 = arith.truncf %65 : vector<2x8x32xf32> to vector<2x8x32xbf16>
    %67 = vector.extract_strided_slice %26 {offsets = [0, 0, 64], sizes = [2, 8, 32], strides = [1, 1, 1]} : vector<2x8x128xf32> to vector<2x8x32xf32>
    %68 = arith.truncf %67 : vector<2x8x32xf32> to vector<2x8x32xbf16>
    "tpu.trace_start"() <{level = 10 : i32, message = "bqd,bkd->bqk"}> : () -> ()
    %cst_23 = arith.constant dense<0.000000e+00> : vector<2x8x8xf32>
    %69 = tpu.matmul %64, %66, %cst_23 {dimension_numbers = #tpu.dot_dimension_numbers<[2], [2], [1], [1], [0, 0, 0, 1, 1, 1], [0], [0]>} : vector<2x8x32xbf16>, vector<2x8x32xbf16>, vector<2x8x8xf32> -> vector<2x8x8xf32>
    "tpu.trace_stop"() : () -> ()
    %cst_24 = arith.constant dense<0xFF800000> : vector<2x8xf32>
    %70 = vector.multi_reduction <maximumf>, %69, %cst_24 [2] : vector<2x8x8xf32> to vector<2x8xf32>
    %71 = vector.shape_cast %70 : vector<2x8xf32> to vector<2x8x1xf32>
    %72 = vector.broadcast %71 : vector<2x8x1xf32> to vector<2x8x8xf32>
    %73 = arith.subf %69, %72 : vector<2x8x8xf32>
    %74 = math.exp %73 : vector<2x8x8xf32>
    %cst_25 = arith.constant dense<0.000000e+00> : vector<2x8xf32>
    %75 = vector.multi_reduction <add>, %74, %cst_25 [2] : vector<2x8x8xf32> to vector<2x8xf32>
    %76 = vector.shape_cast %75 : vector<2x8xf32> to vector<2x8x1xf32>
    %77 = vector.broadcast %76 : vector<2x8x1xf32> to vector<2x8x8xf32>
    %78 = arith.divf %74, %77 : vector<2x8x8xf32>
    %79 = arith.truncf %78 : vector<2x8x8xf32> to vector<2x8x8xbf16>
    "tpu.trace_start"() <{level = 10 : i32, message = "bqk,bkd->bqd"}> : () -> ()
    %cst_26 = arith.constant dense<0.000000e+00> : vector<2x8x32xf32>
    %80 = tpu.matmul %79, %68, %cst_26 {dimension_numbers = #tpu.dot_dimension_numbers<[2], [1], [1], [2], [0, 0, 0, 1, 1, 2], [0], [0]>} : vector<2x8x8xbf16>, vector<2x8x32xbf16>, vector<2x8x32xf32> -> vector<2x8x32xf32>
    "tpu.trace_stop"() : () -> ()
    %81 = vector.extract_strided_slice %22 {offsets = [0, 0, 96], sizes = [2, 8, 32], strides = [1, 1, 1]} : vector<2x8x128xf32> to vector<2x8x32xf32>
    %82 = arith.truncf %81 : vector<2x8x32xf32> to vector<2x8x32xbf16>
    %83 = vector.extract_strided_slice %24 {offsets = [0, 0, 96], sizes = [2, 8, 32], strides = [1, 1, 1]} : vector<2x8x128xf32> to vector<2x8x32xf32>
    %84 = arith.truncf %83 : vector<2x8x32xf32> to vector<2x8x32xbf16>
    %85 = vector.extract_strided_slice %26 {offsets = [0, 0, 96], sizes = [2, 8, 32], strides = [1, 1, 1]} : vector<2x8x128xf32> to vector<2x8x32xf32>
    %86 = arith.truncf %85 : vector<2x8x32xf32> to vector<2x8x32xbf16>
    "tpu.trace_start"() <{level = 10 : i32, message = "bqd,bkd->bqk"}> : () -> ()
    %cst_27 = arith.constant dense<0.000000e+00> : vector<2x8x8xf32>
    %87 = tpu.matmul %82, %84, %cst_27 {dimension_numbers = #tpu.dot_dimension_numbers<[2], [2], [1], [1], [0, 0, 0, 1, 1, 1], [0], [0]>} : vector<2x8x32xbf16>, vector<2x8x32xbf16>, vector<2x8x8xf32> -> vector<2x8x8xf32>
    "tpu.trace_stop"() : () -> ()
    %cst_28 = arith.constant dense<0xFF800000> : vector<2x8xf32>
    %88 = vector.multi_reduction <maximumf>, %87, %cst_28 [2] : vector<2x8x8xf32> to vector<2x8xf32>
    %89 = vector.shape_cast %88 : vector<2x8xf32> to vector<2x8x1xf32>
    %90 = vector.broadcast %89 : vector<2x8x1xf32> to vector<2x8x8xf32>
    %91 = arith.subf %87, %90 : vector<2x8x8xf32>
    %92 = math.exp %91 : vector<2x8x8xf32>
    %cst_29 = arith.constant dense<0.000000e+00> : vector<2x8xf32>
    %93 = vector.multi_reduction <add>, %92, %cst_29 [2] : vector<2x8x8xf32> to vector<2x8xf32>
    %94 = vector.shape_cast %93 : vector<2x8xf32> to vector<2x8x1xf32>
    %95 = vector.broadcast %94 : vector<2x8x1xf32> to vector<2x8x8xf32>
    %96 = arith.divf %92, %95 : vector<2x8x8xf32>
    %97 = arith.truncf %96 : vector<2x8x8xf32> to vector<2x8x8xbf16>
    "tpu.trace_start"() <{level = 10 : i32, message = "bqk,bkd->bqd"}> : () -> ()
    %cst_30 = arith.constant dense<0.000000e+00> : vector<2x8x32xf32>
    %98 = tpu.matmul %97, %86, %cst_30 {dimension_numbers = #tpu.dot_dimension_numbers<[2], [1], [1], [2], [0, 0, 0, 1, 1, 2], [0], [0]>} : vector<2x8x8xbf16>, vector<2x8x32xbf16>, vector<2x8x32xf32> -> vector<2x8x32xf32>
    "tpu.trace_stop"() : () -> ()
    %99 = tpu.concatenate %44, %62, %80, %98 in 2 : vector<2x8x32xf32>, vector<2x8x32xf32>, vector<2x8x32xf32>, vector<2x8x32xf32> -> vector<2x8x128xf32>
    %100 = vector.shape_cast %99 : vector<2x8x128xf32> to vector<16x128xf32>
    %101 = arith.truncf %100 : vector<16x128xf32> to vector<16x128xbf16>
    %c0_31 = arith.constant 0 : index
    %c0_32 = arith.constant 0 : index
    %c0_33 = arith.constant 0 : index
    %102 = vector.load %arg7[%c0_31, %c0_32, %c0_33] : memref<2x128x128xbf16, #tpu.memory_space<vmem>>, vector<1x128x128xbf16>
    %103 = vector.shape_cast %102 : vector<1x128x128xbf16> to vector<128x128xbf16>
    %cst_34 = arith.constant dense<0.000000e+00> : vector<16x128xf32>
    %104 = tpu.matmul %101, %103, %cst_34 {dimension_numbers = #tpu.dot_dimension_numbers<[1], [0], [0], [1], [0, 0, 1, 1], [], []>} : vector<16x128xbf16>, vector<128x128xbf16>, vector<16x128xf32> -> vector<16x128xf32>
    %c0_35 = arith.constant 0 : index
    %c0_36 = arith.constant 0 : index
    %c0_37 = arith.constant 0 : index
    %105 = vector.load %arg8[%c0_35, %c0_36, %c0_37] : memref<2x1x128xf32, #tpu.memory_space<vmem>>, vector<1x1x128xf32>
    %106 = vector.shape_cast %105 : vector<1x1x128xf32> to vector<1x128xf32>
    %107 = vector.broadcast %106 : vector<1x128xf32> to vector<16x128xf32>
    %108 = arith.addf %104, %107 : vector<16x128xf32>
    %109 = arith.addf %12, %108 : vector<16x128xf32>
    %cst_38 = arith.constant dense<0.000000e+00> : vector<16xf32>
    %110 = vector.multi_reduction <add>, %109, %cst_38 [1] : vector<16x128xf32> to vector<16xf32>
    %111 = vector.shape_cast %110 : vector<16xf32> to vector<16x1xf32>
    %cst_39 = arith.constant 1.280000e+02 : f32
    %112 = vector.broadcast %cst_39 : f32 to vector<16x1xf32>
    %113 = arith.divf %111, %112 : vector<16x1xf32>
    %114 = vector.broadcast %113 : vector<16x1xf32> to vector<16x128xf32>
    %115 = arith.subf %109, %114 : vector<16x128xf32>
    %116 = arith.mulf %115, %115 : vector<16x128xf32>
    %cst_40 = arith.constant dense<0.000000e+00> : vector<16xf32>
    %117 = vector.multi_reduction <add>, %116, %cst_40 [1] : vector<16x128xf32> to vector<16xf32>
    %118 = vector.shape_cast %117 : vector<16xf32> to vector<16x1xf32>
    %cst_41 = arith.constant 1.280000e+02 : f32
    %119 = vector.broadcast %cst_41 : f32 to vector<16x1xf32>
    %120 = arith.divf %118, %119 : vector<16x1xf32>
    %121 = vector.broadcast %113 : vector<16x1xf32> to vector<16x128xf32>
    %122 = arith.subf %109, %121 : vector<16x128xf32>
    %cst_42 = arith.constant 9.99999974E-6 : f32
    %123 = vector.broadcast %cst_42 : f32 to vector<16x1xf32>
    %124 = arith.addf %120, %123 : vector<16x1xf32>
    %125 = math.rsqrt %124 : vector<16x1xf32>
    %126 = vector.broadcast %125 : vector<16x1xf32> to vector<16x128xf32>
    %127 = arith.mulf %122, %126 : vector<16x128xf32>
    %c0_43 = arith.constant 0 : index
    %c0_44 = arith.constant 0 : index
    %c0_45 = arith.constant 0 : index
    %128 = vector.load %arg9[%c0_43, %c0_44, %c0_45] : memref<2x1x128xf32, #tpu.memory_space<vmem>>, vector<1x1x128xf32>
    %129 = vector.shape_cast %128 : vector<1x1x128xf32> to vector<1x128xf32>
    %130 = vector.broadcast %129 : vector<1x128xf32> to vector<16x128xf32>
    %131 = arith.mulf %127, %130 : vector<16x128xf32>
    %c0_46 = arith.constant 0 : index
    %c0_47 = arith.constant 0 : index
    %c0_48 = arith.constant 0 : index
    %132 = vector.load %arg10[%c0_46, %c0_47, %c0_48] : memref<2x1x128xf32, #tpu.memory_space<vmem>>, vector<1x1x128xf32>
    %133 = vector.shape_cast %132 : vector<1x1x128xf32> to vector<1x128xf32>
    %134 = vector.broadcast %133 : vector<1x128xf32> to vector<16x128xf32>
    %135 = arith.addf %131, %134 : vector<16x128xf32>
    %136 = arith.truncf %135 : vector<16x128xf32> to vector<16x128xbf16>
    %c0_49 = arith.constant 0 : index
    %c0_50 = arith.constant 0 : index
    %c0_51 = arith.constant 0 : index
    %137 = vector.load %arg11[%c0_49, %c0_50, %c0_51] : memref<2x128x256xbf16, #tpu.memory_space<vmem>>, vector<1x128x256xbf16>
    %138 = vector.shape_cast %137 : vector<1x128x256xbf16> to vector<128x256xbf16>
    %cst_52 = arith.constant dense<0.000000e+00> : vector<16x256xf32>
    %139 = tpu.matmul %136, %138, %cst_52 {dimension_numbers = #tpu.dot_dimension_numbers<[1], [0], [0], [1], [0, 0, 1, 1], [], []>} : vector<16x128xbf16>, vector<128x256xbf16>, vector<16x256xf32> -> vector<16x256xf32>
    %c0_53 = arith.constant 0 : index
    %c0_54 = arith.constant 0 : index
    %c0_55 = arith.constant 0 : index
    %140 = vector.load %arg12[%c0_53, %c0_54, %c0_55] : memref<2x1x256xf32, #tpu.memory_space<vmem>>, vector<1x1x256xf32>
    %141 = vector.shape_cast %140 : vector<1x1x256xf32> to vector<1x256xf32>
    %142 = vector.broadcast %141 : vector<1x256xf32> to vector<16x256xf32>
    %143 = arith.addf %139, %142 : vector<16x256xf32>
    %cst_56 = arith.constant 0.000000e+00 : f32
    %144 = vector.broadcast %cst_56 : f32 to vector<16x256xf32>
    %145 = arith.maximumf %143, %144 : vector<16x256xf32>
    %146 = arith.truncf %145 : vector<16x256xf32> to vector<16x256xbf16>
    %c0_57 = arith.constant 0 : index
    %c0_58 = arith.constant 0 : index
    %c0_59 = arith.constant 0 : index
    %147 = vector.load %arg13[%c0_57, %c0_58, %c0_59] : memref<2x256x128xbf16, #tpu.memory_space<vmem>>, vector<1x256x128xbf16>
    %148 = vector.shape_cast %147 : vector<1x256x128xbf16> to vector<256x128xbf16>
    %cst_60 = arith.constant dense<0.000000e+00> : vector<16x128xf32>
    %149 = tpu.matmul %146, %148, %cst_60 {dimension_numbers = #tpu.dot_dimension_numbers<[1], [0], [0], [1], [0, 0, 1, 1], [], []>} : vector<16x256xbf16>, vector<256x128xbf16>, vector<16x128xf32> -> vector<16x128xf32>
    %c0_61 = arith.constant 0 : index
    %c0_62 = arith.constant 0 : index
    %c0_63 = arith.constant 0 : index
    %150 = vector.load %arg14[%c0_61, %c0_62, %c0_63] : memref<2x1x128xf32, #tpu.memory_space<vmem>>, vector<1x1x128xf32>
    %151 = vector.shape_cast %150 : vector<1x1x128xf32> to vector<1x128xf32>
    %152 = vector.broadcast %151 : vector<1x128xf32> to vector<16x128xf32>
    %153 = arith.addf %149, %152 : vector<16x128xf32>
    %154 = arith.addf %135, %153 : vector<16x128xf32>
    %cst_64 = arith.constant dense<0.000000e+00> : vector<16xf32>
    %155 = vector.multi_reduction <add>, %154, %cst_64 [1] : vector<16x128xf32> to vector<16xf32>
    %156 = vector.shape_cast %155 : vector<16xf32> to vector<16x1xf32>
    %cst_65 = arith.constant 1.280000e+02 : f32
    %157 = vector.broadcast %cst_65 : f32 to vector<16x1xf32>
    %158 = arith.divf %156, %157 : vector<16x1xf32>
    %159 = vector.broadcast %158 : vector<16x1xf32> to vector<16x128xf32>
    %160 = arith.subf %154, %159 : vector<16x128xf32>
    %161 = arith.mulf %160, %160 : vector<16x128xf32>
    %cst_66 = arith.constant dense<0.000000e+00> : vector<16xf32>
    %162 = vector.multi_reduction <add>, %161, %cst_66 [1] : vector<16x128xf32> to vector<16xf32>
    %163 = vector.shape_cast %162 : vector<16xf32> to vector<16x1xf32>
    %cst_67 = arith.constant 1.280000e+02 : f32
    %164 = vector.broadcast %cst_67 : f32 to vector<16x1xf32>
    %165 = arith.divf %163, %164 : vector<16x1xf32>
    %166 = vector.broadcast %158 : vector<16x1xf32> to vector<16x128xf32>
    %167 = arith.subf %154, %166 : vector<16x128xf32>
    %cst_68 = arith.constant 9.99999974E-6 : f32
    %168 = vector.broadcast %cst_68 : f32 to vector<16x1xf32>
    %169 = arith.addf %165, %168 : vector<16x1xf32>
    %170 = math.rsqrt %169 : vector<16x1xf32>
    %171 = vector.broadcast %170 : vector<16x1xf32> to vector<16x128xf32>
    %172 = arith.mulf %167, %171 : vector<16x128xf32>
    %c0_69 = arith.constant 0 : index
    %c0_70 = arith.constant 0 : index
    %c0_71 = arith.constant 0 : index
    %173 = vector.load %arg15[%c0_69, %c0_70, %c0_71] : memref<2x1x128xf32, #tpu.memory_space<vmem>>, vector<1x1x128xf32>
    %174 = vector.shape_cast %173 : vector<1x1x128xf32> to vector<1x128xf32>
    %175 = vector.broadcast %174 : vector<1x128xf32> to vector<16x128xf32>
    %176 = arith.mulf %172, %175 : vector<16x128xf32>
    %c0_72 = arith.constant 0 : index
    %c0_73 = arith.constant 0 : index
    %c0_74 = arith.constant 0 : index
    %177 = vector.load %arg16[%c0_72, %c0_73, %c0_74] : memref<2x1x128xf32, #tpu.memory_space<vmem>>, vector<1x1x128xf32>
    %178 = vector.shape_cast %177 : vector<1x1x128xf32> to vector<1x128xf32>
    %179 = vector.broadcast %178 : vector<1x128xf32> to vector<16x128xf32>
    %180 = arith.addf %176, %179 : vector<16x128xf32>
    %181 = arith.truncf %180 : vector<16x128xf32> to vector<16x128xbf16>
    %c1 = arith.constant 1 : index
    %c0_75 = arith.constant 0 : index
    %c0_76 = arith.constant 0 : index
    %182 = vector.load %arg5[%c1, %c0_75, %c0_76] : memref<2x128x384xbf16, #tpu.memory_space<vmem>>, vector<1x128x384xbf16>
    %183 = vector.shape_cast %182 : vector<1x128x384xbf16> to vector<128x384xbf16>
    %cst_77 = arith.constant dense<0.000000e+00> : vector<16x384xf32>
    %184 = tpu.matmul %181, %183, %cst_77 {dimension_numbers = #tpu.dot_dimension_numbers<[1], [0], [0], [1], [0, 0, 1, 1], [], []>} : vector<16x128xbf16>, vector<128x384xbf16>, vector<16x384xf32> -> vector<16x384xf32>
    %c1_78 = arith.constant 1 : index
    %c0_79 = arith.constant 0 : index
    %c0_80 = arith.constant 0 : index
    %185 = vector.load %arg6[%c1_78, %c0_79, %c0_80] : memref<2x1x384xf32, #tpu.memory_space<vmem>>, vector<1x1x384xf32>
    %186 = vector.shape_cast %185 : vector<1x1x384xf32> to vector<1x384xf32>
    %187 = vector.broadcast %186 : vector<1x384xf32> to vector<16x384xf32>
    %188 = arith.addf %184, %187 : vector<16x384xf32>
    %189 = vector.extract_strided_slice %188 {offsets = [0, 0], sizes = [16, 128], strides = [1, 1]} : vector<16x384xf32> to vector<16x128xf32>
    %190 = vector.shape_cast %189 : vector<16x128xf32> to vector<2x8x128xf32>
    %191 = vector.extract_strided_slice %188 {offsets = [0, 128], sizes = [16, 128], strides = [1, 1]} : vector<16x384xf32> to vector<16x128xf32>
    %192 = vector.shape_cast %191 : vector<16x128xf32> to vector<2x8x128xf32>
    %193 = vector.extract_strided_slice %188 {offsets = [0, 256], sizes = [16, 128], strides = [1, 1]} : vector<16x384xf32> to vector<16x128xf32>
    %194 = vector.shape_cast %193 : vector<16x128xf32> to vector<2x8x128xf32>
    %195 = vector.extract_strided_slice %190 {offsets = [0, 0, 0], sizes = [2, 8, 32], strides = [1, 1, 1]} : vector<2x8x128xf32> to vector<2x8x32xf32>
    %196 = arith.truncf %195 : vector<2x8x32xf32> to vector<2x8x32xbf16>
    %197 = vector.extract_strided_slice %192 {offsets = [0, 0, 0], sizes = [2, 8, 32], strides = [1, 1, 1]} : vector<2x8x128xf32> to vector<2x8x32xf32>
    %198 = arith.truncf %197 : vector<2x8x32xf32> to vector<2x8x32xbf16>
    %199 = vector.extract_strided_slice %194 {offsets = [0, 0, 0], sizes = [2, 8, 32], strides = [1, 1, 1]} : vector<2x8x128xf32> to vector<2x8x32xf32>
    %200 = arith.truncf %199 : vector<2x8x32xf32> to vector<2x8x32xbf16>
    "tpu.trace_start"() <{level = 10 : i32, message = "bqd,bkd->bqk"}> : () -> ()
    %cst_81 = arith.constant dense<0.000000e+00> : vector<2x8x8xf32>
    %201 = tpu.matmul %196, %198, %cst_81 {dimension_numbers = #tpu.dot_dimension_numbers<[2], [2], [1], [1], [0, 0, 0, 1, 1, 1], [0], [0]>} : vector<2x8x32xbf16>, vector<2x8x32xbf16>, vector<2x8x8xf32> -> vector<2x8x8xf32>
    "tpu.trace_stop"() : () -> ()
    %cst_82 = arith.constant dense<0xFF800000> : vector<2x8xf32>
    %202 = vector.multi_reduction <maximumf>, %201, %cst_82 [2] : vector<2x8x8xf32> to vector<2x8xf32>
    %203 = vector.shape_cast %202 : vector<2x8xf32> to vector<2x8x1xf32>
    %204 = vector.broadcast %203 : vector<2x8x1xf32> to vector<2x8x8xf32>
    %205 = arith.subf %201, %204 : vector<2x8x8xf32>
    %206 = math.exp %205 : vector<2x8x8xf32>
    %cst_83 = arith.constant dense<0.000000e+00> : vector<2x8xf32>
    %207 = vector.multi_reduction <add>, %206, %cst_83 [2] : vector<2x8x8xf32> to vector<2x8xf32>
    %208 = vector.shape_cast %207 : vector<2x8xf32> to vector<2x8x1xf32>
    %209 = vector.broadcast %208 : vector<2x8x1xf32> to vector<2x8x8xf32>
    %210 = arith.divf %206, %209 : vector<2x8x8xf32>
    %211 = arith.truncf %210 : vector<2x8x8xf32> to vector<2x8x8xbf16>
    "tpu.trace_start"() <{level = 10 : i32, message = "bqk,bkd->bqd"}> : () -> ()
    %cst_84 = arith.constant dense<0.000000e+00> : vector<2x8x32xf32>
    %212 = tpu.matmul %211, %200, %cst_84 {dimension_numbers = #tpu.dot_dimension_numbers<[2], [1], [1], [2], [0, 0, 0, 1, 1, 2], [0], [0]>} : vector<2x8x8xbf16>, vector<2x8x32xbf16>, vector<2x8x32xf32> -> vector<2x8x32xf32>
    "tpu.trace_stop"() : () -> ()
    %213 = vector.extract_strided_slice %190 {offsets = [0, 0, 32], sizes = [2, 8, 32], strides = [1, 1, 1]} : vector<2x8x128xf32> to vector<2x8x32xf32>
    %214 = arith.truncf %213 : vector<2x8x32xf32> to vector<2x8x32xbf16>
    %215 = vector.extract_strided_slice %192 {offsets = [0, 0, 32], sizes = [2, 8, 32], strides = [1, 1, 1]} : vector<2x8x128xf32> to vector<2x8x32xf32>
    %216 = arith.truncf %215 : vector<2x8x32xf32> to vector<2x8x32xbf16>
    %217 = vector.extract_strided_slice %194 {offsets = [0, 0, 32], sizes = [2, 8, 32], strides = [1, 1, 1]} : vector<2x8x128xf32> to vector<2x8x32xf32>
    %218 = arith.truncf %217 : vector<2x8x32xf32> to vector<2x8x32xbf16>
    "tpu.trace_start"() <{level = 10 : i32, message = "bqd,bkd->bqk"}> : () -> ()
    %cst_85 = arith.constant dense<0.000000e+00> : vector<2x8x8xf32>
    %219 = tpu.matmul %214, %216, %cst_85 {dimension_numbers = #tpu.dot_dimension_numbers<[2], [2], [1], [1], [0, 0, 0, 1, 1, 1], [0], [0]>} : vector<2x8x32xbf16>, vector<2x8x32xbf16>, vector<2x8x8xf32> -> vector<2x8x8xf32>
    "tpu.trace_stop"() : () -> ()
    %cst_86 = arith.constant dense<0xFF800000> : vector<2x8xf32>
    %220 = vector.multi_reduction <maximumf>, %219, %cst_86 [2] : vector<2x8x8xf32> to vector<2x8xf32>
    %221 = vector.shape_cast %220 : vector<2x8xf32> to vector<2x8x1xf32>
    %222 = vector.broadcast %221 : vector<2x8x1xf32> to vector<2x8x8xf32>
    %223 = arith.subf %219, %222 : vector<2x8x8xf32>
    %224 = math.exp %223 : vector<2x8x8xf32>
    %cst_87 = arith.constant dense<0.000000e+00> : vector<2x8xf32>
    %225 = vector.multi_reduction <add>, %224, %cst_87 [2] : vector<2x8x8xf32> to vector<2x8xf32>
    %226 = vector.shape_cast %225 : vector<2x8xf32> to vector<2x8x1xf32>
    %227 = vector.broadcast %226 : vector<2x8x1xf32> to vector<2x8x8xf32>
    %228 = arith.divf %224, %227 : vector<2x8x8xf32>
    %229 = arith.truncf %228 : vector<2x8x8xf32> to vector<2x8x8xbf16>
    "tpu.trace_start"() <{level = 10 : i32, message = "bqk,bkd->bqd"}> : () -> ()
    %cst_88 = arith.constant dense<0.000000e+00> : vector<2x8x32xf32>
    %230 = tpu.matmul %229, %218, %cst_88 {dimension_numbers = #tpu.dot_dimension_numbers<[2], [1], [1], [2], [0, 0, 0, 1, 1, 2], [0], [0]>} : vector<2x8x8xbf16>, vector<2x8x32xbf16>, vector<2x8x32xf32> -> vector<2x8x32xf32>
    "tpu.trace_stop"() : () -> ()
    %231 = vector.extract_strided_slice %190 {offsets = [0, 0, 64], sizes = [2, 8, 32], strides = [1, 1, 1]} : vector<2x8x128xf32> to vector<2x8x32xf32>
    %232 = arith.truncf %231 : vector<2x8x32xf32> to vector<2x8x32xbf16>
    %233 = vector.extract_strided_slice %192 {offsets = [0, 0, 64], sizes = [2, 8, 32], strides = [1, 1, 1]} : vector<2x8x128xf32> to vector<2x8x32xf32>
    %234 = arith.truncf %233 : vector<2x8x32xf32> to vector<2x8x32xbf16>
    %235 = vector.extract_strided_slice %194 {offsets = [0, 0, 64], sizes = [2, 8, 32], strides = [1, 1, 1]} : vector<2x8x128xf32> to vector<2x8x32xf32>
    %236 = arith.truncf %235 : vector<2x8x32xf32> to vector<2x8x32xbf16>
    "tpu.trace_start"() <{level = 10 : i32, message = "bqd,bkd->bqk"}> : () -> ()
    %cst_89 = arith.constant dense<0.000000e+00> : vector<2x8x8xf32>
    %237 = tpu.matmul %232, %234, %cst_89 {dimension_numbers = #tpu.dot_dimension_numbers<[2], [2], [1], [1], [0, 0, 0, 1, 1, 1], [0], [0]>} : vector<2x8x32xbf16>, vector<2x8x32xbf16>, vector<2x8x8xf32> -> vector<2x8x8xf32>
    "tpu.trace_stop"() : () -> ()
    %cst_90 = arith.constant dense<0xFF800000> : vector<2x8xf32>
    %238 = vector.multi_reduction <maximumf>, %237, %cst_90 [2] : vector<2x8x8xf32> to vector<2x8xf32>
    %239 = vector.shape_cast %238 : vector<2x8xf32> to vector<2x8x1xf32>
    %240 = vector.broadcast %239 : vector<2x8x1xf32> to vector<2x8x8xf32>
    %241 = arith.subf %237, %240 : vector<2x8x8xf32>
    %242 = math.exp %241 : vector<2x8x8xf32>
    %cst_91 = arith.constant dense<0.000000e+00> : vector<2x8xf32>
    %243 = vector.multi_reduction <add>, %242, %cst_91 [2] : vector<2x8x8xf32> to vector<2x8xf32>
    %244 = vector.shape_cast %243 : vector<2x8xf32> to vector<2x8x1xf32>
    %245 = vector.broadcast %244 : vector<2x8x1xf32> to vector<2x8x8xf32>
    %246 = arith.divf %242, %245 : vector<2x8x8xf32>
    %247 = arith.truncf %246 : vector<2x8x8xf32> to vector<2x8x8xbf16>
    "tpu.trace_start"() <{level = 10 : i32, message = "bqk,bkd->bqd"}> : () -> ()
    %cst_92 = arith.constant dense<0.000000e+00> : vector<2x8x32xf32>
    %248 = tpu.matmul %247, %236, %cst_92 {dimension_numbers = #tpu.dot_dimension_numbers<[2], [1], [1], [2], [0, 0, 0, 1, 1, 2], [0], [0]>} : vector<2x8x8xbf16>, vector<2x8x32xbf16>, vector<2x8x32xf32> -> vector<2x8x32xf32>
    "tpu.trace_stop"() : () -> ()
    %249 = vector.extract_strided_slice %190 {offsets = [0, 0, 96], sizes = [2, 8, 32], strides = [1, 1, 1]} : vector<2x8x128xf32> to vector<2x8x32xf32>
    %250 = arith.truncf %249 : vector<2x8x32xf32> to vector<2x8x32xbf16>
    %251 = vector.extract_strided_slice %192 {offsets = [0, 0, 96], sizes = [2, 8, 32], strides = [1, 1, 1]} : vector<2x8x128xf32> to vector<2x8x32xf32>
    %252 = arith.truncf %251 : vector<2x8x32xf32> to vector<2x8x32xbf16>
    %253 = vector.extract_strided_slice %194 {offsets = [0, 0, 96], sizes = [2, 8, 32], strides = [1, 1, 1]} : vector<2x8x128xf32> to vector<2x8x32xf32>
    %254 = arith.truncf %253 : vector<2x8x32xf32> to vector<2x8x32xbf16>
    "tpu.trace_start"() <{level = 10 : i32, message = "bqd,bkd->bqk"}> : () -> ()
    %cst_93 = arith.constant dense<0.000000e+00> : vector<2x8x8xf32>
    %255 = tpu.matmul %250, %252, %cst_93 {dimension_numbers = #tpu.dot_dimension_numbers<[2], [2], [1], [1], [0, 0, 0, 1, 1, 1], [0], [0]>} : vector<2x8x32xbf16>, vector<2x8x32xbf16>, vector<2x8x8xf32> -> vector<2x8x8xf32>
    "tpu.trace_stop"() : () -> ()
    %cst_94 = arith.constant dense<0xFF800000> : vector<2x8xf32>
    %256 = vector.multi_reduction <maximumf>, %255, %cst_94 [2] : vector<2x8x8xf32> to vector<2x8xf32>
    %257 = vector.shape_cast %256 : vector<2x8xf32> to vector<2x8x1xf32>
    %258 = vector.broadcast %257 : vector<2x8x1xf32> to vector<2x8x8xf32>
    %259 = arith.subf %255, %258 : vector<2x8x8xf32>
    %260 = math.exp %259 : vector<2x8x8xf32>
    %cst_95 = arith.constant dense<0.000000e+00> : vector<2x8xf32>
    %261 = vector.multi_reduction <add>, %260, %cst_95 [2] : vector<2x8x8xf32> to vector<2x8xf32>
    %262 = vector.shape_cast %261 : vector<2x8xf32> to vector<2x8x1xf32>
    %263 = vector.broadcast %262 : vector<2x8x1xf32> to vector<2x8x8xf32>
    %264 = arith.divf %260, %263 : vector<2x8x8xf32>
    %265 = arith.truncf %264 : vector<2x8x8xf32> to vector<2x8x8xbf16>
    "tpu.trace_start"() <{level = 10 : i32, message = "bqk,bkd->bqd"}> : () -> ()
    %cst_96 = arith.constant dense<0.000000e+00> : vector<2x8x32xf32>
    %266 = tpu.matmul %265, %254, %cst_96 {dimension_numbers = #tpu.dot_dimension_numbers<[2], [1], [1], [2], [0, 0, 0, 1, 1, 2], [0], [0]>} : vector<2x8x8xbf16>, vector<2x8x32xbf16>, vector<2x8x32xf32> -> vector<2x8x32xf32>
    "tpu.trace_stop"() : () -> ()
    %267 = tpu.concatenate %212, %230, %248, %266 in 2 : vector<2x8x32xf32>, vector<2x8x32xf32>, vector<2x8x32xf32>, vector<2x8x32xf32> -> vector<2x8x128xf32>
    %268 = vector.shape_cast %267 : vector<2x8x128xf32> to vector<16x128xf32>
    %269 = arith.truncf %268 : vector<16x128xf32> to vector<16x128xbf16>
    %c1_97 = arith.constant 1 : index
    %c0_98 = arith.constant 0 : index
    %c0_99 = arith.constant 0 : index
    %270 = vector.load %arg7[%c1_97, %c0_98, %c0_99] : memref<2x128x128xbf16, #tpu.memory_space<vmem>>, vector<1x128x128xbf16>
    %271 = vector.shape_cast %270 : vector<1x128x128xbf16> to vector<128x128xbf16>
    %cst_100 = arith.constant dense<0.000000e+00> : vector<16x128xf32>
    %272 = tpu.matmul %269, %271, %cst_100 {dimension_numbers = #tpu.dot_dimension_numbers<[1], [0], [0], [1], [0, 0, 1, 1], [], []>} : vector<16x128xbf16>, vector<128x128xbf16>, vector<16x128xf32> -> vector<16x128xf32>
    %c1_101 = arith.constant 1 : index
    %c0_102 = arith.constant 0 : index
    %c0_103 = arith.constant 0 : index
    %273 = vector.load %arg8[%c1_101, %c0_102, %c0_103] : memref<2x1x128xf32, #tpu.memory_space<vmem>>, vector<1x1x128xf32>
    %274 = vector.shape_cast %273 : vector<1x1x128xf32> to vector<1x128xf32>
    %275 = vector.broadcast %274 : vector<1x128xf32> to vector<16x128xf32>
    %276 = arith.addf %272, %275 : vector<16x128xf32>
    %277 = arith.addf %180, %276 : vector<16x128xf32>
    %cst_104 = arith.constant dense<0.000000e+00> : vector<16xf32>
    %278 = vector.multi_reduction <add>, %277, %cst_104 [1] : vector<16x128xf32> to vector<16xf32>
    %279 = vector.shape_cast %278 : vector<16xf32> to vector<16x1xf32>
    %cst_105 = arith.constant 1.280000e+02 : f32
    %280 = vector.broadcast %cst_105 : f32 to vector<16x1xf32>
    %281 = arith.divf %279, %280 : vector<16x1xf32>
    %282 = vector.broadcast %281 : vector<16x1xf32> to vector<16x128xf32>
    %283 = arith.subf %277, %282 : vector<16x128xf32>
    %284 = arith.mulf %283, %283 : vector<16x128xf32>
    %cst_106 = arith.constant dense<0.000000e+00> : vector<16xf32>
    %285 = vector.multi_reduction <add>, %284, %cst_106 [1] : vector<16x128xf32> to vector<16xf32>
    %286 = vector.shape_cast %285 : vector<16xf32> to vector<16x1xf32>
    %cst_107 = arith.constant 1.280000e+02 : f32
    %287 = vector.broadcast %cst_107 : f32 to vector<16x1xf32>
    %288 = arith.divf %286, %287 : vector<16x1xf32>
    %289 = vector.broadcast %281 : vector<16x1xf32> to vector<16x128xf32>
    %290 = arith.subf %277, %289 : vector<16x128xf32>
    %cst_108 = arith.constant 9.99999974E-6 : f32
    %291 = vector.broadcast %cst_108 : f32 to vector<16x1xf32>
    %292 = arith.addf %288, %291 : vector<16x1xf32>
    %293 = math.rsqrt %292 : vector<16x1xf32>
    %294 = vector.broadcast %293 : vector<16x1xf32> to vector<16x128xf32>
    %295 = arith.mulf %290, %294 : vector<16x128xf32>
    %c1_109 = arith.constant 1 : index
    %c0_110 = arith.constant 0 : index
    %c0_111 = arith.constant 0 : index
    %296 = vector.load %arg9[%c1_109, %c0_110, %c0_111] : memref<2x1x128xf32, #tpu.memory_space<vmem>>, vector<1x1x128xf32>
    %297 = vector.shape_cast %296 : vector<1x1x128xf32> to vector<1x128xf32>
    %298 = vector.broadcast %297 : vector<1x128xf32> to vector<16x128xf32>
    %299 = arith.mulf %295, %298 : vector<16x128xf32>
    %c1_112 = arith.constant 1 : index
    %c0_113 = arith.constant 0 : index
    %c0_114 = arith.constant 0 : index
    %300 = vector.load %arg10[%c1_112, %c0_113, %c0_114] : memref<2x1x128xf32, #tpu.memory_space<vmem>>, vector<1x1x128xf32>
    %301 = vector.shape_cast %300 : vector<1x1x128xf32> to vector<1x128xf32>
    %302 = vector.broadcast %301 : vector<1x128xf32> to vector<16x128xf32>
    %303 = arith.addf %299, %302 : vector<16x128xf32>
    %304 = arith.truncf %303 : vector<16x128xf32> to vector<16x128xbf16>
    %c1_115 = arith.constant 1 : index
    %c0_116 = arith.constant 0 : index
    %c0_117 = arith.constant 0 : index
    %305 = vector.load %arg11[%c1_115, %c0_116, %c0_117] : memref<2x128x256xbf16, #tpu.memory_space<vmem>>, vector<1x128x256xbf16>
    %306 = vector.shape_cast %305 : vector<1x128x256xbf16> to vector<128x256xbf16>
    %cst_118 = arith.constant dense<0.000000e+00> : vector<16x256xf32>
    %307 = tpu.matmul %304, %306, %cst_118 {dimension_numbers = #tpu.dot_dimension_numbers<[1], [0], [0], [1], [0, 0, 1, 1], [], []>} : vector<16x128xbf16>, vector<128x256xbf16>, vector<16x256xf32> -> vector<16x256xf32>
    %c1_119 = arith.constant 1 : index
    %c0_120 = arith.constant 0 : index
    %c0_121 = arith.constant 0 : index
    %308 = vector.load %arg12[%c1_119, %c0_120, %c0_121] : memref<2x1x256xf32, #tpu.memory_space<vmem>>, vector<1x1x256xf32>
    %309 = vector.shape_cast %308 : vector<1x1x256xf32> to vector<1x256xf32>
    %310 = vector.broadcast %309 : vector<1x256xf32> to vector<16x256xf32>
    %311 = arith.addf %307, %310 : vector<16x256xf32>
    %cst_122 = arith.constant 0.000000e+00 : f32
    %312 = vector.broadcast %cst_122 : f32 to vector<16x256xf32>
    %313 = arith.maximumf %311, %312 : vector<16x256xf32>
    %314 = arith.truncf %313 : vector<16x256xf32> to vector<16x256xbf16>
    %c1_123 = arith.constant 1 : index
    %c0_124 = arith.constant 0 : index
    %c0_125 = arith.constant 0 : index
    %315 = vector.load %arg13[%c1_123, %c0_124, %c0_125] : memref<2x256x128xbf16, #tpu.memory_space<vmem>>, vector<1x256x128xbf16>
    %316 = vector.shape_cast %315 : vector<1x256x128xbf16> to vector<256x128xbf16>
    %cst_126 = arith.constant dense<0.000000e+00> : vector<16x128xf32>
    %317 = tpu.matmul %314, %316, %cst_126 {dimension_numbers = #tpu.dot_dimension_numbers<[1], [0], [0], [1], [0, 0, 1, 1], [], []>} : vector<16x256xbf16>, vector<256x128xbf16>, vector<16x128xf32> -> vector<16x128xf32>
    %c1_127 = arith.constant 1 : index
    %c0_128 = arith.constant 0 : index
    %c0_129 = arith.constant 0 : index
    %318 = vector.load %arg14[%c1_127, %c0_128, %c0_129] : memref<2x1x128xf32, #tpu.memory_space<vmem>>, vector<1x1x128xf32>
    %319 = vector.shape_cast %318 : vector<1x1x128xf32> to vector<1x128xf32>
    %320 = vector.broadcast %319 : vector<1x128xf32> to vector<16x128xf32>
    %321 = arith.addf %317, %320 : vector<16x128xf32>
    %322 = arith.addf %303, %321 : vector<16x128xf32>
    %cst_130 = arith.constant dense<0.000000e+00> : vector<16xf32>
    %323 = vector.multi_reduction <add>, %322, %cst_130 [1] : vector<16x128xf32> to vector<16xf32>
    %324 = vector.shape_cast %323 : vector<16xf32> to vector<16x1xf32>
    %cst_131 = arith.constant 1.280000e+02 : f32
    %325 = vector.broadcast %cst_131 : f32 to vector<16x1xf32>
    %326 = arith.divf %324, %325 : vector<16x1xf32>
    %327 = vector.broadcast %326 : vector<16x1xf32> to vector<16x128xf32>
    %328 = arith.subf %322, %327 : vector<16x128xf32>
    %329 = arith.mulf %328, %328 : vector<16x128xf32>
    %cst_132 = arith.constant dense<0.000000e+00> : vector<16xf32>
    %330 = vector.multi_reduction <add>, %329, %cst_132 [1] : vector<16x128xf32> to vector<16xf32>
    %331 = vector.shape_cast %330 : vector<16xf32> to vector<16x1xf32>
    %cst_133 = arith.constant 1.280000e+02 : f32
    %332 = vector.broadcast %cst_133 : f32 to vector<16x1xf32>
    %333 = arith.divf %331, %332 : vector<16x1xf32>
    %334 = vector.broadcast %326 : vector<16x1xf32> to vector<16x128xf32>
    %335 = arith.subf %322, %334 : vector<16x128xf32>
    %cst_134 = arith.constant 9.99999974E-6 : f32
    %336 = vector.broadcast %cst_134 : f32 to vector<16x1xf32>
    %337 = arith.addf %333, %336 : vector<16x1xf32>
    %338 = math.rsqrt %337 : vector<16x1xf32>
    %339 = vector.broadcast %338 : vector<16x1xf32> to vector<16x128xf32>
    %340 = arith.mulf %335, %339 : vector<16x128xf32>
    %c1_135 = arith.constant 1 : index
    %c0_136 = arith.constant 0 : index
    %c0_137 = arith.constant 0 : index
    %341 = vector.load %arg15[%c1_135, %c0_136, %c0_137] : memref<2x1x128xf32, #tpu.memory_space<vmem>>, vector<1x1x128xf32>
    %342 = vector.shape_cast %341 : vector<1x1x128xf32> to vector<1x128xf32>
    %343 = vector.broadcast %342 : vector<1x128xf32> to vector<16x128xf32>
    %344 = arith.mulf %340, %343 : vector<16x128xf32>
    %c1_138 = arith.constant 1 : index
    %c0_139 = arith.constant 0 : index
    %c0_140 = arith.constant 0 : index
    %345 = vector.load %arg16[%c1_138, %c0_139, %c0_140] : memref<2x1x128xf32, #tpu.memory_space<vmem>>, vector<1x1x128xf32>
    %346 = vector.shape_cast %345 : vector<1x1x128xf32> to vector<1x128xf32>
    %347 = vector.broadcast %346 : vector<1x128xf32> to vector<16x128xf32>
    %348 = arith.addf %344, %347 : vector<16x128xf32>
    %349 = vector.shape_cast %348 : vector<16x128xf32> to vector<2x8x128xf32>
    %350 = vector.extract_strided_slice %349 {offsets = [0, 7, 0], sizes = [2, 1, 128], strides = [1, 1, 1]} : vector<2x8x128xf32> to vector<2x1x128xf32>
    %351 = vector.shape_cast %350 : vector<2x1x128xf32> to vector<2x128xf32>
    %c0_141 = arith.constant 0 : index
    %c0_142 = arith.constant 0 : index
    %352 = vector.load %arg17[%c0_141, %c0_142] : memref<128x128xf32, #tpu.memory_space<vmem>>, vector<128x128xf32>
    %cst_143 = arith.constant dense<0.000000e+00> : vector<2x128xf32>
    %353 = tpu.matmul %351, %352, %cst_143 {dimension_numbers = #tpu.dot_dimension_numbers<[1], [0], [0], [1], [0, 0, 1, 1], [], []>} : vector<2x128xf32>, vector<128x128xf32>, vector<2x128xf32> -> vector<2x128xf32>
    %c0_144 = arith.constant 0 : index
    %c0_145 = arith.constant 0 : index
    %354 = vector.load %arg18[%c0_144, %c0_145] : memref<1x128xf32, #tpu.memory_space<vmem>>, vector<1x128xf32>
    %355 = vector.broadcast %354 : vector<1x128xf32> to vector<2x128xf32>
    %356 = arith.addf %353, %355 : vector<2x128xf32>
    %357 = vector.shape_cast %356 : vector<2x128xf32> to vector<2x1x128xf32>
    %c0_146 = arith.constant 0 : index
    %c0_147 = arith.constant 0 : index
    %c0_148 = arith.constant 0 : index
    %358 = vector.load %arg19[%c0_146, %c0_147, %c0_148] : memref<2x1x128xf32, #tpu.memory_space<vmem>>, vector<2x1x128xf32>
    tpu.vector_store %arg19[%c0_146, %c0_147, %c0_148], %357 {strides = array<i32>} : memref<2x1x128xf32, #tpu.memory_space<vmem>>, vector<2x1x128xf32>,
    return
  }
  func.func @transform_0(%arg0: i32) -> (i32, i32, i32) {
    %c0_i32 = arith.constant 0 : i32
    %c0_i32_0 = arith.constant 0 : i32
    %c0_i32_1 = arith.constant 0 : i32
    return %arg0, %c0_i32, %c0_i32_0 : i32, i32, i32
  }
  func.func @transform_1(%arg0: i32) -> (i32, i32) {
    %c0_i32 = arith.constant 0 : i32
    %c0_i32_0 = arith.constant 0 : i32
    %c0_i32_1 = arith.constant 0 : i32
    return %c0_i32, %c0_i32_0 : i32, i32
  }
  func.func @transform_2(%arg0: i32) -> (i32, i32) {
    %c0_i32 = arith.constant 0 : i32
    %c0_i32_0 = arith.constant 0 : i32
    %c0_i32_1 = arith.constant 0 : i32
    return %c0_i32, %c0_i32_0 : i32, i32
  }
  func.func @transform_3(%arg0: i32) -> (i32, i32) {
    %c0_i32 = arith.constant 0 : i32
    %c0_i32_0 = arith.constant 0 : i32
    %c0_i32_1 = arith.constant 0 : i32
    return %c0_i32, %c0_i32_0 : i32, i32
  }
  func.func @transform_4(%arg0: i32) -> (i32, i32, i32) {
    %c0_i32 = arith.constant 0 : i32
    %c0_i32_0 = arith.constant 0 : i32
    %c0_i32_1 = arith.constant 0 : i32
    %c0_i32_2 = arith.constant 0 : i32
    return %c0_i32, %c0_i32_0, %c0_i32_1 : i32, i32, i32
  }
  func.func @transform_5(%arg0: i32) -> (i32, i32, i32) {
    %c0_i32 = arith.constant 0 : i32
    %c0_i32_0 = arith.constant 0 : i32
    %c0_i32_1 = arith.constant 0 : i32
    %c0_i32_2 = arith.constant 0 : i32
    return %c0_i32, %c0_i32_0, %c0_i32_1 : i32, i32, i32
  }
  func.func @transform_6(%arg0: i32) -> (i32, i32, i32) {
    %c0_i32 = arith.constant 0 : i32
    %c0_i32_0 = arith.constant 0 : i32
    %c0_i32_1 = arith.constant 0 : i32
    %c0_i32_2 = arith.constant 0 : i32
    return %c0_i32, %c0_i32_0, %c0_i32_1 : i32, i32, i32
  }
  func.func @transform_7(%arg0: i32) -> (i32, i32, i32) {
    %c0_i32 = arith.constant 0 : i32
    %c0_i32_0 = arith.constant 0 : i32
    %c0_i32_1 = arith.constant 0 : i32
    %c0_i32_2 = arith.constant 0 : i32
    return %c0_i32, %c0_i32_0, %c0_i32_1 : i32, i32, i32
  }
  func.func @transform_8(%arg0: i32) -> (i32, i32, i32) {
    %c0_i32 = arith.constant 0 : i32
    %c0_i32_0 = arith.constant 0 : i32
    %c0_i32_1 = arith.constant 0 : i32
    %c0_i32_2 = arith.constant 0 : i32
    return %c0_i32, %c0_i32_0, %c0_i32_1 : i32, i32, i32
  }
  func.func @transform_9(%arg0: i32) -> (i32, i32, i32) {
    %c0_i32 = arith.constant 0 : i32
    %c0_i32_0 = arith.constant 0 : i32
    %c0_i32_1 = arith.constant 0 : i32
    %c0_i32_2 = arith.constant 0 : i32
    return %c0_i32, %c0_i32_0, %c0_i32_1 : i32, i32, i32
  }
  func.func @transform_10(%arg0: i32) -> (i32, i32, i32) {
    %c0_i32 = arith.constant 0 : i32
    %c0_i32_0 = arith.constant 0 : i32
    %c0_i32_1 = arith.constant 0 : i32
    %c0_i32_2 = arith.constant 0 : i32
    return %c0_i32, %c0_i32_0, %c0_i32_1 : i32, i32, i32
  }
  func.func @transform_11(%arg0: i32) -> (i32, i32, i32) {
    %c0_i32 = arith.constant 0 : i32
    %c0_i32_0 = arith.constant 0 : i32
    %c0_i32_1 = arith.constant 0 : i32
    %c0_i32_2 = arith.constant 0 : i32
    return %c0_i32, %c0_i32_0, %c0_i32_1 : i32, i32, i32
  }
  func.func @transform_12(%arg0: i32) -> (i32, i32, i32) {
    %c0_i32 = arith.constant 0 : i32
    %c0_i32_0 = arith.constant 0 : i32
    %c0_i32_1 = arith.constant 0 : i32
    %c0_i32_2 = arith.constant 0 : i32
    return %c0_i32, %c0_i32_0, %c0_i32_1 : i32, i32, i32
  }
  func.func @transform_13(%arg0: i32) -> (i32, i32, i32) {
    %c0_i32 = arith.constant 0 : i32
    %c0_i32_0 = arith.constant 0 : i32
    %c0_i32_1 = arith.constant 0 : i32
    %c0_i32_2 = arith.constant 0 : i32
    return %c0_i32, %c0_i32_0, %c0_i32_1 : i32, i32, i32
  }
  func.func @transform_14(%arg0: i32) -> (i32, i32, i32) {
    %c0_i32 = arith.constant 0 : i32
    %c0_i32_0 = arith.constant 0 : i32
    %c0_i32_1 = arith.constant 0 : i32
    %c0_i32_2 = arith.constant 0 : i32
    return %c0_i32, %c0_i32_0, %c0_i32_1 : i32, i32, i32
  }
  func.func @transform_15(%arg0: i32) -> (i32, i32, i32) {
    %c0_i32 = arith.constant 0 : i32
    %c0_i32_0 = arith.constant 0 : i32
    %c0_i32_1 = arith.constant 0 : i32
    %c0_i32_2 = arith.constant 0 : i32
    return %c0_i32, %c0_i32_0, %c0_i32_1 : i32, i32, i32
  }
  func.func @transform_16(%arg0: i32) -> (i32, i32) {
    %c0_i32 = arith.constant 0 : i32
    %c0_i32_0 = arith.constant 0 : i32
    %c0_i32_1 = arith.constant 0 : i32
    return %c0_i32, %c0_i32_0 : i32, i32
  }
  func.func @transform_17(%arg0: i32) -> (i32, i32) {
    %c0_i32 = arith.constant 0 : i32
    %c0_i32_0 = arith.constant 0 : i32
    %c0_i32_1 = arith.constant 0 : i32
    return %c0_i32, %c0_i32_0 : i32, i32
  }
  func.func @transform_18(%arg0: i32) -> (i32, i32, i32) {
    %c0_i32 = arith.constant 0 : i32
    %c0_i32_0 = arith.constant 0 : i32
    %c0_i32_1 = arith.constant 0 : i32
    return %arg0, %c0_i32, %c0_i32_0 : i32, i32, i32
  }
}

</mosaic_0001>

<bundles_post_ra>
// kernel: bayesian_transformer_quantile_forward.1
= control target key start
LH: loop header
LB: loop body
LE: loop exit
PB: predicated region body
PF: predicated region fallthrough
CT: control target
= control target key end

     0   :  { %s7417_s0 = inlined_call_operand.vmem [shape: f32[4,8,4], index: 0, kind: input, shape index: {}]   ;;  %s7418_s1 = inlined_call_operand.hbm [shape: f32[5000,128], index: 1, kind: input, shape index: {}]   ;;  %s7419_s2 = inlined_call_operand.hbm [shape: bf16[4,128], index: 2, kind: input, shape index: {}]   ;;  %s7420_s3 = inlined_call_operand.hbm [shape: f32[1,128], index: 3, kind: input, shape index: {}]   ;;  %s7421_s4 = inlined_call_operand.hbm [shape: bf16[2,128,384], index: 4, kind: input, shape index: {}]   ;;  %s7422_s5 = inlined_call_operand.hbm [shape: f32[2,1,384], index: 5, kind: input, shape index: {}]   ;;  %s7423_s6 = inlined_call_operand.hbm [shape: bf16[2,128,128], index: 6, kind: input, shape index: {}]   ;;  %s7424_s7 = inlined_call_operand.hbm [shape: f32[2,1,128], index: 7, kind: input, shape index: {}]   ;;  %s7425_s8 = inlined_call_operand.hbm [shape: f32[2,1,128], index: 8, kind: input, shape index: {}]   ;;  %s7426_s9 = inlined_call_operand.hbm [shape: f32[2,1,128], index: 9, kind: input, shape index: {}]   ;;  %s7427_s10 = inlined_call_operand.hbm [shape: bf16[2,128,256], index: 10, kind: input, shape index: {}]   ;;  %s7428_s11 = inlined_call_operand.hbm [shape: f32[2,1,256], index: 11, kind: input, shape index: {}]   ;;  %s7429_s12 = inlined_call_operand.hbm [shape: bf16[2,256,128], index: 12, kind: input, shape index: {}]   ;;  %s7430_s13 = inlined_call_operand.hbm [shape: f32[2,1,128], index: 13, kind: input, shape index: {}]   ;;  %s7431_s14 = inlined_call_operand.hbm [shape: f32[2,1,128], index: 14, kind: input, shape index: {}]   ;;  %s7432_s15 = inlined_call_operand.hbm [shape: f32[2,1,128], index: 15, kind: input, shape index: {}]   ;;  %s7433_s16 = inlined_call_operand.hbm [shape: f32[128,128], index: 16, kind: input, shape index: {}]   ;;  %s7434_s17 = inlined_call_operand.hbm [shape: f32[1,128], index: 17, kind: input, shape index: {}]   ;;  %s7435_s18 = inlined_call_operand.vmem [shape: f32[4,1,128], index: 18, kind: output, shape index: {}]  }
   0x1   :  { %7454 = sst [smem:[#allocation39_spill]] %s7417_s0 }
   0x2   :  { %7455 = sst [smem:[#allocation40_spill]] %s7418_s1 }
   0x3   :  { %7456 = sst [smem:[#allocation41_spill]] %s7419_s2 }
   0x4   :  { %7457 = sst [smem:[#allocation42_spill]] %s7420_s3 }
   0x5   :  { %7458 = sst [smem:[#allocation43_spill]] %s7421_s4 }
   0x6   :  { %7459 = sst [smem:[#allocation44_spill]] %s7423_s6 }
   0x7   :  { %7460 = sst [smem:[#allocation45_spill]] %s7425_s8 }
   0x8   :  { %7461 = sst [smem:[#allocation46_spill]] %s7427_s10 }
   0x9   :  { %7462 = sst [smem:[#allocation47_spill]] %s7429_s12 }
   0xa   :  { %7463 = sst [smem:[#allocation48_spill]] %s7435_s18 }
   0xb   :  { %23 = vsyncpa [#allocation3], 0 }
   0xc   :  { %24 = vsyncpa [#allocation5], 0 }
   0xd   :  { %25 = vsyncpa [#allocation8], 0 }
   0xe   :  { %26 = vsyncpa [#allocation11], 0 }
   0xf   :  { %27 = vsyncpa [#allocation14], 0 }
  0x10   :  { %28 = vsyncpa [#allocation17], 0 }
  0x11   :  { %29 = vsyncpa [#allocation20], 0 }
  0x12   :  { %30 = vsyncpa [#allocation23], 0 }
  0x13   :  { %31 = vsyncpa [#allocation26], 0  ;;  %s6495_s27 = smov 0  }
  0x14 LB: > { %7464 = sst [smem:[#allocation37_spill]] %s6361_s27  ;;  %s6363_s28 = smov [#allocation4]   ;;  %s6361_s27 = sphi %s6495_s27, %s37_s27  }
  0x15   : > { %s475_s29 = sshll.u32 %s6363_s28, 4  ;;  %s7438_s30 = sadd.s32 4294967295, %s6361_s27   ;;  %s476_s29 = int_to_ptr.vmem [resolvable:$true] %s475_s29 }
  0x16   : > { %p4653_p0 = scmp.ge.s32.totalorder %s6361_s27, 1  ;;  %p451_p1 = scmp.lt.s32.totalorder %s6361_s27, 3 }
  0x17   : > { %p6505_p2 = scmp.eq.s32.totalorder %s7438_s30, 0  ;;  %s6364_s1 = smov [#allocation7]  }
  0x18   : > { %p6509_p3 = pnand %p4653_p0, %p451_p1  ;;  %s496_s20 = sshll.u32 %s6364_s1, 4  ;;  %s6515_s20 = int_to_ptr.vmem [resolvable:$true] %s496_s20 }
  0x19   : > { %s7465_s0 = scalar_select %p6505_p2, 1, 0 }
  0x1a   : > { %s7467_s19 = scalar_select %p6509_p3, 1, 0 }
  0x1b   : > { %7466 = sst [smem:[#allocation38_spill]] %s7465_s0  ;;  %p5442_p4 = pneg %p6509_p3 }
  0x1c   : > { %s6365_s22 = smov [#allocation10]   ;;  %s7469_s25 = sld [smem:[#allocation41_spill]] }
  0x1d   : > { %p6519_p5 = pnand %p6505_p2, %p5442_p4  ;;  %s522_s2 = sshll.u32 %s6365_s22, 4  ;;  %s6523_s2 = int_to_ptr.vmem [resolvable:$true] %s522_s2 }
  0x1f   : > { %p6533_p7 = pneg %p6519_p5 }
  0x22   : > { %s5843_s26 = scalar_lea.hbm %s7469_s25, 32 }
  0x23   : > { %p5844_p6 = scmp.ne.s32.totalorder %s7469_s25, %s5843_s26  ;;  %p5850_p10 = scmp.lt.u32.totalorder %s5843_s26, %s7469_s25 }
  0x25   : > { %p5846_p8 = pnand %p6533_p7, %p5844_p6 }
  0x27   : > { %p5847_p9 = pneg %p5846_p8 }
  0x29   : > { %p5852_p11 = pnand %p5850_p10, %p5847_p9 }
  0x2b   : > { %5855 = shalt.err (!%p5852_p11)
}
  0x2c   : > { %s5856_s23 = scalar_lea.vmem %s476_s29, 32  ;;  %p5864_p1 = scmp.lt.s32.totalorder %s476_s29, %s476_s29 }
  0x2d   : > { %p5857_p12 = scmp.ne.s32.totalorder %s476_s29, %s5856_s23  ;;  %p5865_p4 = scmp.lt.s32.totalorder %s5856_s23, %s5856_s23 }
  0x2f   : > { %p5859_p13 = pnand %p5857_p12, %p6533_p7  ;;  %p5866_p2 = por %p5865_p4, %p5864_p1 }
  0x31   : > { %p5860_p0 = pneg %p5859_p13 }
  0x33   : > { %p5867_p3 = pnand %p5866_p2, %p5860_p0 }
  0x35   : > { %5870 = shalt.err (!%p5867_p3)
}
  0x36   : > { %5448 = dma.hbm_to_vmem [thread:$0]  (!%p6519_p5), %s7469_s25, 32, %s476_s29, [#allocation5]  }
  0x37   : > { %s7471_s4 = sld [smem:[#allocation43_spill]] }
  0x3d   : > { %s5871_s1 = scalar_lea.hbm %s7471_s4, 6144 }
  0x3e   : > { %p5872_p6 = scmp.ne.s32.totalorder %s7471_s4, %s5871_s1  ;;  %p5878_p2 = scmp.lt.u32.totalorder %s5871_s1, %s7471_s4 }
  0x40   : > { %p5874_p8 = pnand %p5872_p6, %p6533_p7 }
  0x42   : > { %p5875_p9 = pneg %p5874_p8 }
  0x44   : > { %p5880_p3 = pnand %p5878_p2, %p5875_p9 }
  0x46   : > { %5883 = shalt.err (!%p5880_p3)
}
  0x47   : > { %s5884_s29 = scalar_lea.vmem %s6515_s20, 6144  ;;  %p5892_p13 = scmp.lt.s32.totalorder %s6515_s20, %s6515_s20 }
  0x48   : > { %p5885_p10 = scmp.ne.s32.totalorder %s6515_s20, %s5884_s29  ;;  %p5893_p0 = scmp.lt.s32.totalorder %s5884_s29, %s5884_s29 }
  0x4a   : > { %p5887_p11 = pnand %p5885_p10, %p6533_p7  ;;  %p5894_p1 = por %p5893_p0, %p5892_p13 }
  0x4c   : > { %p5888_p12 = pneg %p5887_p11 }
  0x4e   : > { %p5895_p4 = pnand %p5894_p1, %p5888_p12 }
  0x50   : > { %5898 = shalt.err (!%p5895_p4)
}
  0x51   : > { %s6366_s27 = smov 192   ;;  %s6367_s0 = smov 12  }
  0x52   : > { %5454 = dma.hbm_to_vmem [thread:$0]  (!%p6519_p5), %s7471_s4, 6144, %s6515_s20, [#allocation8], %s6366_s27, %s6366_s27, %s6367_s0  }
  0x53   : > { %s7472_s6 = sld [smem:[#allocation44_spill]] }
  0x59   : > { %s5899_s1 = scalar_lea.hbm %s7472_s6, 2048 }
  0x5a   : > { %p5900_p6 = scmp.ne.s32.totalorder %s7472_s6, %s5899_s1  ;;  %p5906_p2 = scmp.lt.u32.totalorder %s5899_s1, %s7472_s6 }
  0x5c   : > { %p5902_p8 = pnand %p5900_p6, %p6533_p7 }
  0x5e   : > { %p5903_p9 = pneg %p5902_p8 }
  0x60   : > { %p5908_p3 = pnand %p5906_p2, %p5903_p9 }
  0x62   : > { %5911 = shalt.err (!%p5908_p3)
}
  0x63   : > { %s5912_s20 = scalar_lea.vmem %s6523_s2, 2048  ;;  %p5920_p13 = scmp.lt.s32.totalorder %s6523_s2, %s6523_s2 }
  0x64   : > { %p5913_p10 = scmp.ne.s32.totalorder %s6523_s2, %s5912_s20  ;;  %p5921_p0 = scmp.lt.s32.totalorder %s5912_s20, %s5912_s20 }
  0x66   : > { %p5915_p11 = pnand %p5913_p10, %p6533_p7  ;;  %p5922_p1 = por %p5921_p0, %p5920_p13 }
  0x68   : > { %p5916_p12 = pneg %p5915_p11 }
  0x6a   : > { %p5923_p4 = pnand %p5922_p1, %p5916_p12 }
  0x6c   : > { %5926 = shalt.err (!%p5923_p4)
}
  0x6d   : > { %s7446_s27 = smov 64   ;;  %s7451_s25 = smov 4  }
  0x6e   : > { %5460 = dma.hbm_to_vmem [thread:$0]  (!%p6519_p5), %s7472_s6, 2048, %s6523_s2, [#allocation11], %s7446_s27, %s7446_s27, %s7451_s25  }
  0x6f   : > { %s6370_s28 = smov [#allocation13]   ;;  %s6371_s26 = smov [#allocation16]  }
  0x70   : > { %s548_s18 = sshll.u32 %s6370_s28, 4  ;;  %s574_s1 = sshll.u32 %s6371_s26, 4  ;;  %s549_s18 = int_to_ptr.vmem [resolvable:$true] %s548_s18  ;;  %s6598_s1 = int_to_ptr.vmem [resolvable:$true] %s574_s1 }
  0x71   : > { %s7473_s8 = sld [smem:[#allocation45_spill]] }
  0x77   : > { %s5927_s29 = scalar_lea.hbm %s7473_s8, 32 }
  0x78   : > { %p5928_p6 = scmp.ne.s32.totalorder %s7473_s8, %s5927_s29  ;;  %p5934_p2 = scmp.lt.u32.totalorder %s5927_s29, %s7473_s8 }
  0x7a   : > { %p5930_p8 = pnand %p5928_p6, %p6533_p7 }
  0x7c   : > { %p5931_p9 = pneg %p5930_p8 }
  0x7e   : > { %p5936_p3 = pnand %p5934_p2, %p5931_p9 }
  0x80   : > { %5939 = shalt.err (!%p5936_p3)
}
  0x81   : > { %s5940_s24 = scalar_lea.vmem %s549_s18, 32  ;;  %p5948_p13 = scmp.lt.s32.totalorder %s549_s18, %s549_s18 }
  0x82   : > { %p5941_p10 = scmp.ne.s32.totalorder %s549_s18, %s5940_s24  ;;  %p5949_p0 = scmp.lt.s32.totalorder %s5940_s24, %s5940_s24 }
  0x84   : > { %p5943_p11 = pnand %p5941_p10, %p6533_p7  ;;  %p5950_p1 = por %p5949_p0, %p5948_p13 }
  0x86   : > { %p5944_p12 = pneg %p5943_p11 }
  0x88   : > { %p5951_p4 = pnand %p5950_p1, %p5944_p12 }
  0x8a   : > { %5954 = shalt.err (!%p5951_p4)
}
  0x8b   : > { %s7447_s4 = smov 16   ;;  %s7449_s28 = smov 1  }
  0x8c   : > { %5466 = dma.hbm_to_vmem [thread:$0]  (!%p6519_p5), %s7473_s8, 32, %s549_s18, [#allocation14], %s7447_s4, %s7447_s4, %s7449_s28  }
  0x8d   : > { %s7474_s10 = sld [smem:[#allocation46_spill]] }
  0x93   : > { %s5955_s20 = scalar_lea.hbm %s7474_s10, 4096 }
  0x94   : > { %p5956_p6 = scmp.ne.s32.totalorder %s7474_s10, %s5955_s20  ;;  %p5962_p2 = scmp.lt.u32.totalorder %s5955_s20, %s7474_s10 }
  0x96   : > { %p5958_p8 = pnand %p5956_p6, %p6533_p7 }
  0x98   : > { %p5959_p9 = pneg %p5958_p8 }
  0x9a   : > { %p5964_p3 = pnand %p5962_p2, %p5959_p9 }
  0x9c   : > { %5967 = shalt.err (!%p5964_p3)
}
  0x9d   : > { %s5968_s18 = scalar_lea.vmem %s6598_s1, 4096  ;;  %p5976_p13 = scmp.lt.s32.totalorder %s6598_s1, %s6598_s1 }
  0x9e   : > { %p5969_p10 = scmp.ne.s32.totalorder %s6598_s1, %s5968_s18  ;;  %p5977_p0 = scmp.lt.s32.totalorder %s5968_s18, %s5968_s18 }
  0xa0   : > { %p5971_p11 = pnand %p5969_p10, %p6533_p7  ;;  %p5978_p1 = por %p5977_p0, %p5976_p13 }
  0xa2   : > { %p5972_p12 = pneg %p5971_p11 }
  0xa4   : > { %p5979_p4 = pnand %p5978_p1, %p5972_p12 }
  0xa6   : > { %5982 = shalt.err (!%p5979_p4)
}
  0xa7   : > { %s7452_s26 = smov 128   ;;  %s7453_s27 = smov 8  }
  0xa8   : > { %5472 = dma.hbm_to_vmem [thread:$0]  (!%p6519_p5), %s7474_s10, 4096, %s6598_s1, [#allocation17], %s7452_s26, %s7452_s26, %s7453_s27  }
  0xa9   : > { %s6376_s29 = smov [#allocation19]   ;;  %s6377_s0 = smov [#allocation22]  }
  0xaa   : > { %s600_s20 = sshll.u32 %s6376_s29, 4  ;;  %s626_s2 = sshll.u32 %s6377_s0, 4  ;;  %s601_s20 = int_to_ptr.vmem [resolvable:$true] %s600_s20  ;;  %s6647_s2 = int_to_ptr.vmem [resolvable:$true] %s626_s2 }
  0xab   : > { %s7475_s12 = sld [smem:[#allocation47_spill]] }
  0xb1   : > { %s5983_s4 = scalar_lea.hbm %s7475_s12, 4096 }
  0xb2   : > { %p5984_p6 = scmp.ne.s32.totalorder %s7475_s12, %s5983_s4  ;;  %p5990_p2 = scmp.lt.u32.totalorder %s5983_s4, %s7475_s12 }
  0xb4   : > { %p5986_p8 = pnand %p5984_p6, %p6533_p7 }
  0xb6   : > { %p5987_p9 = pneg %p5986_p8 }
  0xb8   : > { %p5992_p3 = pnand %p5990_p2, %p5987_p9 }
  0xba   : > { %5995 = shalt.err (!%p5992_p3)
}
  0xbb   : > { %s5996_s23 = scalar_lea.vmem %s601_s20, 4096  ;;  %p6004_p13 = scmp.lt.s32.totalorder %s601_s20, %s601_s20 }
  0xbc   : > { %p5997_p10 = scmp.ne.s32.totalorder %s601_s20, %s5996_s23  ;;  %p6005_p0 = scmp.lt.s32.totalorder %s5996_s23, %s5996_s23 }
  0xbe   : > { %p5999_p11 = pnand %p5997_p10, %p6533_p7  ;;  %p6006_p1 = por %p6005_p0, %p6004_p13 }
  0xc0   : > { %p6000_p12 = pneg %p5999_p11 }
  0xc2   : > { %p6007_p4 = pnand %p6006_p1, %p6000_p12 }
  0xc4   : > { %6010 = shalt.err (!%p6007_p4)
}
  0xc5   : > { %s7476_s25 = smov 4   ;;  %s7477_s28 = smov 64  }
  0xc6   : > { %5478 = dma.hbm_to_vmem [thread:$0]  (!%p6519_p5), %s7475_s12, 4096, %s601_s20, [#allocation20], %s7477_s28, %s7477_s28, %s7476_s25  }
  0xc7   : > { %s6011_s18 = scalar_lea.hbm %s7431_s14, 32 }
  0xc8   : > { %p6012_p6 = scmp.ne.s32.totalorder %s7431_s14, %s6011_s18  ;;  %p6018_p2 = scmp.lt.u32.totalorder %s6011_s18, %s7431_s14 }
  0xca   : > { %p6014_p8 = pnand %p6012_p6, %p6533_p7 }
  0xcc   : > { %p6015_p9 = pneg %p6014_p8 }
  0xce   : > { %p6020_p3 = pnand %p6018_p2, %p6015_p9 }
  0xd0   : > { %6023 = shalt.err (!%p6020_p3)
}
  0xd1   : > { %s6024_s20 = scalar_lea.vmem %s6647_s2, 32  ;;  %p6032_p13 = scmp.lt.s32.totalorder %s6647_s2, %s6647_s2 }
  0xd2   : > { %p6025_p10 = scmp.ne.s32.totalorder %s6647_s2, %s6024_s20  ;;  %p6033_p0 = scmp.lt.s32.totalorder %s6024_s20, %s6024_s20 }
  0xd4   : > { %p6027_p11 = pnand %p6025_p10, %p6533_p7  ;;  %p6034_p1 = por %p6033_p0, %p6032_p13 }
  0xd6   : > { %p6028_p12 = pneg %p6027_p11 }
  0xd8   : > { %p6035_p4 = pnand %p6034_p1, %p6028_p12 }
  0xda   : > { %6038 = shalt.err (!%p6035_p4)
}
  0xdb   : > { %s7478_s26 = smov 1   ;;  %s7479_s25 = smov 16  }
  0xdc   : > { %5484 = dma.hbm_to_vmem [thread:$0]  (!%p6519_p5), %s7431_s14, 32, %s6647_s2, [#allocation23], %s7479_s25, %s7479_s25, %s7478_s26  }
  0xdd   : > { %s6378_s4 = smov [#allocation25]   ;;  %s6379_s24 = smov [#allocation2]  }
  0xde   : > { %s652_s0 = sshll.u32 %s6378_s4, 4  ;;  %s464_s18 = sshll.u32 %s6379_s24, 4  ;;  %s653_s0 = int_to_ptr.vmem [resolvable:$true] %s652_s0  ;;  %s6696_s18 = int_to_ptr.vmem [resolvable:$true] %s464_s18 }
  0xdf   : > { %s6039_s23 = scalar_lea.hbm %s7433_s16, 2048 }
  0xe0   : > { %p6040_p6 = scmp.ne.s32.totalorder %s7433_s16, %s6039_s23  ;;  %p6046_p2 = scmp.lt.u32.totalorder %s6039_s23, %s7433_s16 }
  0xe2   : > { %p6042_p8 = pnand %p6040_p6, %p6533_p7 }
  0xe4   : > { %p6043_p9 = pneg %p6042_p8 }
  0xe6   : > { %p6048_p3 = pnand %p6046_p2, %p6043_p9 }
  0xe8   : > { %6051 = shalt.err (!%p6048_p3)
}
  0xe9   : > { %s6052_s29 = scalar_lea.vmem %s653_s0, 2048  ;;  %p6060_p13 = scmp.lt.s32.totalorder %s653_s0, %s653_s0 }
  0xea   : > { %p6053_p10 = scmp.ne.s32.totalorder %s653_s0, %s6052_s29  ;;  %p6061_p0 = scmp.lt.s32.totalorder %s6052_s29, %s6052_s29 }
  0xec   : > { %p6055_p11 = pnand %p6053_p10, %p6533_p7  ;;  %p6062_p1 = por %p6061_p0, %p6060_p13 }
  0xee   : > { %p6056_p12 = pneg %p6055_p11 }
  0xf0   : > { %p6063_p4 = pnand %p6062_p1, %p6056_p12 }
  0xf2   : > { %6066 = shalt.err (!%p6063_p4)
}
  0xf3   : > { %s7480_s27 = smov 8   ;;  %s7481_s4 = smov 128  }
  0xf4   : > { %5490 = dma.hbm_to_vmem [thread:$0]  (!%p6519_p5), %s7433_s16, 2048, %s653_s0, [#allocation26], %s7481_s4, %s7481_s4, %s7480_s27  }
  0xf5   : > { %s7482_s20 = sld [smem:[#allocation40_spill]] }
  0xfb   : > { %s6067_s28 = scalar_lea.hbm %s7482_s20, 128  ;;  %s6072_s10 = scalar_lea.hbm %s7482_s20, 80000 }
  0xfc   : > { %p6068_p6 = scmp.ne.s32.totalorder %s7482_s20, %s6067_s28  ;;  %p6073_p2 = scmp.lt.u32.totalorder %s6072_s10, %s6067_s28 }
  0xfd   : > { %p6074_p3 = scmp.lt.u32.totalorder %s6067_s28, %s7482_s20 }
  0xfe   : > { %p6070_p8 = pnand %p6068_p6, %p6533_p7 }
  0xff   : > { %p6075_p10 = por %p6074_p3, %p6073_p2 }
 0x100   : > { %p6071_p9 = pneg %p6070_p8 }
 0x102   : > { %p6076_p11 = pnand %p6075_p10, %p6071_p9 }
 0x104   : > { %6079 = shalt.err (!%p6076_p11)
}
 0x105   : > { %s6080_s6 = scalar_lea.vmem %s6696_s18, 128  ;;  %p6088_p1 = scmp.lt.s32.totalorder %s6696_s18, %s6696_s18 }
 0x106   : > { %p6081_p12 = scmp.ne.s32.totalorder %s6696_s18, %s6080_s6  ;;  %p6089_p4 = scmp.lt.s32.totalorder %s6080_s6, %s6080_s6 }
 0x108   : > { %p6083_p13 = pnand %p6081_p12, %p6533_p7  ;;  %p6090_p6 = por %p6089_p4, %p6088_p1 }
 0x10a   : > { %p6084_p0 = pneg %p6083_p13 }
 0x10c   : > { %p6091_p8 = pnand %p6090_p6, %p6084_p0 }
 0x10e   : > { %6094 = shalt.err (!%p6091_p8)
}
 0x10f   : > { %5445 = dma.hbm_to_vmem [thread:$0]  (!%p6519_p5), %s7482_s20, 128, %s6696_s18, [#allocation3]  }
 0x110   : > { %s6380_s12 = smov [#allocation6]   ;;  %s6381_s27 = smov [#allocation9]  }
 0x111   : > { %s486_s0 = sshll.u32 %s6380_s12, 4  ;;  %s509_s4 = sshll.u32 %s6381_s27, 4  ;;  %s487_s0 = int_to_ptr.vmem [resolvable:$true] %s486_s0  ;;  %s6745_s4 = int_to_ptr.vmem [resolvable:$true] %s509_s4 }
 0x112   : > { %s7483_s3 = sld [smem:[#allocation42_spill]] }
 0x118   : > { %s6095_s23 = scalar_lea.hbm %s7483_s3, 16 }
 0x119   : > { %p6096_p9 = scmp.ne.s32.totalorder %s7483_s3, %s6095_s23  ;;  %p6102_p10 = scmp.lt.u32.totalorder %s6095_s23, %s7483_s3 }
 0x11b   : > { %p6098_p2 = pnand %p6096_p9, %p6533_p7 }
 0x11d   : > { %p6099_p3 = pneg %p6098_p2 }
 0x11f   : > { %p6104_p11 = pnand %p6102_p10, %p6099_p3 }
 0x121   : > { %6107 = shalt.err (!%p6104_p11)
}
 0x122   : > { %s6108_s24 = scalar_lea.vmem %s487_s0, 16  ;;  %s6115_s6 = scalar_lea.vmem %s487_s0, 32 }
 0x123   : > { %p6109_p12 = scmp.ne.s32.totalorder %s487_s0, %s6108_s24  ;;  %p6116_p1 = scmp.lt.s32.totalorder %s487_s0, %s487_s0 }
 0x124   : > { %p6117_p4 = scmp.lt.s32.totalorder %s6115_s6, %s6108_s24 }
 0x125   : > { %p6111_p13 = pnand %p6109_p12, %p6533_p7 }
 0x126   : > { %p6118_p6 = por %p6117_p4, %p6116_p1 }
 0x127   : > { %p6112_p0 = pneg %p6111_p13 }
 0x129   : > { %p6119_p8 = pnand %p6118_p6, %p6112_p0 }
 0x12b   : > { %6122 = shalt.err (!%p6119_p8)
}
 0x12c   : > { %5451 = dma.hbm_to_vmem [thread:$0]  (!%p6519_p5), %s7483_s3, 16, %s487_s0, [#allocation5]  }
 0x12d   : > { %s6123_s22 = scalar_lea.hbm %s7422_s5, 96 }
 0x12e   : > { %p6124_p9 = scmp.ne.s32.totalorder %s7422_s5, %s6123_s22  ;;  %p6130_p10 = scmp.lt.u32.totalorder %s6123_s22, %s7422_s5 }
 0x130   : > { %p6126_p2 = pnand %p6124_p9, %p6533_p7 }
 0x132   : > { %p6127_p3 = pneg %p6126_p2 }
 0x134   : > { %p6132_p11 = pnand %p6130_p10, %p6127_p3 }
 0x136   : > { %6135 = shalt.err (!%p6132_p11)
}
 0x137   : > { %s6136_s0 = scalar_lea.vmem %s6745_s4, 96  ;;  %p6144_p1 = scmp.lt.s32.totalorder %s6745_s4, %s6745_s4 }
 0x138   : > { %p6137_p12 = scmp.ne.s32.totalorder %s6745_s4, %s6136_s0  ;;  %p6145_p4 = scmp.lt.s32.totalorder %s6136_s0, %s6136_s0 }
 0x13a   : > { %p6139_p13 = pnand %p6137_p12, %p6533_p7  ;;  %p6146_p6 = por %p6145_p4, %p6144_p1 }
 0x13c   : > { %p6140_p0 = pneg %p6139_p13 }
 0x13e   : > { %p6147_p8 = pnand %p6146_p6, %p6140_p0 }
 0x140   : > { %6150 = shalt.err (!%p6147_p8)
}
 0x141   : > { %s6382_s29 = smov 48   ;;  %s6383_s18 = smov 3  }
 0x142   : > { %5457 = dma.hbm_to_vmem [thread:$0]  (!%p6519_p5), %s7422_s5, 96, %s6745_s4, [#allocation8], %s6382_s29, %s6382_s29, %s6383_s18  }
 0x143   : > { %s6384_s8 = smov [#allocation12]   ;;  %s6385_s12 = smov [#allocation15]  }
 0x144   : > { %s535_s10 = sshll.u32 %s6384_s8, 4  ;;  %s561_s27 = sshll.u32 %s6385_s12, 4  ;;  %s536_s10 = int_to_ptr.vmem [resolvable:$true] %s535_s10  ;;  %s6788_s27 = int_to_ptr.vmem [resolvable:$true] %s561_s27 }
 0x145   : > { %s6151_s23 = scalar_lea.hbm %s7424_s7, 32 }
 0x146   : > { %p6152_p9 = scmp.ne.s32.totalorder %s7424_s7, %s6151_s23  ;;  %p6158_p10 = scmp.lt.u32.totalorder %s6151_s23, %s7424_s7 }
 0x148   : > { %p6154_p2 = pnand %p6152_p9, %p6533_p7 }
 0x14a   : > { %p6155_p3 = pneg %p6154_p2 }
 0x14c   : > { %p6160_p11 = pnand %p6158_p10, %p6155_p3 }
 0x14e   : > { %6163 = shalt.err (!%p6160_p11)
}
 0x14f   : > { %s6164_s29 = scalar_lea.vmem %s536_s10, 32  ;;  %p6172_p1 = scmp.lt.s32.totalorder %s536_s10, %s536_s10 }
 0x150   : > { %p6165_p12 = scmp.ne.s32.totalorder %s536_s10, %s6164_s29  ;;  %p6173_p4 = scmp.lt.s32.totalorder %s6164_s29, %s6164_s29 }
 0x152   : > { %p6167_p13 = pnand %p6165_p12, %p6533_p7  ;;  %p6174_p6 = por %p6173_p4, %p6172_p1 }
 0x154   : > { %p6168_p0 = pneg %p6167_p13 }
 0x156   : > { %p6175_p8 = pnand %p6174_p6, %p6168_p0 }
 0x158   : > { %6178 = shalt.err (!%p6175_p8)
}
 0x159   : > { %5463 = dma.hbm_to_vmem [thread:$0]  (!%p6519_p5), %s7424_s7, 32, %s536_s10, [#allocation11], %s7479_s25, %s7479_s25, %s7478_s26  }
 0x15a   : > { %s6179_s12 = scalar_lea.hbm %s7426_s9, 32 }
 0x15b   : > { %p6180_p9 = scmp.ne.s32.totalorder %s7426_s9, %s6179_s12  ;;  %p6186_p10 = scmp.lt.u32.totalorder %s6179_s12, %s7426_s9 }
 0x15d   : > { %p6182_p2 = pnand %p6180_p9, %p6533_p7 }
 0x15f   : > { %p6183_p3 = pneg %p6182_p2 }
 0x161   : > { %p6188_p11 = pnand %p6186_p10, %p6183_p3 }
 0x163   : > { %6191 = shalt.err (!%p6188_p11)
}
 0x164   : > { %s6192_s10 = scalar_lea.vmem %s6788_s27, 32  ;;  %p6200_p1 = scmp.lt.s32.totalorder %s6788_s27, %s6788_s27 }
 0x165   : > { %p6193_p12 = scmp.ne.s32.totalorder %s6788_s27, %s6192_s10  ;;  %p6201_p4 = scmp.lt.s32.totalorder %s6192_s10, %s6192_s10 }
 0x167   : > { %p6195_p13 = pnand %p6193_p12, %p6533_p7  ;;  %p6202_p6 = por %p6201_p4, %p6200_p1 }
 0x169   : > { %p6196_p0 = pneg %p6195_p13 }
 0x16b   : > { %p6203_p8 = pnand %p6202_p6, %p6196_p0 }
 0x16d   : > { %6206 = shalt.err (!%p6203_p8)
}
 0x16e   : > { %5469 = dma.hbm_to_vmem [thread:$0]  (!%p6519_p5), %s7426_s9, 32, %s6788_s27, [#allocation14], %s7479_s25, %s7479_s25, %s7478_s26  }
 0x16f   : > { %s6386_s4 = smov [#allocation18]   ;;  %s6207_s6 = scalar_lea.hbm %s7428_s11, 64 }
 0x170   : > { %s587_s29 = sshll.u32 %s6386_s4, 4  ;;  %p6208_p9 = scmp.ne.s32.totalorder %s7428_s11, %s6207_s6  ;;  %s588_s29 = int_to_ptr.vmem [resolvable:$true] %s587_s29 }
 0x171   : > { %p6214_p10 = scmp.lt.u32.totalorder %s6207_s6, %s7428_s11 }
 0x172   : > { %p6210_p2 = pnand %p6208_p9, %p6533_p7 }
 0x174   : > { %p6211_p3 = pneg %p6210_p2 }
 0x176   : > { %p6216_p11 = pnand %p6214_p10, %p6211_p3 }
 0x178   : > { %6219 = shalt.err (!%p6216_p11)
}
 0x179   : > { %s6220_s27 = scalar_lea.vmem %s588_s29, 64  ;;  %p6228_p1 = scmp.lt.s32.totalorder %s588_s29, %s588_s29 }
 0x17a   : > { %p6221_p12 = scmp.ne.s32.totalorder %s588_s29, %s6220_s27  ;;  %p6229_p4 = scmp.lt.s32.totalorder %s6220_s27, %s6220_s27 }
 0x17c   : > { %p6223_p13 = pnand %p6221_p12, %p6533_p7  ;;  %p6230_p6 = por %p6229_p4, %p6228_p1 }
 0x17e   : > { %p6224_p0 = pneg %p6223_p13 }
 0x180   : > { %p6231_p8 = pnand %p6230_p6, %p6224_p0 }
 0x182   : > { %6234 = shalt.err (!%p6231_p8)
}
 0x183   : > { %s6387_s23 = smov 32   ;;  %s6388_s28 = smov 2  }
 0x184   : > { %5475 = dma.hbm_to_vmem [thread:$0]  (!%p6519_p5), %s7428_s11, 64, %s588_s29, [#allocation17], %s6387_s23, %s6387_s23, %s6388_s28  }
 0x185   : > { %s6389_s0 = smov [#allocation21]   ;;  %s6390_s18 = smov [#allocation24]  }
 0x186   : > { %s613_s4 = sshll.u32 %s6389_s0, 4  ;;  %s639_s24 = sshll.u32 %s6390_s18, 4  ;;  %s614_s4 = int_to_ptr.vmem [resolvable:$true] %s613_s4  ;;  %s640_s24 = int_to_ptr.vmem [resolvable:$true] %s639_s24 }
 0x187   : > { %s6235_s12 = scalar_lea.hbm %s7430_s13, 32 }
 0x188   : > { %p6236_p9 = scmp.ne.s32.totalorder %s7430_s13, %s6235_s12  ;;  %p6242_p10 = scmp.lt.u32.totalorder %s6235_s12, %s7430_s13 }
 0x18a   : > { %p6238_p2 = pnand %p6236_p9, %p6533_p7 }
 0x18c   : > { %p6239_p3 = pneg %p6238_p2 }
 0x18e   : > { %p6244_p11 = pnand %p6242_p10, %p6239_p3 }
 0x190   : > { %6247 = shalt.err (!%p6244_p11)
}
 0x191   : > { %s6248_s29 = scalar_lea.vmem %s614_s4, 32  ;;  %p6256_p1 = scmp.lt.s32.totalorder %s614_s4, %s614_s4 }
 0x192   : > { %p6249_p12 = scmp.ne.s32.totalorder %s614_s4, %s6248_s29  ;;  %p6257_p4 = scmp.lt.s32.totalorder %s6248_s29, %s6248_s29 }
 0x194   : > { %p6251_p13 = pnand %p6249_p12, %p6533_p7  ;;  %p6258_p6 = por %p6257_p4, %p6256_p1 }
 0x196   : > { %p6252_p0 = pneg %p6251_p13 }
 0x198   : > { %p6259_p8 = pnand %p6258_p6, %p6252_p0 }
 0x19a   : > { %6262 = shalt.err (!%p6259_p8)
}
 0x19b   : > { %5481 = dma.hbm_to_vmem [thread:$0]  (!%p6519_p5), %s7430_s13, 32, %s614_s4, [#allocation20], %s7479_s25, %s7479_s25, %s7478_s26  }
 0x19c   : > { %s6263_s2 = scalar_lea.hbm %s7432_s15, 32 }
 0x19d   : > { %p6264_p9 = scmp.ne.s32.totalorder %s7432_s15, %s6263_s2  ;;  %p6270_p10 = scmp.lt.u32.totalorder %s6263_s2, %s7432_s15 }
 0x19f   : > { %p6266_p2 = pnand %p6264_p9, %p6533_p7 }
 0x1a1   : > { %p6267_p3 = pneg %p6266_p2 }
 0x1a3   : > { %p6272_p11 = pnand %p6270_p10, %p6267_p3 }
 0x1a5   : > { %6275 = shalt.err (!%p6272_p11)
}
 0x1a6   : > { %s6276_s12 = scalar_lea.vmem %s640_s24, 32  ;;  %p6284_p1 = scmp.lt.s32.totalorder %s640_s24, %s640_s24 }
 0x1a7   : > { %p6277_p12 = scmp.ne.s32.totalorder %s640_s24, %s6276_s12  ;;  %p6285_p4 = scmp.lt.s32.totalorder %s6276_s12, %s6276_s12 }
 0x1a9   : > { %p6279_p13 = pnand %p6277_p12, %p6533_p7  ;;  %p6286_p6 = por %p6285_p4, %p6284_p1 }
 0x1ab   : > { %p6280_p0 = pneg %p6279_p13 }
 0x1ad   : > { %p6287_p8 = pnand %p6286_p6, %p6280_p0 }
 0x1af   : > { %6290 = shalt.err (!%p6287_p8)
}
 0x1b0   : > { %5487 = dma.hbm_to_vmem [thread:$0]  (!%p6519_p5), %s7432_s15, 32, %s640_s24, [#allocation23], %s7479_s25, %s7479_s25, %s7478_s26  }
 0x1b1   : > { %s6391_s1 = smov [#allocation27]   ;;  %s6291_s23 = scalar_lea.hbm %s7434_s17, 16 }
 0x1b2   : > { %s666_s27 = sshll.u32 %s6391_s1, 4  ;;  %p6292_p9 = scmp.ne.s32.totalorder %s7434_s17, %s6291_s23  ;;  %s667_s27 = int_to_ptr.vmem [resolvable:$true] %s666_s27 }
 0x1b3   : > { %p6298_p10 = scmp.lt.u32.totalorder %s6291_s23, %s7434_s17 }
 0x1b4   : > { %p6294_p2 = pnand %p6292_p9, %p6533_p7 }
 0x1b6   : > { %p6295_p3 = pneg %p6294_p2 }
 0x1b8   : > { %p6300_p11 = pnand %p6298_p10, %p6295_p3 }
 0x1ba   : > { %6303 = shalt.err (!%p6300_p11)
}
 0x1bb   : > { %s6304_s26 = scalar_lea.vmem %s667_s27, 16  ;;  %s6311_s25 = scalar_lea.vmem %s667_s27, 32 }
 0x1bc   : > { %p6305_p12 = scmp.ne.s32.totalorder %s667_s27, %s6304_s26  ;;  %p6312_p1 = scmp.lt.s32.totalorder %s667_s27, %s667_s27 }
 0x1bd   : > { %p6313_p4 = scmp.lt.s32.totalorder %s6311_s25, %s6304_s26 }
 0x1be   : > { %p6307_p13 = pnand %p6305_p12, %p6533_p7 }
 0x1bf   : > { %p6314_p6 = por %p6313_p4, %p6312_p1 }
 0x1c0   : > { %p6308_p0 = pneg %p6307_p13 }
 0x1c2   : > { %p6315_p8 = pnand %p6314_p6, %p6308_p0 }
 0x1c4   : > { %6318 = shalt.err (!%p6315_p8)
}
 0x1c5   : > { %5493 = dma.hbm_to_vmem [thread:$0]  (!%p6519_p5), %s7434_s17, 16, %s667_s27, [#allocation26]  }
 0x1c6   : > { %p7484_p9 = scmp.ne.s32.totalorder %s7467_s19, 0 }
 0x1c7   : > { %s7485_s6 = sld [smem:[#allocation38_spill]] (!%p7484_p9) }
 0x1c8   : > { %688 = sbr.rel (%p7484_p9) target bundleno = 8921 (0x22d9), region = 92 }
 0x1cd   : > { %p7486_p2 = scmp.ne.s32.totalorder (!%p7484_p9), %s7485_s6, 0 }
 0x1cf   : > { %6324 = dma.done.wait (%p7486_p2), [#allocation3], 128  }
 0x1d0   : > { %6326 = vsyncadd (%p7486_p2), [#allocation3], 4294967168 }
 0x1d1   : > { %6328 = dma.done.wait (%p7486_p2), [#allocation5], 48  }
 0x1d2   : > { %6330 = vsyncadd (%p7486_p2), [#allocation5], 4294967248 }
 0x1d3   : > { %6332 = dma.done.wait (%p7486_p2), [#allocation8], 6240  }
 0x1d4   : > { %6334 = vsyncadd (%p7486_p2), [#allocation8], 4294961056 }
 0x1d5   : > { %6336 = dma.done.wait (%p7486_p2), [#allocation11], 2080  }
 0x1d6   : > { %6338 = vsyncadd (%p7486_p2), [#allocation11], 4294965216 }
 0x1d7   : > { %6340 = dma.done.wait (%p7486_p2), [#allocation14], 64  }
 0x1d8   : > { %6342 = vsyncadd (%p7486_p2), [#allocation14], 4294967232 }
 0x1d9   : > { %6344 = dma.done.wait (%p7486_p2), [#allocation17], 4160  }
 0x1da   : > { %6346 = vsyncadd (%p7486_p2), [#allocation17], 4294963136 }
 0x1db   : > { %6348 = dma.done.wait (%p7486_p2), [#allocation20], 4128  }
 0x1dc   : > { %6350 = vsyncadd (%p7486_p2), [#allocation20], 4294963168 }
 0x1dd   : > { %6352 = dma.done.wait (%p7486_p2), [#allocation23], 64  }
 0x1de   : > { %6354 = vsyncadd (%p7486_p2), [#allocation23], 4294967232 }
 0x1df   : > { %6356 = dma.done.wait (%p7486_p2), [#allocation26], 2064  }
 0x1e0   : > { %6358 = vsyncadd (%p7486_p2), [#allocation26], 4294965232  ;;  %s7487_s30 = sld [smem:[#allocation37_spill]]  ;;  %v6392_v0 = vmov 0.0   ;;  %vm6393_vm0 = vmmov 0   ;;  %vm838_vm1 = vcmask 1041408   ;;  %v921_v42 = vlaneseq }
 0x1e1   : > { %5037 = vmatprep.subr.bf16.mxu0 %v6392_v0  ;;  %5039 = vmatprep.mubr.msk.bf16.mxu0 %vm6393_vm0, %v6392_v0  ;;  %s7489_s22 = sld [smem:[#allocation39_spill]]  ;;  %v821_v1 = vld [vmem:[#allocation4] sm:$0x3]  ;;  %vm834_vm2 = vcmask 31744   ;;  %v5603_v6 = vld [vmem:[#allocation7 + $0x4] ss:$12 sps:$4 sm:$0xff]  }
 0x1e2   : > { %v840_v4 = vsel %vm838_vm1, %v821_v1, 0  ;;  %v5605_v7 = vld [vmem:[#allocation7] ss:$12 sps:$4 sm:$0xff]   ;;  %1064 = vmatprep.subr.bf16.mxu1 %v5603_v6  ;;  %v5606_v8 = vld [vmem:[#allocation7 + $0x8] ss:$12 sps:$4 sm:$0xff]   ;;  %v6394_v30 = vmov 0  }
 0x1e3   : > { %5038 = vmatpush3.bf16.msra.mxu0 %v840_v4  ;;  %1065 = vmatpush1.bf16.msra.mxu1 %v5605_v7  ;;  %v5607_v9 = vld [vmem:[#allocation7 + $0x1c] ss:$12 sps:$4 sm:$0xff]   ;;  %v5609_v10 = vld [vmem:[#allocation7 + $0x18] ss:$12 sps:$4 sm:$0xff]   ;;  %v5610_v11 = vld [vmem:[#allocation7 + $0x20] ss:$12 sps:$4 sm:$0xff]  }
 0x1e4   : > { %5043 = vmatprep.subr.bf16.mxu0 %v6392_v0  ;;  %1066 = vmatprep.subr.bf16.mxu1 %v5607_v9  ;;  %v5611_v12 = vld [vmem:[#allocation7 + $0x34] ss:$12 sps:$4 sm:$0xff]   ;;  %v5613_v13 = vld [vmem:[#allocation7 + $0x30] ss:$12 sps:$4 sm:$0xff]   ;;  %v5615_v14 = vld [vmem:[#allocation7 + $0x4c] ss:$12 sps:$4 sm:$0xff]  }
 0x1e5   : > { %v5614_v15 = vld [vmem:[#allocation7 + $0x38] ss:$12 sps:$4 sm:$0xff]   ;;  %v5617_v16 = vld [vmem:[#allocation7 + $0x48] ss:$12 sps:$4 sm:$0xff]   ;;  %v5618_v17 = vld [vmem:[#allocation7 + $0x50] ss:$12 sps:$4 sm:$0xff]   ;;  %1096 = vmatprep.mubr.bf16.mxu1 %v6394_v30 }
 0x1e6   : > { %s7488_s19 = sadd.s32 4294967295, %s7487_s30   ;;  %v5619_v18 = vld [vmem:[#allocation7 + $0x64] ss:$12 sps:$4 sm:$0xff]   ;;  %v5621_v19 = vld [vmem:[#allocation7 + $0x60] ss:$12 sps:$4 sm:$0xff]   ;;  %v883_v35 = vld [vmem:[#allocation2] sm:$0xff] }
 0x1e7   : > { %s4690_s21 = sshll.u32 %s7488_s19, 1  ;;  %1067 = vmatpush1.bf16.msra.mxu1 %v5609_v10  ;;  %v5623_v20 = vld [vmem:[#allocation7 + $0x7c] ss:$12 sps:$4 sm:$0xff]   ;;  %v5625_v22 = vld [vmem:[#allocation7 + $0x78] ss:$12 sps:$4 sm:$0xff]   ;;  %v6987_v43 = vshrl.u32 %v921_v42, 7 }
 0x1e8   : > { %p806_p5 = scmp.lt.s32.totalorder %s4690_s21, 3  ;;  %1068 = vmatprep.subr.bf16.mxu1 %v5611_v12  ;;  %v5622_v21 = vld [vmem:[#allocation7 + $0x68] ss:$12 sps:$4 sm:$0xff]   ;;  %v5626_v23 = vld [vmem:[#allocation7 + $0x80] ss:$12 sps:$4 sm:$0xff]   ;;  %vm1154_vm3 = vcmask 261120  }
 0x1e9   : > { %v5627_v24 = vld [vmem:[#allocation7 + $0x94] ss:$12 sps:$4 sm:$0xff]   ;;  %v5629_v25 = vld [vmem:[#allocation7 + $0x90] ss:$12 sps:$4 sm:$0xff]   ;;  %v5630_v26 = vld [vmem:[#allocation7 + $0x98] ss:$12 sps:$4 sm:$0xff]  }
 0x1ea   : > { %s7493_s21 = smov (!%p806_p5, %s4690_s21), 3  ;;  %v5631_v27 = vld [vmem:[#allocation7 + $0xac] ss:$12 sps:$4 sm:$0xff]   ;;  %v5633_v28 = vld [vmem:[#allocation7 + $0xa8] ss:$12 sps:$4 sm:$0xff]   ;;  %v6990_v44 = vsub.s32 1, %v6987_v43 }
 0x1eb   : > { %s4691_s8 = sshll.u32 %s7493_s21, 3  ;;  %1069 = vmatpush1.bf16.msra.mxu1 %v5613_v13  ;;  %v5634_v29 = vld [vmem:[#allocation7 + $0xb0] ss:$12 sps:$4 sm:$0xff]   ;;  %v919_v45 = vld [vmem:[#allocation9] sm:$0x7]  ;;  %v931_v46 = vsub.s32 2, %v6987_v43 }
 0x1ec   : > { %s809_s1 = scalar_lea.vmem %s7489_s22, %s4691_s8  ;;  %1070 = vmatprep.subr.bf16.mxu1 %v5615_v14  ;;  %v4693_v31 = vld [vmem:[#allocation6] ss:$0 sm:$0xff]  ;;  %v928_v47 = vrot.slane %v919_v45, %v6990_v44  ;;  %v6995_v48 = vsub.s32 0, %v6987_v43  ;;  %s6395_s27 = smov 96   ;;  %vm1275_vm4 = vcmask 1043456   ;;  %vm1247_vm5 = vcmask 64512  }
 0x1ed   : > { %v817_v2 = vld [vmem:[%s809_s1] sm:$0xff]  ;;  %v818_v3 = vld [vmem:[%s809_s1 + $0x8] sm:$0xff]  ;;  %v932_v53 = vrot.slane %v919_v45, %v931_v46  ;;  %s6396_s29 = smov 64   ;;  %s6397_s3 = smov 32   ;;  %vm2057_vm6 = vcmask 523264   ;;  %vm2060_vm7 = vcmask 785408  }
 0x1ee   : > { %v4873_v5 = vpack.c.bf16 %v818_v3, %v817_v2  ;;  %v924_v59 = vrot.slane %v919_v45, %v6995_v48  ;;  %vm4337_vm8 = vcmask 1041409   ;;  %s7490_s10 = sld [smem:[#allocation48_spill]] }
 0x1ef   : > { %1071 = vmatpush1.bf16.msra.mxu1 %v5617_v16 }
 0x1f0   : > { %5040 = vmatmul.mubr.msk.bf16.vlgmr.msra.gmra.mrb[0].mxu0 %vm834_vm2, %v4873_v5  ;;  %1072 = vmatprep.subr.bf16.mxu1 %v5619_v18 }
 0x1f1   : > { %5044 = vmatpush3.bf16.msra.mxu0 %v5606_v8  ;;  %5059 = vmatprep.mubr.msk.bf16.mxu0 %vm6393_vm0, %v6392_v0 }
 0x1f2   : > { %5045 = vmatprep.subr.bf16.mxu0 %v6392_v0 }
 0x1f3   : > { %1073 = vmatpush1.bf16.msra.mxu1 %v5621_v19 }
 0x1f4   : > { %1074 = vmatprep.subr.bf16.mxu1 %v5623_v20  ;;  %s814_s2 = scalar_lea.vmem %s7490_s10, %s7493_s21 }
 0x1f5   : > { %5046 = vmatpush3.bf16.msra.mxu0 %v5610_v11 }
 0x1f6   : > { %5047 = vmatprep.subr.bf16.mxu0 %v6392_v0 }
 0x1f7   : > { %1075 = vmatpush1.bf16.msra.mxu1 %v5625_v22 }
 0x1f8   : > { %1076 = vmatprep.subr.bf16.mxu1 %v5627_v24 }
 0x1f9   : > { %5048 = vmatpush3.bf16.msra.mxu0 %v5614_v15 }
 0x1fa   : > { %5049 = vmatprep.subr.bf16.mxu0 %v6392_v0 }
 0x1fb   : > { %1077 = vmatpush1.bf16.msra.mxu1 %v5629_v25 }
 0x1fc   : > { %1078 = vmatprep.subr.bf16.mxu1 %v5631_v27 }
 0x1fd   : > { %5050 = vmatpush3.bf16.msra.mxu0 %v5618_v17 }
 0x1fe   : > { %5051 = vmatprep.subr.bf16.mxu0 %v6392_v0 }
 0x1ff   : > { %1079 = vmatpush1.bf16.msra.mxu1 %v5633_v28 }
 0x200   : > { %5063 = vmatprep.subr.bf16.mxu1 %v6392_v0 }
 0x201   : > { %5052 = vmatpush3.bf16.msra.mxu0 %v5622_v21 }
 0x202   : > { %5053 = vmatprep.subr.bf16.mxu0 %v6392_v0 }
 0x205   : > { %5054 = vmatpush3.bf16.msra.mxu0 %v5626_v23 }
 0x206   : > { %5055 = vmatprep.subr.bf16.mxu0 %v6392_v0 }
 0x209   : > { %5056 = vmatpush3.bf16.msra.mxu0 %v5630_v26 }
 0x20a   : > { %5057 = vmatprep.subr.bf16.mxu0 %v6392_v0 }
 0x20d   : > { %5058 = vmatpush3.bf16.msra.mxu0 %v5634_v29 }
 0x20e   : > { %5069 = vmatprep.subr.bf16.mxu0 %v6392_v0 }
 0x2c3   : > { %v876_v32 = vpop.f32.mrb[0].mxu0 }
 0x2c4   : > { %v877_v33 = vadd.f32 %v4693_v31, %v876_v32  ;;  %v5041_v34 = vpop.f32.mrb[1].mxu0 }
 0x2c5   : > { %v879_v36 = vpop.f32.mrb[2].mxu0 }
 0x2c6   : > { %v880_v37 = vadd.f32 %v4693_v31, %v879_v36  ;;  %v5042_v38 = vpop.f32.mrb[3].mxu0  ;;  %v6977_v39 = vadd.f32 %v883_v35, %v877_v33 }
 0x2c8   : > { %v6979_v40 = vadd.f32 %v883_v35, %v880_v37 }
 0x2ca   : > { %v886_v41 = vpack.c.bf16 %v6979_v40, %v6977_v39 }
 0x2cc   : > { %1097 = vmatmul.mubr.bf16.vlgmr.msra.gmra.mrb[0].mxu1 %v886_v41  ;;  %5060 = vmatmul.mubr.bf16.vlgmr.msra.gmra.mrb[4].mxu0 %v886_v41 }
 0x2cd   : > { %5065 = vmatprep.mubr.msk.bf16.mxu1 %vm6393_vm0, %v6392_v0  ;;  %5071 = vmatprep.mubr.msk.bf16.mxu0 %vm6393_vm0, %v6392_v0 }
 0x39f   : > { %v1098_v49 = vpop.f32.mrb[0].mxu1  ;;  %v1141_v50 = vpop.f32.mrb[4].mxu0 }
 0x3a0   : > { %v1100_v51 = vpop.f32.mrb[1].mxu1  ;;  %v5061_v52 = vpop.f32.mrb[5].mxu0  ;;  %v1142_v62 = vadd.f32 %v1141_v50, %v932_v53  ;;  %v1099_v2 = vadd.f32 %v1098_v49, %v924_v59 }
 0x3a1   : > { %v1101_v54 = vadd.f32 %v1100_v51, %v928_v47  ;;  %v1102_v55 = vpop.f32.mrb[2].mxu1  ;;  %v1144_v56 = vpop.f32.mrb[6].mxu0 }
 0x3a2   : > { %v1104_v57 = vpop.f32.mrb[3].mxu1  ;;  %v5062_v58 = vpop.f32.mrb[7].mxu0  ;;  %v1145_v3 = vadd.f32 %v1144_v56, %v932_v53  ;;  %v7011_v5 = vpack.c.bf16 %v1142_v62, %v1142_v62  ;;  %v1103_v6 = vadd.f32 %v1102_v55, %v924_v59  ;;  %v7014_v7 = vpack.c.bf16 %v1099_v2, %v1099_v2 }
 0x3a3   : > { %v7000_v60 = vpack.c.bf16 %v1101_v54, %v1101_v54  ;;  %v1105_v61 = vadd.f32 %v1104_v57, %v928_v47 }
 0x3a4   : > { %v7016_v8 = vpack.c.bf16 %v1145_v3, %v1145_v3  ;;  %v7018_v9 = vpack.c.bf16 %v1103_v6, %v1103_v6  ;;  %v1277_v10 = vsel %vm1275_vm4, %v7011_v5, 0 }
 0x3a5   : > { %v7002_v63 = vpack.c.bf16 %v1105_v61, %v1105_v61  ;;  %v1159_v1 = vsel %vm1154_vm3, %v7000_v60, 0 }
 0x3a6   : > { %5064 = vmatpush3.bf16.xpose.msra.mxu1 %v1159_v1  ;;  %v1323_v11 = vsel %vm1275_vm4, %v7016_v8, 0 }
 0x3a7   : > { %1421 = vrot.lane.b32.xlu1 %v7002_v63, %s6395_s27  ;;  %v1205_v4 = vsel %vm1154_vm3, %v7002_v63, 0  ;;  %5075 = vmatprep.subr.bf16.mxu1 %v6392_v0 }
 0x3a8   : > { %5070 = vmatpush3.bf16.xpose.msra.mxu0 %v1205_v4 }
 0x3a9   : > { %5081 = vmatprep.subr.bf16.mxu0 %v6392_v0 }
 0x3ad   : > { %5066 = vmatmul.mubr.msk.bf16.vlgmr.msra.gmra.mrb[4].mxu1 %vm1154_vm3, %v7014_v7 }
 0x3ae   : > { %5076 = vmatpush3.bf16.msra.mxu1 %v1277_v10  ;;  %5077 = vmatprep.mubr.msk.bf16.mxu1 %vm6393_vm0, %v6392_v0 }
 0x3af   : > { %5072 = vmatmul.mubr.msk.bf16.vlgmr.msra.gmra.mrb[8].mxu0 %vm1154_vm3, %v7018_v9  ;;  %5087 = vmatprep.subr.bf16.mxu1 %v6392_v0 }
 0x3b0   : > { %5082 = vmatpush3.bf16.msra.mxu0 %v1323_v11  ;;  %5083 = vmatprep.mubr.msk.bf16.mxu0 %vm6393_vm0, %v6392_v0 }
 0x3b1   : > { %5093 = vmatprep.subr.bf16.mxu0 %v6392_v0 }
 0x419   : > { %v1422_v33 = vpop.permute.xlu1 %1421 }
 0x41a   : > { %v1427_v50 = vsel %vm1154_vm3, %v1422_v33, 0 }
 0x480   : > { %v1195_v12 = vpop.f32.mrb[4].mxu1 }
 0x481   : > { %v5067_v13 = vpop.f32.mrb[5].mxu1  ;;  %v1248_v14 = vsel %vm1247_vm5, %v1195_v12, -inf }
 0x482   : > { %1249 = vmax.xlane.f32.xlu0 %v1248_v14  ;;  %v1198_v15 = vpop.f32.mrb[6].mxu1  ;;  %v1241_v16 = vpop.f32.mrb[8].mxu0 }
 0x483   : > { %v5068_v17 = vpop.f32.mrb[7].mxu1  ;;  %v5073_v18 = vpop.f32.mrb[9].mxu0  ;;  %v1251_v21 = vsel %vm1247_vm5, %v1241_v16, -inf }
 0x484   : > { %v1244_v19 = vpop.f32.mrb[10].mxu0 }
 0x485   : > { %v5074_v20 = vpop.f32.mrb[11].mxu0 }
 0x486   : > { %1252 = vmax.xlane.f32.xlu0 %v1251_v21 }
 0x49c   : > { %1369 = vrot.lane.b32.xlu0 %v7000_v60, %s6395_s27 }
 0x50f   : > { %v1250_v22 = vpop.xlane.xlu0 %1249 }
 0x510   : > { %v1254_v23 = vsub.f32 %v1195_v12, %v1250_v22 }
 0x512   : > { %v1256_v24 = vmul.f32 1.442695, %v1254_v23 }
 0x513   : > { %v1253_v25 = vpop.xlane.xlu0 %1252 }
 0x514   : > { %5763 = vpow2.f32 %v1256_v24  ;;  %v1255_v26 = vsub.f32 %v1241_v16, %v1253_v25 }
 0x516   : > { %v1258_v27 = vmul.f32 1.442695, %v1255_v26 }
 0x517   : > { %v1370_v38 = vpop.permute.xlu0 %1369 }
 0x518   : > { %5765 = vpow2.f32 %v1258_v27  ;;  %v1375_v45 = vsel %vm1154_vm3, %v1370_v38, 0 }
 0x51e   : > { %v5764_v28 = vpop.eup %5763 }
 0x51f   : > { %v1260_v29 = vsel %vm1247_vm5, %v5764_v28, 0.0 }
 0x520   : > { %1261 = vadd.xlane.f32.xlu1 %v1260_v29 }
 0x522   : > { %v5766_v31 = vpop.eup %5765 }
 0x523   : > { %v1263_v32 = vsel %vm1247_vm5, %v5766_v31, 0.0 }
 0x524   : > { %1264 = vadd.xlane.f32.xlu1 %v1263_v32 }
 0x535   : > { %1366 = vrot.lane.b32.xlu1 %v7014_v7, %s6395_s27 }
 0x539   : > { %1418 = vrot.lane.b32.xlu1 %v7018_v9, %s6395_s27 }
 0x5ad   : > { %v1262_v34 = vpop.xlane.xlu1 %1261 }
 0x5ae   : > { %5767 = vrcp.f32 %v1262_v34 }
 0x5b1   : > { %v1265_v35 = vpop.xlane.xlu1 %1264 }
 0x5b2   : > { %5769 = vrcp.f32 %v1265_v35 }
 0x5b5   : > { %v1367_v51 = vpop.permute.xlu1 %1366 }
 0x5b8   : > { %v5768_v36 = vpop.eup %5767 }
 0x5b9   : > { %v1267_v37 = vmul.f32 %v5768_v36, %v5764_v28  ;;  %v1419_v52 = vpop.permute.xlu1 %1418 }
 0x5bb   : > { %v1270_v41 = vpack.c.bf16 %v1267_v37, %v1267_v37 }
 0x5bc   : > { %v5770_v42 = vpop.eup %5769 }
 0x5bd   : > { %v1269_v47 = vmul.f32 %v5770_v42, %v5766_v31  ;;  %5078 = vmatmul.mubr.msk.bf16.vlgmr.msra.gmra.mrb[8].mxu1 %vm1247_vm5, %v1270_v41 }
 0x5be   : > { %5088 = vmatpush3.bf16.xpose.msra.mxu1 %v1375_v45  ;;  %5089 = vmatprep.mubr.msk.bf16.mxu1 %vm6393_vm0, %v6392_v0 }
 0x5bf   : > { %v1271_v49 = vpack.c.bf16 %v1269_v47, %v1269_v47  ;;  %5099 = vmatprep.subr.bf16.mxu1 %v6392_v0 }
 0x5c1   : > { %5084 = vmatmul.mubr.msk.bf16.vlgmr.msra.gmra.mrb[12].mxu0 %vm1247_vm5, %v1271_v49 }
 0x5c2   : > { %5094 = vmatpush3.bf16.xpose.msra.mxu0 %v1427_v50  ;;  %5095 = vmatprep.mubr.msk.bf16.mxu0 %vm6393_vm0, %v6392_v0 }
 0x5c3   : > { %5105 = vmatprep.subr.bf16.mxu0 %v6392_v0 }
 0x5c5   : > { %5090 = vmatmul.mubr.msk.bf16.vlgmr.msra.gmra.mrb[12].mxu1 %vm1154_vm3, %v1367_v51 }
 0x5c6   : > { %5101 = vmatprep.mubr.msk.bf16.mxu1 %vm6393_vm0, %v6392_v0 }
 0x5c9   : > { %5096 = vmatmul.mubr.msk.bf16.vlgmr.msra.gmra.mrb[16].mxu0 %vm1154_vm3, %v1419_v52 }
 0x5ca   : > { %5107 = vmatprep.mubr.msk.bf16.mxu0 %vm6393_vm0, %v6392_v0 }
 0x690   : > { %v7060_v53 = vpop.f32.mrb[8].mxu1 }
 0x691   : > { %v5079_v54 = vpop.f32.mrb[9].mxu1 }
 0x692   : > { %v1316_v55 = vpop.f32.mrb[10].mxu1 }
 0x693   : > { %v5080_v56 = vpop.f32.mrb[11].mxu1 }
 0x694   : > { %v7062_v57 = vpop.f32.mrb[12].mxu0 }
 0x695   : > { %v5085_v58 = vpop.f32.mrb[13].mxu0 }
 0x696   : > { %v1362_v59 = vpop.f32.mrb[14].mxu0 }
 0x697   : > { %v5086_v61 = vpop.f32.mrb[15].mxu0 }
 0x698   : > { %v1411_v62 = vpop.f32.mrb[12].mxu1 }
 0x699   : > { %v5091_v1 = vpop.f32.mrb[13].mxu1  ;;  %v1469_v2 = vsel %vm1247_vm5, %v1411_v62, -inf }
 0x69a   : > { %1470 = vmax.xlane.f32.xlu0 %v1469_v2  ;;  %v1414_v3 = vpop.f32.mrb[14].mxu1 }
 0x69b   : > { %v5092_v4 = vpop.f32.mrb[15].mxu1 }
 0x69c   : > { %v1463_v6 = vpop.f32.mrb[16].mxu0 }
 0x69d   : > { %v5097_v10 = vpop.f32.mrb[17].mxu0  ;;  %v1472_v11 = vsel %vm1247_vm5, %v1463_v6, -inf }
 0x69e   : > { %1473 = vmax.xlane.f32.xlu1 %v1472_v11  ;;  %v1466_v12 = vpop.f32.mrb[18].mxu0 }
 0x69f   : > { %v5098_v13 = vpop.f32.mrb[19].mxu0 }
 0x6af   : > { %1543 = vrot.lane.b32.xlu1 %v7016_v8, %s6395_s27 }
 0x6b3   : > { %1593 = vrot.lane.b32.xlu1 %v7000_v60, %s6396_s29 }
 0x6b7   : > { %1643 = vrot.lane.b32.xlu1 %v7002_v63, %s6396_s29 }
 0x6bb   : > { %1641 = vrot.lane.b32.xlu1 %v7018_v9, %s6396_s29 }
 0x727   : > { %v1471_v14 = vpop.xlane.xlu0 %1470 }
 0x728   : > { %v1475_v15 = vsub.f32 %v1411_v62, %v1471_v14 }
 0x72a   : > { %v1477_v16 = vmul.f32 1.442695, %v1475_v15 }
 0x72b   : > { %v1474_v17 = vpop.xlane.xlu1 %1473 }
 0x72c   : > { %5771 = vpow2.f32 %v1477_v16  ;;  %v1476_v18 = vsub.f32 %v1463_v6, %v1474_v17 }
 0x72e   : > { %v1479_v19 = vmul.f32 1.442695, %v1476_v18 }
 0x72f   : > { %v1544_v20 = vpop.permute.xlu1 %1543 }
 0x730   : > { %5773 = vpow2.f32 %v1479_v19  ;;  %v1549_v21 = vsel %vm1275_vm4, %v1544_v20, 0 }
 0x731   : > { %5106 = vmatpush3.bf16.msra.mxu0 %v1549_v21 }
 0x732   : > { %5117 = vmatprep.subr.bf16.mxu0 %v6392_v0 }
 0x733   : > { %v1594_v32 = vpop.permute.xlu1 %1593 }
 0x734   : > { %v1599_v38 = vsel %vm1154_vm3, %v1594_v32, 0 }
 0x736   : > { %v5772_v22 = vpop.eup %5771 }
 0x737   : > { %v1481_v23 = vsel %vm1247_vm5, %v5772_v22, 0.0  ;;  %v1644_v37 = vpop.permute.xlu1 %1643 }
 0x738   : > { %1482 = vadd.xlane.f32.xlu0 %v1481_v23  ;;  %v1649_v42 = vsel %vm1154_vm3, %v1644_v37, 0 }
 0x73a   : > { %v5774_v24 = vpop.eup %5773 }
 0x73b   : > { %v1484_v25 = vsel %vm1247_vm5, %v5774_v24, 0.0  ;;  %v1642_v47 = vpop.permute.xlu1 %1641 }
 0x73c   : > { %1485 = vadd.xlane.f32.xlu0 %v1484_v25 }
 0x752   : > { %1494 = vrot.lane.b32.xlu0 %v7011_v5, %s6395_s27 }
 0x756   : > { %1591 = vrot.lane.b32.xlu0 %v7014_v7, %s6396_s29 }
 0x7c5   : > { %v1483_v26 = vpop.xlane.xlu0 %1482 }
 0x7c6   : > { %5775 = vrcp.f32 %v1483_v26 }
 0x7c9   : > { %v1486_v27 = vpop.xlane.xlu0 %1485 }
 0x7ca   : > { %5777 = vrcp.f32 %v1486_v27 }
 0x7cd   : > { %v1495_v28 = vpop.permute.xlu0 %1494 }
 0x7ce   : > { %v1500_v29 = vsel %vm1275_vm4, %v1495_v28, 0 }
 0x7cf   : > { %5100 = vmatpush3.bf16.msra.mxu1 %v1500_v29 }
 0x7d0   : > { %v5776_v31 = vpop.eup %5775  ;;  %5111 = vmatprep.subr.bf16.mxu1 %v6392_v0 }
 0x7d1   : > { %v1488_v33 = vmul.f32 %v5776_v31, %v5772_v22  ;;  %v1592_v45 = vpop.permute.xlu0 %1591 }
 0x7d3   : > { %v1491_v34 = vpack.c.bf16 %v1488_v33, %v1488_v33 }
 0x7d4   : > { %v5778_v35 = vpop.eup %5777 }
 0x7d5   : > { %v1490_v36 = vmul.f32 %v5778_v35, %v5774_v24  ;;  %5102 = vmatmul.mubr.msk.bf16.vlgmr.msra.gmra.mrb[16].mxu1 %vm1247_vm5, %v1491_v34 }
 0x7d6   : > { %5113 = vmatprep.mubr.msk.bf16.mxu1 %vm6393_vm0, %v6392_v0 }
 0x7d7   : > { %v1492_v41 = vpack.c.bf16 %v1490_v36, %v1490_v36 }
 0x7d8   : > { %5112 = vmatpush3.bf16.xpose.msra.mxu1 %v1599_v38 }
 0x7d9   : > { %5108 = vmatmul.mubr.msk.bf16.vlgmr.msra.gmra.mrb[20].mxu0 %vm1247_vm5, %v1492_v41  ;;  %5123 = vmatprep.subr.bf16.mxu1 %v6392_v0 }
 0x7da   : > { %5118 = vmatpush3.bf16.xpose.msra.mxu0 %v1649_v42  ;;  %5119 = vmatprep.mubr.msk.bf16.mxu0 %vm6393_vm0, %v6392_v0 }
 0x7db   : > { %5129 = vmatprep.subr.bf16.mxu0 %v6392_v0 }
 0x7df   : > { %5114 = vmatmul.mubr.msk.bf16.vlgmr.msra.gmra.mrb[20].mxu1 %vm1154_vm3, %v1592_v45 }
 0x7e0   : > { %5125 = vmatprep.mubr.msk.bf16.mxu1 %vm6393_vm0, %v6392_v0 }
 0x7e1   : > { %5120 = vmatmul.mubr.msk.bf16.vlgmr.msra.gmra.mrb[24].mxu0 %vm1154_vm3, %v1642_v47 }
 0x7e2   : > { %5131 = vmatprep.mubr.msk.bf16.mxu0 %vm6393_vm0, %v6392_v0 }
 0x8a8   : > { %v7100_v49 = vpop.f32.mrb[16].mxu1 }
 0x8a9   : > { %v5103_v50 = vpop.f32.mrb[17].mxu1 }
 0x8aa   : > { %v1539_v51 = vpop.f32.mrb[18].mxu1 }
 0x8ab   : > { %v5104_v52 = vpop.f32.mrb[19].mxu1 }
 0x8ac   : > { %v7102_v54 = vpop.f32.mrb[20].mxu0 }
 0x8ad   : > { %v5573_v55 = vpack.i.bf16 %v7102_v54, %v7100_v49  ;;  %v5109_v56 = vpop.f32.mrb[21].mxu0 }
 0x8ae   : > { %v1588_v58 = vpop.f32.mrb[22].mxu0 }
 0x8af   : > { %v5110_v59 = vpop.f32.mrb[23].mxu0 }
 0x8b2   : > { %v1635_v61 = vpop.f32.mrb[20].mxu1 }
 0x8b3   : > { %v5115_v62 = vpop.f32.mrb[21].mxu1  ;;  %v1691_v1 = vsel %vm1247_vm5, %v1635_v61, -inf }
 0x8b4   : > { %1692 = vmax.xlane.f32.xlu0 %v1691_v1  ;;  %v1638_v2 = vpop.f32.mrb[22].mxu1  ;;  %v1685_v3 = vpop.f32.mrb[24].mxu0 }
 0x8b5   : > { %v5116_v4 = vpop.f32.mrb[23].mxu1  ;;  %v5121_v6 = vpop.f32.mrb[25].mxu0  ;;  %v1694_v10 = vsel %vm1247_vm5, %v1685_v3, -inf }
 0x8b6   : > { %1695 = vmax.xlane.f32.xlu1 %v1694_v10  ;;  %v1688_v11 = vpop.f32.mrb[26].mxu0 }
 0x8b7   : > { %v5122_v12 = vpop.f32.mrb[27].mxu0 }
 0x8c7   : > { %1763 = vrot.lane.b32.xlu1 %v7016_v8, %s6396_s29 }
 0x8cb   : > { %1813 = vrot.lane.b32.xlu1 %v7000_v60, %s6397_s3 }
 0x8cf   : > { %1863 = vrot.lane.b32.xlu1 %v7002_v63, %s6397_s3 }
 0x8d3   : > { %1861 = vrot.lane.b32.xlu1 %v7018_v9, %s6397_s3 }
 0x941   : > { %v1693_v13 = vpop.xlane.xlu0 %1692 }
 0x942   : > { %v1697_v14 = vsub.f32 %v1635_v61, %v1693_v13 }
 0x943   : > { %v1696_v15 = vpop.xlane.xlu1 %1695 }
 0x944   : > { %v1699_v16 = vmul.f32 1.442695, %v1697_v14  ;;  %v1698_v17 = vsub.f32 %v1685_v3, %v1696_v15 }
 0x946   : > { %5779 = vpow2.f32 %v1699_v16  ;;  %v1701_v18 = vmul.f32 1.442695, %v1698_v17 }
 0x947   : > { %v1764_v19 = vpop.permute.xlu1 %1763 }
 0x948   : > { %5781 = vpow2.f32 %v1701_v18  ;;  %v1769_v20 = vsel %vm1275_vm4, %v1764_v19, 0 }
 0x949   : > { %5130 = vmatpush3.bf16.msra.mxu0 %v1769_v20 }
 0x94a   : > { %5141 = vmatprep.subr.bf16.mxu0 %v6392_v0 }
 0x94b   : > { %v1814_v27 = vpop.permute.xlu1 %1813 }
 0x94f   : > { %v1864_v33 = vpop.permute.xlu1 %1863 }
 0x950   : > { %v5780_v60 = vpop.eup %5779  ;;  %v1869_v35 = vsel %vm1154_vm3, %v1864_v33, 0  ;;  %v5642_v33 = vld [vmem:[#allocation10 + $0x38] sm:$0xff]  }
 0x951   : > { %v1703_v63 = vsel %vm1247_vm5, %v5780_v60, 0.0 }
 0x952   : > { %v5782_v21 = vpop.eup %5781  ;;  %1704 = vadd.xlane.f32.xlu0 %v1703_v63 }
 0x953   : > { %v1706_v9 = vsel %vm1247_vm5, %v5782_v21, 0.0  ;;  %v1862_v37 = vpop.permute.xlu1 %1861 }
 0x956   : > { %1707 = vadd.xlane.f32.xlu0 %v1706_v9 }
 0x96c   : > { %1715 = vrot.lane.b32.xlu0 %v7011_v5, %s6396_s29 }
 0x970   : > { %1811 = vrot.lane.b32.xlu0 %v7014_v7, %s6397_s3  ;;  %v1819_v7 = vsel %vm1154_vm3, %v1814_v27, 0  ;;  %v5637_v27 = vld [vmem:[#allocation10 + $0x10] sm:$0xff]  }
 0x9df   : > { %v1705_v22 = vpop.xlane.xlu0 %1704 }
 0x9e0   : > { %5783 = vrcp.f32 %v1705_v22 }
 0x9e3   : > { %v1708_v23 = vpop.xlane.xlu0 %1707 }
 0x9e4   : > { %5785 = vrcp.f32 %v1708_v23 }
 0x9e7   : > { %v1716_v24 = vpop.permute.xlu0 %1715 }
 0x9e8   : > { %v1721_v25 = vsel %vm1275_vm4, %v1716_v24, 0 }
 0x9e9   : > { %5124 = vmatpush3.bf16.msra.mxu1 %v1721_v25  ;;  %v5635_v25 = vld [vmem:[#allocation10] sm:$0xff]  }
 0x9ea   : > { %v5784_v26 = vpop.eup %5783  ;;  %5135 = vmatprep.subr.bf16.mxu1 %v6392_v0 }
 0x9eb   : > { %v1710_v28 = vmul.f32 %v5784_v26, %v5780_v60  ;;  %v1812_v36 = vpop.permute.xlu0 %1811  ;;  %v5636_v26 = vld [vmem:[#allocation10 + $0x8] sm:$0xff]  }
 0x9ed   : > { %v1713_v29 = vpack.c.bf16 %v1710_v28, %v1710_v28  ;;  %v5638_v28 = vld [vmem:[#allocation10 + $0x18] sm:$0xff]  }
 0x9ee   : > { %v5786_v31 = vpop.eup %5785 }
 0x9ef   : > { %v1712_v32 = vmul.f32 %v5786_v31, %v5782_v21  ;;  %5126 = vmatmul.mubr.msk.bf16.vlgmr.msra.gmra.mrb[24].mxu1 %vm1247_vm5, %v1713_v29  ;;  %v5639_v29 = vld [vmem:[#allocation10 + $0x20] sm:$0xff]   ;;  %v5640_v31 = vld [vmem:[#allocation10 + $0x28] sm:$0xff]  }
 0x9f0   : > { %5137 = vmatprep.mubr.msk.bf16.mxu1 %vm6393_vm0, %v6392_v0 }
 0x9f1   : > { %v1714_v34 = vpack.c.bf16 %v1712_v32, %v1712_v32  ;;  %v5641_v32 = vld [vmem:[#allocation10 + $0x30] sm:$0xff]  }
 0x9f2   : > { %5136 = vmatpush3.bf16.xpose.msra.mxu1 %v1819_v7 }
 0x9f3   : > { %5132 = vmatmul.mubr.msk.bf16.vlgmr.msra.gmra.mrb[28].mxu0 %vm1247_vm5, %v1714_v34  ;;  %5147 = vmatprep.subr.bf16.mxu1 %v6392_v0 }
 0x9f4   : > { %5142 = vmatpush3.bf16.xpose.msra.mxu0 %v1869_v35  ;;  %5143 = vmatprep.mubr.msk.bf16.mxu0 %vm6393_vm0, %v6392_v0 }
 0x9f5   : > { %5153 = vmatprep.subr.bf16.mxu0 %v6392_v0 }
 0x9f9   : > { %5138 = vmatmul.mubr.msk.bf16.vlgmr.msra.gmra.mrb[28].mxu1 %vm1154_vm3, %v1812_v36 }
 0x9fa   : > { %5149 = vmatprep.mubr.msk.bf16.mxu1 %vm6393_vm0, %v6392_v0 }
 0x9fb   : > { %5144 = vmatmul.mubr.msk.bf16.vlgmr.msra.gmra.mrb[32].mxu0 %vm1154_vm3, %v1862_v37 }
 0x9fc   : > { %5155 = vmatprep.mubr.msk.bf16.mxu0 %vm6393_vm0, %v6392_v0 }
 0xac2   : > { %v1757_v38 = vpop.f32.mrb[24].mxu1 }
 0xac3   : > { %v5127_v41 = vpop.f32.mrb[25].mxu1 }
 0xac4   : > { %v1760_v42 = vpop.f32.mrb[26].mxu1 }
 0xac5   : > { %v5128_v45 = vpop.f32.mrb[27].mxu1 }
 0xac6   : > { %v1805_v47 = vpop.f32.mrb[28].mxu0 }
 0xac7   : > { %v5578_v50 = vpack.i.bf16 %v1805_v47, %v1757_v38  ;;  %v5133_v51 = vpop.f32.mrb[29].mxu0 }
 0xac8   : > { %v1808_v52 = vpop.f32.mrb[30].mxu0 }
 0xac9   : > { %v5134_v56 = vpop.f32.mrb[31].mxu0 }
 0xacc   : > { %v1855_v58 = vpop.f32.mrb[28].mxu1 }
 0xacd   : > { %v5139_v59 = vpop.f32.mrb[29].mxu1  ;;  %v1911_v61 = vsel %vm1247_vm5, %v1855_v58, -inf }
 0xace   : > { %1912 = vmax.xlane.f32.xlu0 %v1911_v61  ;;  %v1858_v62 = vpop.f32.mrb[30].mxu1  ;;  %v1905_v1 = vpop.f32.mrb[32].mxu0 }
 0xacf   : > { %v5140_v2 = vpop.f32.mrb[31].mxu1  ;;  %v5145_v3 = vpop.f32.mrb[33].mxu0  ;;  %v1914_v4 = vsel %vm1247_vm5, %v1905_v1, -inf }
 0xad0   : > { %1915 = vmax.xlane.f32.xlu1 %v1914_v4  ;;  %v1908_v6 = vpop.f32.mrb[34].mxu0 }
 0xad1   : > { %v5146_v10 = vpop.f32.mrb[35].mxu0 }
 0xae1   : > { %1983 = vrot.lane.b32.xlu1 %v7016_v8, %s6397_s3 }
 0xae5   : > { %5574 = vrot.lane.b32.xlu1 %v5573_v55, %s6397_s3 }
 0xae9   : > { %5579 = vrot.lane.b32.xlu1 %v5578_v50, %s6396_s29 }
 0xb5b   : > { %v1913_v11 = vpop.xlane.xlu0 %1912 }
 0xb5c   : > { %v1917_v12 = vsub.f32 %v1855_v58, %v1913_v11 }
 0xb5d   : > { %v1916_v13 = vpop.xlane.xlu1 %1915 }
 0xb5e   : > { %v1919_v14 = vmul.f32 1.442695, %v1917_v12  ;;  %v1918_v15 = vsub.f32 %v1905_v1, %v1916_v13  ;;  %v4736_v12 = vld [vmem:[#allocation12] ss:$0 sm:$0xff] }
 0xb60   : > { %5787 = vpow2.f32 %v1919_v14  ;;  %v1921_v16 = vmul.f32 1.442695, %v1918_v15 }
 0xb61   : > { %v1984_v17 = vpop.permute.xlu1 %1983 }
 0xb62   : > { %5789 = vpow2.f32 %v1921_v16  ;;  %v1989_v18 = vsel %vm1275_vm4, %v1984_v17, 0 }
 0xb63   : > { %5154 = vmatpush3.bf16.msra.mxu0 %v1989_v18 }
 0xb65   : > { %v5575_v47 = vpop.permute.xlu1 %5574 }
 0xb66   : > { %v5577_v51 = vunpack.i.h.bf16 %v5575_v47  ;;  %v5576_v52 = vunpack.i.l.bf16 %v5575_v47  ;;  %v5676_v47 = vld [vmem:[#allocation19 + $0x20] sm:$0xff]  }
 0xb68   : > { %v2056_v61 = vsel %vm1154_vm3, %v7062_v57, %v5577_v51  ;;  %v2055_v62 = vsel %vm1154_vm3, %v7060_v53, %v5576_v52 }
 0xb69   : > { %v5580_v50 = vpop.permute.xlu1 %5579 }
 0xb6a   : > { %v5788_v8 = vpop.eup %5787  ;;  %v5582_v56 = vunpack.i.h.bf16 %v5580_v50  ;;  %v5581_v58 = vunpack.i.l.bf16 %v5580_v50  ;;  %v5677_v50 = vld [vmem:[#allocation19 + $0x68] sm:$0xff]  }
 0xb6b   : > { %v1923_v19 = vsel %vm1247_vm5, %v5788_v8, 0.0 }
 0xb6c   : > { %v5790_v20 = vpop.eup %5789  ;;  %1924 = vadd.xlane.f32.xlu0 %v1923_v19  ;;  %v2058_v3 = vsel %vm2057_vm6, %v2055_v62, %v5581_v58  ;;  %v2059_v4 = vsel %vm2057_vm6, %v2056_v61, %v5582_v56  ;;  %v5645_v19 = vld [vmem:[#allocation16 + $0x4] ss:$8 sps:$4 sm:$0xff]  }
 0xb6d   : > { %v1926_v49 = vsel %vm1247_vm5, %v5790_v20, 0.0  ;;  %2328 = vmatprep.subr.bf16.mxu0 %v5645_v19 }
 0xb70   : > { %1927 = vadd.xlane.f32.xlu0 %v1926_v49  ;;  %v5646_v49 = vld [vmem:[#allocation16 + $0x10] ss:$8 sps:$4 sm:$0xff]  }
 0xb86   : > { %1935 = vrot.lane.b32.xlu0 %v7011_v5, %s6397_s3 }
 0xbf9   : > { %v1925_v54 = vpop.xlane.xlu0 %1924 }
 0xbfa   : > { %5791 = vrcp.f32 %v1925_v54 }
 0xbfd   : > { %v1928_v55 = vpop.xlane.xlu0 %1927 }
 0xbfe   : > { %5793 = vrcp.f32 %v1928_v55 }
 0xc01   : > { %v1936_v60 = vpop.permute.xlu0 %1935 }
 0xc02   : > { %v1941_v63 = vsel %vm1275_vm4, %v1936_v60, 0 }
 0xc03   : > { %5148 = vmatpush3.bf16.msra.mxu1 %v1941_v63 }
 0xc04   : > { %v5792_v21 = vpop.eup %5791  ;;  %5159 = vmatprep.subr.bf16.mxu1 %v6392_v0 }
 0xc05   : > { %v1930_v9 = vmul.f32 %v5792_v21, %v5788_v8  ;;  %v5643_v8 = vld [vmem:[#allocation16] ss:$8 sps:$4 sm:$0xff]  }
 0xc07   : > { %v1933_v22 = vpack.c.bf16 %v1930_v9, %v1930_v9 }
 0xc08   : > { %v5794_v23 = vpop.eup %5793 }
 0xc09   : > { %v1932_v24 = vmul.f32 %v5794_v23, %v5790_v20  ;;  %5150 = vmatmul.mubr.msk.bf16.vlgmr.msra.gmra.mrb[32].mxu1 %vm1247_vm5, %v1933_v22  ;;  %v5648_v20 = vld [vmem:[#allocation16 + $0x14] ss:$8 sps:$4 sm:$0xff]   ;;  %v5651_v22 = vld [vmem:[#allocation16 + $0x24] ss:$8 sps:$4 sm:$0xff]   ;;  %v5649_v23 = vld [vmem:[#allocation16 + $0x20] ss:$8 sps:$4 sm:$0xff]  }
 0xc0a   : > { %5175 = vmatprep.mubr.msk.bf16.mxu1 %vm6393_vm0, %v6392_v0  ;;  %5160 = vmatpush3.bf16.msra.mxu1 %v5635_v25  ;;  %v5657_v25 = vld [vmem:[#allocation16 + $0x44] ss:$8 sps:$4 sm:$0xff]  }
 0xc0b   : > { %v1934_v5 = vpack.c.bf16 %v1932_v24, %v1932_v24  ;;  %5161 = vmatprep.subr.bf16.mxu1 %v6392_v0  ;;  %v5654_v24 = vld [vmem:[#allocation16 + $0x34] ss:$8 sps:$4 sm:$0xff]  }
 0xc0d   : > { %5156 = vmatmul.mubr.msk.bf16.vlgmr.msra.gmra.mrb[36].mxu0 %vm1247_vm5, %v1934_v5  ;;  %v5652_v5 = vld [vmem:[#allocation16 + $0x30] ss:$8 sps:$4 sm:$0xff]  }
 0xc0e   : > { %2360 = vmatprep.mubr.bf16.mxu0 %v6394_v30  ;;  %5162 = vmatpush3.bf16.msra.mxu1 %v5636_v26  ;;  %v5655_v26 = vld [vmem:[#allocation16 + $0x40] ss:$8 sps:$4 sm:$0xff]  }
 0xc0f   : > { %5163 = vmatprep.subr.bf16.mxu1 %v6392_v0  ;;  %2329 = vmatpush1.bf16.msra.mxu0 %v5643_v8 }
 0xc10   : > { %2330 = vmatprep.subr.bf16.mxu0 %v5648_v20 }
 0xc12   : > { %5164 = vmatpush3.bf16.msra.mxu1 %v5637_v27  ;;  %v5660_v27 = vld [vmem:[#allocation16 + $0x54] ss:$8 sps:$4 sm:$0xff]  }
 0xc13   : > { %5165 = vmatprep.subr.bf16.mxu1 %v6392_v0  ;;  %2331 = vmatpush1.bf16.msra.mxu0 %v5646_v49 }
 0xc14   : > { %2332 = vmatprep.subr.bf16.mxu0 %v5651_v22 }
 0xc16   : > { %5166 = vmatpush3.bf16.msra.mxu1 %v5638_v28  ;;  %v5658_v28 = vld [vmem:[#allocation16 + $0x50] ss:$8 sps:$4 sm:$0xff]  }
 0xc17   : > { %5167 = vmatprep.subr.bf16.mxu1 %v6392_v0  ;;  %2333 = vmatpush1.bf16.msra.mxu0 %v5649_v23 }
 0xc18   : > { %2334 = vmatprep.subr.bf16.mxu0 %v5654_v24 }
 0xc1a   : > { %5168 = vmatpush3.bf16.msra.mxu1 %v5639_v29  ;;  %v5663_v29 = vld [vmem:[#allocation16 + $0x64] ss:$8 sps:$4 sm:$0xff]  }
 0xc1b   : > { %5169 = vmatprep.subr.bf16.mxu1 %v6392_v0  ;;  %2335 = vmatpush1.bf16.msra.mxu0 %v5652_v5 }
 0xc1c   : > { %2336 = vmatprep.subr.bf16.mxu0 %v5657_v25 }
 0xc1e   : > { %5170 = vmatpush3.bf16.msra.mxu1 %v5640_v31  ;;  %v5661_v31 = vld [vmem:[#allocation16 + $0x60] ss:$8 sps:$4 sm:$0xff]  }
 0xc1f   : > { %5171 = vmatprep.subr.bf16.mxu1 %v6392_v0  ;;  %2337 = vmatpush1.bf16.msra.mxu0 %v5655_v26  ;;  %v4763_v26 = vld [vmem:[#allocation21] ss:$0 sm:$0xff] }
 0xc20   : > { %2338 = vmatprep.subr.bf16.mxu0 %v5660_v27 }
 0xc22   : > { %5172 = vmatpush3.bf16.msra.mxu1 %v5641_v32  ;;  %v5666_v32 = vld [vmem:[#allocation16 + $0x74] ss:$8 sps:$4 sm:$0xff]  }
 0xc23   : > { %5173 = vmatprep.subr.bf16.mxu1 %v6392_v0  ;;  %2339 = vmatpush1.bf16.msra.mxu0 %v5658_v28 }
 0xc24   : > { %2340 = vmatprep.subr.bf16.mxu0 %v5663_v29 }
 0xc26   : > { %5174 = vmatpush3.bf16.msra.mxu1 %v5642_v33  ;;  %v5664_v33 = vld [vmem:[#allocation16 + $0x70] ss:$8 sps:$4 sm:$0xff]  }
 0xc27   : > { %2341 = vmatpush1.bf16.msra.mxu0 %v5661_v31 }
 0xc28   : > { %2342 = vmatprep.subr.bf16.mxu0 %v5666_v32 }
 0xc2b   : > { %2343 = vmatpush1.bf16.msra.mxu0 %v5664_v33 }
 0xcdc   : > { %v1977_v7 = vpop.f32.mrb[32].mxu1 }
 0xcdd   : > { %v5151_v34 = vpop.f32.mrb[33].mxu1 }
 0xcde   : > { %v1980_v35 = vpop.f32.mrb[34].mxu1  ;;  %v5668_v34 = vld [vmem:[#allocation19] sm:$0xff]  }
 0xcdf   : > { %v5152_v36 = vpop.f32.mrb[35].mxu1  ;;  %v5669_v35 = vld [vmem:[#allocation19 + $0x48] sm:$0xff]  }
 0xce0   : > { %v2025_v37 = vpop.f32.mrb[36].mxu0  ;;  %v5670_v36 = vld [vmem:[#allocation19 + $0x8] sm:$0xff]  }
 0xce1   : > { %v5583_v38 = vpack.i.bf16 %v2025_v37, %v1977_v7  ;;  %v5157_v41 = vpop.f32.mrb[37].mxu0  ;;  %v5667_v7 = vld [vmem:[#allocation19 + $0x40] sm:$0xff]   ;;  %v5671_v37 = vld [vmem:[#allocation19 + $0x50] sm:$0xff]  }
 0xce2   : > { %v2028_v42 = vpop.f32.mrb[38].mxu0  ;;  %4926 = vmatprep.subr.bf16.mxu1 %v5667_v7  ;;  %v5673_v41 = vld [vmem:[#allocation19 + $0x58] sm:$0xff]  }
 0xce3   : > { %5584 = vrot.lane.b32.xlu0 %v5583_v38, %s6395_s27  ;;  %v5158_v45 = vpop.f32.mrb[39].mxu0  ;;  %v5672_v38 = vld [vmem:[#allocation19 + $0x10] sm:$0xff]   ;;  %v5674_v42 = vld [vmem:[#allocation19 + $0x18] sm:$0xff]  }
 0xce4   : > { %v5675_v45 = vld [vmem:[#allocation19 + $0x60] sm:$0xff]  }
 0xd55   : > { %v5585_v59 = vpop.permute.xlu0 %5584 }
 0xd56   : > { %v5587_v1 = vunpack.i.h.bf16 %v5585_v59  ;;  %v5586_v2 = vunpack.i.l.bf16 %v5585_v59 }
 0xd58   : > { %v2062_v6 = vsel %vm2060_vm7, %v2059_v4, %v5587_v1  ;;  %v2061_v10 = vsel %vm2060_vm7, %v2058_v3, %v5586_v2  ;;  %v4745_v2 = vld [vmem:[#allocation13] ss:$0 sm:$0xff] }
 0xd59   : > { %v2063_v11 = vpack.c.bf16 %v2062_v6, %v2061_v10  ;;  %v4746_v10 = vld [vmem:[#allocation15] ss:$0 sm:$0xff] }
 0xd5b   : > { %5176 = vmatmul.mubr.bf16.vlgmr.msra.gmra.mrb[36].mxu1 %v2063_v11 }
 0xd5c   : > { %4927 = vmatpush3.bf16.msra.mxu1 %v5668_v34 }
 0xd5d   : > { %4928 = vmatprep.subr.bf16.mxu1 %v5669_v35 }
 0xd60   : > { %4929 = vmatpush3.bf16.msra.mxu1 %v5670_v36  ;;  %v5683_v36 = vld [vmem:[#allocation7 + $0xc0] ss:$12 sps:$4 sm:$0xff]  }
 0xd61   : > { %4930 = vmatprep.subr.bf16.mxu1 %v5671_v37  ;;  %v5685_v37 = vld [vmem:[#allocation7 + $0xc4] ss:$12 sps:$4 sm:$0xff]  }
 0xd62   : > { %2775 = vmatprep.subr.bf16.mxu0 %v5685_v37 }
 0xd64   : > { %4931 = vmatpush3.bf16.msra.mxu1 %v5672_v38  ;;  %v5686_v38 = vld [vmem:[#allocation7 + $0xc8] ss:$12 sps:$4 sm:$0xff]  }
 0xd65   : > { %4932 = vmatprep.subr.bf16.mxu1 %v5673_v41  ;;  %v5689_v41 = vld [vmem:[#allocation7 + $0xdc] ss:$12 sps:$4 sm:$0xff]  }
 0xd68   : > { %4933 = vmatpush3.bf16.msra.mxu1 %v5674_v42  ;;  %v5690_v42 = vld [vmem:[#allocation7 + $0xe0] ss:$12 sps:$4 sm:$0xff]  }
 0xd69   : > { %4934 = vmatprep.subr.bf16.mxu1 %v5675_v45  ;;  %v5687_v45 = vld [vmem:[#allocation7 + $0xd8] ss:$12 sps:$4 sm:$0xff]  }
 0xd6c   : > { %4935 = vmatpush3.bf16.msra.mxu1 %v5676_v47 }
 0xd6d   : > { %4936 = vmatprep.subr.bf16.mxu1 %v5677_v50 }
 0xe2e   : > { %v2169_v13 = vpop.f32.mrb[36].mxu1 }
 0xe2f   : > { %v2170_v14 = vadd.f32 %v4736_v12, %v2169_v13  ;;  %v5177_v15 = vpop.f32.mrb[37].mxu1 }
 0xe30   : > { %v2172_v57 = vpop.f32.mrb[38].mxu1  ;;  %v5678_v15 = vld [vmem:[#allocation19 + $0x28] sm:$0xff]  }
 0xe31   : > { %v2173_v16 = vadd.f32 %v4736_v12, %v2172_v57  ;;  %v5178_v17 = vpop.f32.mrb[39].mxu1  ;;  %v2176_v53 = vadd.f32 %v2170_v14, %v6977_v39  ;;  %4937 = vmatpush3.bf16.msra.mxu1 %v5678_v15  ;;  %v5679_v57 = vld [vmem:[#allocation19 + $0x70] sm:$0xff]  }
 0xe32   : > { %4938 = vmatprep.subr.bf16.mxu1 %v5679_v57  ;;  %v5681_v17 = vld [vmem:[#allocation19 + $0x78] sm:$0xff]   ;;  %v5709_v57 = vld [vmem:[#allocation7 + $0x154] ss:$12 sps:$4 sm:$0xff]  }
 0xe33   : > { %2178 = vadd.xlane.f32.xlu1 %v2176_v53  ;;  %v2177_v18 = vadd.f32 %v2173_v16, %v6979_v40  ;;  %v5680_v16 = vld [vmem:[#allocation19 + $0x30] sm:$0xff]  }
 0xe34   : > { %v5706_v15 = vld [vmem:[#allocation7 + $0x140] ss:$12 sps:$4 sm:$0xff]  }
 0xe35   : > { %2180 = vadd.xlane.f32.xlu0 %v2177_v18  ;;  %4939 = vmatpush3.bf16.msra.mxu1 %v5680_v16  ;;  %v5707_v16 = vld [vmem:[#allocation7 + $0x150] ss:$12 sps:$4 sm:$0xff]  }
 0xe36   : > { %4940 = vmatprep.subr.bf16.mxu1 %v5681_v17  ;;  %v5710_v17 = vld [vmem:[#allocation7 + $0x158] ss:$12 sps:$4 sm:$0xff]  }
 0xec0   : > { %v2179_v54 = vpop.xlane.xlu1 %2178 }
 0xec1   : > { %v2183_v55 = vmul.f32 0.0078125, %v2179_v54 }
 0xec2   : > { %v2181_v60 = vpop.xlane.xlu0 %2180 }
 0xec3   : > { %v2185_v63 = vsub.f32 %v2176_v53, %v2183_v55  ;;  %v2184_v21 = vmul.f32 0.0078125, %v2181_v60  ;;  %v5682_v53 = vld [vmem:[#allocation19 + $0x38] sm:$0xff]  }
 0xec4   : > { %4941 = vmatpush3.bf16.msra.mxu1 %v5682_v53  ;;  %v5713_v53 = vld [vmem:[#allocation7 + $0x16c] ss:$12 sps:$4 sm:$0xff]  }
 0xec5   : > { %v7181_v9 = vsub.f32 %v2177_v18, %v2184_v21  ;;  %v2187_v39 = vmul.f32 %v2185_v63, %v2185_v63  ;;  %5179 = vmatprep.subr.bf16.mxu1 %v6392_v0  ;;  %v2236_v18 = vld [vmem:[#allocation18] sm:$0x3] }
 0xec6   : > { %v2241_v8 = vrot.slane %v2236_v18, %v6995_v48  ;;  %v2245_v19 = vrot.slane %v2236_v18, %v6990_v44  ;;  %v5711_v18 = vld [vmem:[#allocation7 + $0x168] ss:$12 sps:$4 sm:$0xff]  }
 0xec7   : > { %2189 = vadd.xlane.f32.xlu0 %v2187_v39  ;;  %v2188_v40 = vmul.f32 %v7181_v9, %v7181_v9 }
 0xecb   : > { %2191 = vadd.xlane.f32.xlu0 %v2188_v40 }
 0xf54   : > { %v2190_v51 = vpop.xlane.xlu0 %2189 }
 0xf55   : > { %v2193_v52 = vmul.f32 0.0078125, %v2190_v51 }
 0xf57   : > { %v2195_v56 = vadd.f32 1e-05, %v2193_v52 }
 0xf58   : > { %v2192_v58 = vpop.xlane.xlu0 %2191 }
 0xf59   : > { %5795 = vrsqrt.f32 %v2195_v56  ;;  %v2194_v59 = vmul.f32 0.0078125, %v2192_v58 }
 0xf5b   : > { %v2196_v61 = vadd.f32 1e-05, %v2194_v59 }
 0xf5d   : > { %5797 = vrsqrt.f32 %v2196_v61 }
 0xf63   : > { %v5796_v62 = vpop.eup %5795 }
 0xf64   : > { %v2199_v1 = vmul.f32 %v5796_v62, %v2185_v63  ;;  %v5693_v62 = vld [vmem:[#allocation7 + $0xf4] ss:$12 sps:$4 sm:$0xff]  }
 0xf66   : > { %v2208_v6 = vmul.f32 %v4745_v2, %v2199_v1  ;;  %v5691_v1 = vld [vmem:[#allocation7 + $0xf0] ss:$12 sps:$4 sm:$0xff]  }
 0xf67   : > { %v5798_v3 = vpop.eup %5797 }
 0xf68   : > { %v2200_v4 = vmul.f32 %v5798_v3, %v7181_v9  ;;  %v2217_v12 = vadd.f32 %v4746_v10, %v2208_v6  ;;  %v5697_v3 = vld [vmem:[#allocation7 + $0x10c] ss:$12 sps:$4 sm:$0xff]   ;;  %v5698_v6 = vld [vmem:[#allocation7 + $0x110] ss:$12 sps:$4 sm:$0xff]  }
 0xf6a   : > { %v2209_v11 = vmul.f32 %v4745_v2, %v2200_v4  ;;  %v5694_v2 = vld [vmem:[#allocation7 + $0xf8] ss:$12 sps:$4 sm:$0xff]   ;;  %v5695_v4 = vld [vmem:[#allocation7 + $0x108] ss:$12 sps:$4 sm:$0xff]  }
 0xf6c   : > { %v2218_v13 = vadd.f32 %v4746_v10, %v2209_v11  ;;  %v5701_v10 = vld [vmem:[#allocation7 + $0x124] ss:$12 sps:$4 sm:$0xff]   ;;  %v5699_v11 = vld [vmem:[#allocation7 + $0x120] ss:$12 sps:$4 sm:$0xff]  }
 0xf6e   : > { %v2219_v14 = vpack.c.bf16 %v2218_v13, %v2217_v12 }
 0xf70   : > { %2361 = vmatmul.mubr.bf16.vlgmr.msra.gmra.mrb[40].mxu0 %v2219_v14  ;;  %v5703_v14 = vld [vmem:[#allocation7 + $0x138] ss:$12 sps:$4 sm:$0xff]  }
 0xf71   : > { %2807 = vmatprep.mubr.bf16.mxu0 %v6394_v30  ;;  %2776 = vmatpush1.bf16.msra.mxu0 %v5683_v36 }
 0xf72   : > { %2777 = vmatprep.subr.bf16.mxu0 %v5689_v41 }
 0xf75   : > { %2778 = vmatpush1.bf16.msra.mxu0 %v5687_v45 }
 0xf76   : > { %2779 = vmatprep.subr.bf16.mxu0 %v5693_v62 }
 0xf79   : > { %2780 = vmatpush1.bf16.msra.mxu0 %v5691_v1 }
 0xf7a   : > { %2781 = vmatprep.subr.bf16.mxu0 %v5697_v3 }
 0xf7d   : > { %2782 = vmatpush1.bf16.msra.mxu0 %v5695_v4 }
 0xf7e   : > { %2783 = vmatprep.subr.bf16.mxu0 %v5701_v10 }
 0xf81   : > { %2784 = vmatpush1.bf16.msra.mxu0 %v5699_v11 }
0x1043   : > { %v2362_v20 = vpop.f32.mrb[40].mxu0 }
0x1044   : > { %v2363_v49 = vadd.f32 %v2362_v20, %v2241_v8  ;;  %v2364_v54 = vpop.f32.mrb[41].mxu0 }
0x1045   : > { %v2365_v55 = vadd.f32 %v2364_v54, %v2245_v19  ;;  %v2366_v60 = vpop.f32.mrb[42].mxu0 }
0x1046   : > { %v2367_v63 = vadd.f32 %v2366_v60, %v2241_v8  ;;  %v2368_v21 = vpop.f32.mrb[43].mxu0  ;;  %v2371_v39 = vmax.f32 %v2363_v49, 0.0  ;;  %v5714_v8 = vld [vmem:[#allocation7 + $0x170] ss:$12 sps:$4 sm:$0xff]  }
0x1047   : > { %v2369_v9 = vadd.f32 %v2368_v21, %v2245_v19  ;;  %v2372_v22 = vmax.f32 %v2365_v55, 0.0  ;;  %v4780_v21 = vld [vmem:[#allocation22] ss:$0 sm:$0xff] }
0x1048   : > { %v2373_v40 = vmax.f32 %v2367_v63, 0.0 }
0x1049   : > { %v2374_v23 = vmax.f32 %v2369_v9, 0.0 }
0x104a   : > { %v2375_v24 = vpack.c.bf16 %v2373_v40, %v2371_v39 }
0x104b   : > { %v2376_v5 = vpack.c.bf16 %v2374_v23, %v2372_v22  ;;  %v4781_v23 = vld [vmem:[#allocation24] ss:$0 sm:$0xff] }
0x104d   : > { %2544 = vmatprep.mubr.bf16.mxu1 %v2376_v5 }
0x104e   : > { %2545 = vmatmul.mubr.bf16.vlgmr.msra.gmra.mrb[40].mxu1 %v2375_v24 }
0x104f   : > { %5195 = vmatprep.mubr.msk.bf16.mxu1 %vm6393_vm0, %v6392_v0  ;;  %5180 = vmatpush3.bf16.msra.mxu1 %v5686_v38 }
0x1050   : > { %5181 = vmatprep.subr.bf16.mxu1 %v6392_v0 }
0x1053   : > { %5182 = vmatpush3.bf16.msra.mxu1 %v5690_v42 }
0x1054   : > { %5183 = vmatprep.subr.bf16.mxu1 %v6392_v0 }
0x1057   : > { %5184 = vmatpush3.bf16.msra.mxu1 %v5694_v2 }
0x1058   : > { %5185 = vmatprep.subr.bf16.mxu1 %v6392_v0 }
0x105b   : > { %5186 = vmatpush3.bf16.msra.mxu1 %v5698_v6 }
0x105c   : > { %5187 = vmatprep.subr.bf16.mxu1 %v6392_v0 }
0x1121   : > { %v4942_v25 = vpop.f32.mrb[40].mxu1 }
0x1122   : > { %v4943_v27 = vpop.f32.mrb[41].mxu1 }
0x1123   : > { %v4944_v28 = vadd.f32 %v4943_v27, %v4942_v25  ;;  %v4945_v29 = vpop.f32.mrb[42].mxu1  ;;  %v2630_v27 = vld [vmem:[#allocation9 + $0x3] sm:$0x7] }
0x1124   : > { %v4946_v31 = vpop.f32.mrb[43].mxu1  ;;  %v2635_v42 = vrot.slane %v2630_v27, %v6995_v48 }
0x1125   : > { %v2547_v32 = vadd.f32 %v4944_v28, %v4763_v26  ;;  %v4947_v33 = vadd.f32 %v4946_v31, %v4945_v29  ;;  %v2639_v28 = vrot.slane %v2630_v27, %v6990_v44 }
0x1127   : > { %v2550_v7 = vadd.f32 %v4947_v33, %v4763_v26  ;;  %v2553_v34 = vadd.f32 %v2547_v32, %v2217_v12  ;;  %v5702_v12 = vld [vmem:[#allocation7 + $0x128] ss:$12 sps:$4 sm:$0xff]   ;;  %v2643_v32 = vrot.slane %v2630_v27, %v931_v46 }
0x1128   : > { %5188 = vmatpush3.bf16.msra.mxu1 %v5702_v12 }
0x1129   : > { %2555 = vadd.xlane.f32.xlu1 %v2553_v34  ;;  %v2554_v35 = vadd.f32 %v2550_v7, %v2218_v13  ;;  %v5705_v13 = vld [vmem:[#allocation7 + $0x13c] ss:$12 sps:$4 sm:$0xff]   ;;  %5189 = vmatprep.subr.bf16.mxu1 %v6392_v0 }
0x112a   : > { %2785 = vmatprep.subr.bf16.mxu0 %v5705_v13 }
0x112b   : > { %2557 = vadd.xlane.f32.xlu0 %v2554_v35  ;;  %2786 = vmatpush1.bf16.msra.mxu0 %v5703_v14 }
0x112c   : > { %5190 = vmatpush3.bf16.msra.mxu1 %v5706_v15  ;;  %2787 = vmatprep.subr.bf16.mxu0 %v5709_v57 }
0x112d   : > { %5191 = vmatprep.subr.bf16.mxu1 %v6392_v0 }
0x112f   : > { %2788 = vmatpush1.bf16.msra.mxu0 %v5707_v16 }
0x1130   : > { %5192 = vmatpush3.bf16.msra.mxu1 %v5710_v17  ;;  %2789 = vmatprep.subr.bf16.mxu0 %v5713_v53 }
0x1131   : > { %5193 = vmatprep.subr.bf16.mxu1 %v6392_v0 }
0x1133   : > { %2790 = vmatpush1.bf16.msra.mxu0 %v5711_v18 }
0x1134   : > { %5194 = vmatpush3.bf16.msra.mxu1 %v5714_v8  ;;  %5199 = vmatprep.subr.bf16.mxu0 %v6392_v0 }
0x1135   : > { %5223 = vmatprep.subr.bf16.mxu1 %v6392_v0 }
0x11b6   : > { %v2556_v47 = vpop.xlane.xlu1 %2555 }
0x11b7   : > { %v2559_v50 = vmul.f32 0.0078125, %v2556_v47 }
0x11b8   : > { %v2558_v51 = vpop.xlane.xlu0 %2557 }
0x11b9   : > { %v2561_v52 = vsub.f32 %v2553_v34, %v2559_v50  ;;  %v2560_v56 = vmul.f32 0.0078125, %v2558_v51 }
0x11bb   : > { %v2562_v58 = vsub.f32 %v2554_v35, %v2560_v56  ;;  %v2563_v59 = vmul.f32 %v2561_v52, %v2561_v52 }
0x11bd   : > { %2565 = vadd.xlane.f32.xlu1 %v2563_v59  ;;  %v2564_v61 = vmul.f32 %v2562_v58, %v2562_v58 }
0x11bf   : > { %2567 = vadd.xlane.f32.xlu0 %v2564_v61 }
0x124a   : > { %v2566_v19 = vpop.xlane.xlu1 %2565 }
0x124b   : > { %v2569_v20 = vmul.f32 0.0078125, %v2566_v19 }
0x124c   : > { %v2568_v49 = vpop.xlane.xlu0 %2567 }
0x124d   : > { %v2571_v54 = vadd.f32 1e-05, %v2569_v20  ;;  %v2570_v55 = vmul.f32 0.0078125, %v2568_v49 }
0x124f   : > { %5799 = vrsqrt.f32 %v2571_v54  ;;  %v2572_v60 = vadd.f32 1e-05, %v2570_v55 }
0x1251   : > { %5801 = vrsqrt.f32 %v2572_v60 }
0x1259   : > { %v5800_v63 = vpop.eup %5799 }
0x125a   : > { %v2575_v9 = vmul.f32 %v5800_v63, %v2561_v52 }
0x125b   : > { %v5802_v39 = vpop.eup %5801 }
0x125c   : > { %v2576_v40 = vmul.f32 %v5802_v39, %v2562_v58  ;;  %v2584_v22 = vmul.f32 %v4780_v21, %v2575_v9 }
0x125e   : > { %v2585_v24 = vmul.f32 %v4780_v21, %v2576_v40  ;;  %v7201_v5 = vadd.f32 %v4781_v23, %v2584_v22 }
0x1260   : > { %v7203_v25 = vadd.f32 %v4781_v23, %v2585_v24 }
0x1262   : > { %v2595_v26 = vpack.c.bf16 %v7203_v25, %v7201_v5 }
0x1264   : > { %2808 = vmatmul.mubr.bf16.vlgmr.msra.gmra.mrb[44].mxu0 %v2595_v26  ;;  %5196 = vmatmul.mubr.bf16.vlgmr.msra.gmra.mrb[44].mxu1 %v2595_v26 }
0x1265   : > { %5201 = vmatprep.mubr.msk.bf16.mxu0 %vm6393_vm0, %v6392_v0  ;;  %5225 = vmatprep.mubr.msk.bf16.mxu1 %vm6393_vm0, %v6392_v0 }
0x1337   : > { %v2809_v29 = vpop.f32.mrb[44].mxu0  ;;  %v2852_v31 = vpop.f32.mrb[44].mxu1 }
0x1338   : > { %v2811_v33 = vpop.f32.mrb[45].mxu0  ;;  %v5197_v7 = vpop.f32.mrb[45].mxu1  ;;  %v2810_v51 = vadd.f32 %v2809_v29, %v2635_v42  ;;  %v2853_v56 = vadd.f32 %v2852_v31, %v2643_v32 }
0x1339   : > { %v2812_v34 = vadd.f32 %v2811_v33, %v2639_v28  ;;  %v2813_v35 = vpop.f32.mrb[46].mxu0  ;;  %v2855_v36 = vpop.f32.mrb[46].mxu1 }
0x133a   : > { %v7214_v37 = vadd.f32 %v2855_v36, %v2643_v32  ;;  %v2815_v38 = vpop.f32.mrb[47].mxu0  ;;  %v5198_v41 = vpop.f32.mrb[47].mxu1  ;;  %v7224_v52 = vpack.c.bf16 %v2810_v51, %v2810_v51  ;;  %v2814_v59 = vadd.f32 %v2813_v35, %v2635_v42  ;;  %v7233_v61 = vpack.c.bf16 %v2853_v56, %v2853_v56 }
0x133b   : > { %v7217_v45 = vpack.c.bf16 %v2812_v34, %v2812_v34  ;;  %v2816_v47 = vadd.f32 %v2815_v38, %v2639_v28 }
0x133c   : > { %v7235_v62 = vpack.c.bf16 %v2814_v59, %v2814_v59  ;;  %v2985_v1 = vsel %vm1275_vm4, %v7233_v61, 0  ;;  %v7260_v39 = vpack.c.bf16 %v7214_v37, %v7214_v37 }
0x133d   : > { %v2869_v50 = vsel %vm1154_vm3, %v7217_v45, 0  ;;  %v7222_v46 = vpack.c.bf16 %v2816_v47, %v2816_v47 }
0x133e   : > { %5200 = vmatpush3.bf16.xpose.msra.mxu0 %v2869_v50  ;;  %v3031_v24 = vsel %vm1275_vm4, %v7260_v39, 0 }
0x133f   : > { %5205 = vmatprep.subr.bf16.mxu0 %v6392_v0  ;;  %v2915_v58 = vsel %vm1154_vm3, %v7222_v46, 0 }
0x1345   : > { %5202 = vmatmul.mubr.msk.bf16.vlgmr.msra.gmra.mrb[48].mxu0 %vm1154_vm3, %v7224_v52 }
0x1346   : > { %5206 = vmatpush3.bf16.xpose.msra.mxu0 %v2915_v58  ;;  %5207 = vmatprep.mubr.msk.bf16.mxu0 %vm6393_vm0, %v6392_v0 }
0x1347   : > { %5211 = vmatprep.subr.bf16.mxu0 %v6392_v0 }
0x134d   : > { %5208 = vmatmul.mubr.msk.bf16.vlgmr.msra.gmra.mrb[52].mxu0 %vm1154_vm3, %v7235_v62 }
0x134e   : > { %5212 = vmatpush3.bf16.msra.mxu0 %v2985_v1  ;;  %5213 = vmatprep.mubr.msk.bf16.mxu0 %vm6393_vm0, %v6392_v0 }
0x134f   : > { %5217 = vmatprep.subr.bf16.mxu0 %v6392_v0 }
0x1418   : > { %v2905_v2 = vpop.f32.mrb[48].mxu0 }
0x1419   : > { %v5203_v3 = vpop.f32.mrb[49].mxu0  ;;  %v2957_v4 = vsel %vm1247_vm5, %v2905_v2, -inf }
0x141a   : > { %2958 = vmax.xlane.f32.xlu1 %v2957_v4  ;;  %v2908_v6 = vpop.f32.mrb[50].mxu0 }
0x141b   : > { %v5204_v10 = vpop.f32.mrb[51].mxu0 }
0x1420   : > { %v2951_v11 = vpop.f32.mrb[52].mxu0 }
0x1421   : > { %v5209_v12 = vpop.f32.mrb[53].mxu0  ;;  %v2960_v13 = vsel %vm1247_vm5, %v2951_v11, -inf }
0x1422   : > { %2961 = vmax.xlane.f32.xlu0 %v2960_v13  ;;  %v2954_v14 = vpop.f32.mrb[54].mxu0 }
0x1423   : > { %v5210_v15 = vpop.f32.mrb[55].mxu0 }
0x14a7   : > { %v2959_v57 = vpop.xlane.xlu1 %2958 }
0x14a8   : > { %v2963_v16 = vsub.f32 %v2905_v2, %v2959_v57 }
0x14aa   : > { %v2965_v17 = vmul.f32 1.442695, %v2963_v16 }
0x14ac   : > { %5803 = vpow2.f32 %v2965_v17 }
0x14af   : > { %v2962_v53 = vpop.xlane.xlu0 %2961 }
0x14b0   : > { %v2964_v18 = vsub.f32 %v2951_v11, %v2962_v53 }
0x14b2   : > { %v2967_v8 = vmul.f32 1.442695, %v2964_v18 }
0x14b4   : > { %5805 = vpow2.f32 %v2967_v8 }
0x14b6   : > { %v5804_v19 = vpop.eup %5803 }
0x14b7   : > { %v2969_v20 = vsel %vm1247_vm5, %v5804_v19, 0.0 }
0x14b8   : > { %2970 = vadd.xlane.f32.xlu1 %v2969_v20 }
0x14be   : > { %v5806_v49 = vpop.eup %5805 }
0x14bf   : > { %v2972_v54 = vsel %vm1247_vm5, %v5806_v49, 0.0 }
0x14c0   : > { %2973 = vadd.xlane.f32.xlu0 %v2972_v54 }
0x14c9   : > { %3077 = vrot.lane.b32.xlu1 %v7217_v45, %s6395_s27 }
0x14cd   : > { %3074 = vrot.lane.b32.xlu1 %v7224_v52, %s6395_s27 }
0x14d1   : > { %3126 = vrot.lane.b32.xlu1 %v7235_v62, %s6395_s27 }
0x14d6   : > { %3129 = vrot.lane.b32.xlu0 %v7222_v46, %s6395_s27 }
0x1545   : > { %v2971_v55 = vpop.xlane.xlu1 %2970 }
0x1546   : > { %5807 = vrcp.f32 %v2971_v55 }
0x1549   : > { %v3078_v60 = vpop.permute.xlu1 %3077 }
0x154a   : > { %v3083_v63 = vsel %vm1154_vm3, %v3078_v60, 0 }
0x154b   : > { %5224 = vmatpush3.bf16.xpose.msra.mxu1 %v3083_v63 }
0x154c   : > { %5235 = vmatprep.subr.bf16.mxu1 %v6392_v0 }
0x154d   : > { %v2974_v21 = vpop.xlane.xlu0 %2973  ;;  %v3075_v22 = vpop.permute.xlu1 %3074 }
0x154e   : > { %5809 = vrcp.f32 %v2974_v21 }
0x1550   : > { %v5808_v9 = vpop.eup %5807 }
0x1551   : > { %v2976_v40 = vmul.f32 %v5808_v9, %v5804_v19  ;;  %v3130_v28 = vpop.permute.xlu0 %3129  ;;  %v3127_v32 = vpop.permute.xlu1 %3126 }
0x1552   : > { %5226 = vmatmul.mubr.msk.bf16.vlgmr.msra.gmra.mrb[48].mxu1 %vm1154_vm3, %v3075_v22  ;;  %v3135_v31 = vsel %vm1154_vm3, %v3130_v28, 0 }
0x1553   : > { %v2979_v23 = vpack.c.bf16 %v2976_v40, %v2976_v40  ;;  %5237 = vmatprep.mubr.msk.bf16.mxu1 %vm6393_vm0, %v6392_v0 }
0x1555   : > { %5214 = vmatmul.mubr.msk.bf16.vlgmr.msra.gmra.mrb[56].mxu0 %vm1247_vm5, %v2979_v23 }
0x1556   : > { %5218 = vmatpush3.bf16.msra.mxu0 %v3031_v24  ;;  %5219 = vmatprep.mubr.msk.bf16.mxu0 %vm6393_vm0, %v6392_v0 }
0x1557   : > { %5229 = vmatprep.subr.bf16.mxu0 %v6392_v0 }
0x1558   : > { %v5810_v26 = vpop.eup %5809 }
0x1559   : > { %v2978_v27 = vmul.f32 %v5810_v26, %v5806_v49 }
0x155b   : > { %v2980_v29 = vpack.c.bf16 %v2978_v27, %v2978_v27 }
0x155d   : > { %5220 = vmatmul.mubr.msk.bf16.vlgmr.msra.gmra.mrb[60].mxu0 %vm1247_vm5, %v2980_v29 }
0x155e   : > { %5231 = vmatprep.mubr.msk.bf16.mxu0 %vm6393_vm0, %v6392_v0 }
0x155f   : > { %5230 = vmatpush3.bf16.xpose.msra.mxu0 %v3135_v31 }
0x1560   : > { %5241 = vmatprep.subr.bf16.mxu0 %v6392_v0 }
0x1566   : > { %5232 = vmatmul.mubr.msk.bf16.vlgmr.msra.gmra.mrb[64].mxu0 %vm1154_vm3, %v3127_v32 }
0x1567   : > { %5243 = vmatprep.mubr.msk.bf16.mxu0 %vm6393_vm0, %v6392_v0 }
0x1625   : > { %v3119_v33 = vpop.f32.mrb[48].mxu1 }
0x1626   : > { %v5227_v7 = vpop.f32.mrb[49].mxu1  ;;  %v3177_v34 = vsel %vm1247_vm5, %v3119_v33, -inf }
0x1627   : > { %3178 = vmax.xlane.f32.xlu1 %v3177_v34  ;;  %v3122_v35 = vpop.f32.mrb[50].mxu1 }
0x1628   : > { %v7280_v36 = vpop.f32.mrb[56].mxu0  ;;  %v5228_v37 = vpop.f32.mrb[51].mxu1 }
0x1629   : > { %v5215_v38 = vpop.f32.mrb[57].mxu0 }
0x162a   : > { %v3024_v41 = vpop.f32.mrb[58].mxu0 }
0x162b   : > { %v5216_v42 = vpop.f32.mrb[59].mxu0 }
0x1630   : > { %v7282_v47 = vpop.f32.mrb[60].mxu0 }
0x1631   : > { %v5221_v50 = vpop.f32.mrb[61].mxu0 }
0x1632   : > { %v3070_v51 = vpop.f32.mrb[62].mxu0 }
0x1633   : > { %v5222_v56 = vpop.f32.mrb[63].mxu0 }
0x1638   : > { %3202 = vrot.lane.b32.xlu1 %v7233_v61, %s6395_s27 }
0x1639   : > { %v3171_v58 = vpop.f32.mrb[64].mxu0 }
0x163a   : > { %v5233_v59 = vpop.f32.mrb[65].mxu0  ;;  %v3180_v1 = vsel %vm1247_vm5, %v3171_v58, -inf }
0x163b   : > { %3181 = vmax.xlane.f32.xlu0 %v3180_v1  ;;  %v3174_v2 = vpop.f32.mrb[66].mxu0 }
0x163c   : > { %v5234_v3 = vpop.f32.mrb[67].mxu0  ;;  %3301 = vrot.lane.b32.xlu1 %v7217_v45, %s6396_s29 }
0x1640   : > { %3351 = vrot.lane.b32.xlu1 %v7222_v46, %s6396_s29 }
0x1644   : > { %3299 = vrot.lane.b32.xlu1 %v7224_v52, %s6396_s29 }
0x16b4   : > { %v3179_v4 = vpop.xlane.xlu1 %3178 }
0x16b5   : > { %v3183_v6 = vsub.f32 %v3119_v33, %v3179_v4 }
0x16b7   : > { %v3185_v10 = vmul.f32 1.442695, %v3183_v6 }
0x16b8   : > { %v3203_v11 = vpop.permute.xlu1 %3202 }
0x16b9   : > { %5811 = vpow2.f32 %v3185_v10  ;;  %v3208_v12 = vsel %vm1275_vm4, %v3203_v11, 0 }
0x16ba   : > { %5236 = vmatpush3.bf16.msra.mxu1 %v3208_v12 }
0x16bb   : > { %5247 = vmatprep.subr.bf16.mxu1 %v6392_v0 }
0x16bc   : > { %v3302_v19 = vpop.permute.xlu1 %3301 }
0x16bd   : > { %v3307_v54 = vsel %vm1154_vm3, %v3302_v19, 0 }
0x16c0   : > { %v3352_v55 = vpop.permute.xlu1 %3351 }
0x16c1   : > { %v3357_v24 = vsel %vm1154_vm3, %v3352_v55, 0 }
0x16c3   : > { %v5812_v13 = vpop.eup %5811 }
0x16c4   : > { %v3189_v14 = vsel %vm1247_vm5, %v5812_v13, 0.0  ;;  %v3300_v63 = vpop.permute.xlu1 %3299 }
0x16c5   : > { %3190 = vadd.xlane.f32.xlu0 %v3189_v14 }
0x16c8   : > { %v3182_v15 = vpop.xlane.xlu0 %3181 }
0x16c9   : > { %v3184_v57 = vsub.f32 %v3171_v58, %v3182_v15 }
0x16cb   : > { %v3187_v16 = vmul.f32 1.442695, %v3184_v57 }
0x16cd   : > { %5813 = vpow2.f32 %v3187_v16 }
0x16d7   : > { %v5814_v17 = vpop.eup %5813 }
0x16d8   : > { %v3192_v53 = vsel %vm1247_vm5, %v5814_v17, 0.0 }
0x16d9   : > { %3193 = vadd.xlane.f32.xlu0 %v3192_v53 }
0x16ef   : > { %3251 = vrot.lane.b32.xlu0 %v7260_v39, %s6395_s27 }
0x16f3   : > { %3349 = vrot.lane.b32.xlu0 %v7235_v62, %s6396_s29 }
0x1752   : > { %v3191_v18 = vpop.xlane.xlu0 %3190 }
0x1753   : > { %5815 = vrcp.f32 %v3191_v18 }
0x175d   : > { %v5816_v8 = vpop.eup %5815 }
0x175e   : > { %v3196_v20 = vmul.f32 %v5816_v8, %v5812_v13 }
0x1760   : > { %v3199_v49 = vpack.c.bf16 %v3196_v20, %v3196_v20 }
0x1762   : > { %5238 = vmatmul.mubr.msk.bf16.vlgmr.msra.gmra.mrb[52].mxu1 %vm1247_vm5, %v3199_v49 }
0x1763   : > { %5248 = vmatpush3.bf16.xpose.msra.mxu1 %v3307_v54  ;;  %5249 = vmatprep.mubr.msk.bf16.mxu1 %vm6393_vm0, %v6392_v0 }
0x1764   : > { %5259 = vmatprep.subr.bf16.mxu1 %v6392_v0 }
0x1766   : > { %v3194_v60 = vpop.xlane.xlu0 %3193 }
0x1767   : > { %5817 = vrcp.f32 %v3194_v60 }
0x176a   : > { %v3252_v21 = vpop.permute.xlu0 %3251  ;;  %5250 = vmatmul.mubr.msk.bf16.vlgmr.msra.gmra.mrb[56].mxu1 %vm1154_vm3, %v3300_v63 }
0x176b   : > { %v3257_v9 = vsel %vm1275_vm4, %v3252_v21, 0  ;;  %5261 = vmatprep.mubr.msk.bf16.mxu1 %vm6393_vm0, %v6392_v0 }
0x176c   : > { %5242 = vmatpush3.bf16.msra.mxu0 %v3257_v9 }
0x176d   : > { %5253 = vmatprep.subr.bf16.mxu0 %v6392_v0 }
0x176e   : > { %v3350_v26 = vpop.permute.xlu0 %3349 }
0x1771   : > { %v5818_v40 = vpop.eup %5817 }
0x1772   : > { %v3198_v22 = vmul.f32 %v5818_v40, %v5814_v17 }
0x1774   : > { %v3200_v23 = vpack.c.bf16 %v3198_v22, %v3198_v22 }
0x1776   : > { %5244 = vmatmul.mubr.msk.bf16.vlgmr.msra.gmra.mrb[68].mxu0 %vm1247_vm5, %v3200_v23 }
0x1777   : > { %5254 = vmatpush3.bf16.xpose.msra.mxu0 %v3357_v24  ;;  %5255 = vmatprep.mubr.msk.bf16.mxu0 %vm6393_vm0, %v6392_v0 }
0x1778   : > { %5265 = vmatprep.subr.bf16.mxu0 %v6392_v0 }
0x177e   : > { %5256 = vmatmul.mubr.msk.bf16.vlgmr.msra.gmra.mrb[72].mxu0 %vm1154_vm3, %v3350_v26 }
0x177f   : > { %5267 = vmatprep.mubr.msk.bf16.mxu0 %vm6393_vm0, %v6392_v0 }
0x1835   : > { %v7319_v27 = vpop.f32.mrb[52].mxu1 }
0x1836   : > { %v5239_v28 = vpop.f32.mrb[53].mxu1 }
0x1837   : > { %v3247_v29 = vpop.f32.mrb[54].mxu1 }
0x1838   : > { %v5240_v31 = vpop.f32.mrb[55].mxu1 }
0x183d   : > { %v3343_v32 = vpop.f32.mrb[56].mxu1 }
0x183e   : > { %v5251_v33 = vpop.f32.mrb[57].mxu1  ;;  %v3399_v7 = vsel %vm1247_vm5, %v3343_v32, -inf }
0x183f   : > { %3400 = vmax.xlane.f32.xlu1 %v3399_v7  ;;  %v3346_v34 = vpop.f32.mrb[58].mxu1 }
0x1840   : > { %v5252_v35 = vpop.f32.mrb[59].mxu1 }
0x1849   : > { %v7322_v37 = vpop.f32.mrb[68].mxu0 }
0x184a   : > { %v5588_v38 = vpack.i.bf16 %v7322_v37, %v7319_v27  ;;  %v5245_v41 = vpop.f32.mrb[69].mxu0 }
0x184b   : > { %v3296_v42 = vpop.f32.mrb[70].mxu0 }
0x184c   : > { %v5246_v50 = vpop.f32.mrb[71].mxu0 }
0x1850   : > { %3423 = vrot.lane.b32.xlu1 %v7233_v61, %s6396_s29 }
0x1851   : > { %v3393_v51 = vpop.f32.mrb[72].mxu0 }
0x1852   : > { %v5257_v56 = vpop.f32.mrb[73].mxu0  ;;  %v3402_v58 = vsel %vm1247_vm5, %v3393_v51, -inf }
0x1853   : > { %3403 = vmax.xlane.f32.xlu0 %v3402_v58  ;;  %v3396_v59 = vpop.f32.mrb[74].mxu0 }
0x1854   : > { %v5258_v1 = vpop.f32.mrb[75].mxu0  ;;  %3521 = vrot.lane.b32.xlu1 %v7217_v45, %s6397_s3 }
0x1858   : > { %3571 = vrot.lane.b32.xlu1 %v7222_v46, %s6397_s3 }
0x185c   : > { %3519 = vrot.lane.b32.xlu1 %v7224_v52, %s6397_s3 }
0x18cc   : > { %v3401_v2 = vpop.xlane.xlu1 %3400 }
0x18cd   : > { %v3405_v3 = vsub.f32 %v3343_v32, %v3401_v2 }
0x18cf   : > { %v3407_v4 = vmul.f32 1.442695, %v3405_v3 }
0x18d0   : > { %v3424_v6 = vpop.permute.xlu1 %3423 }
0x18d1   : > { %5819 = vpow2.f32 %v3407_v4  ;;  %v3429_v10 = vsel %vm1275_vm4, %v3424_v6, 0 }
0x18d2   : > { %5260 = vmatpush3.bf16.msra.mxu1 %v3429_v10 }
0x18d3   : > { %5271 = vmatprep.subr.bf16.mxu1 %v6392_v0 }
0x18d4   : > { %v3522_v16 = vpop.permute.xlu1 %3521 }
0x18d5   : > { %v3527_v18 = vsel %vm1154_vm3, %v3522_v16, 0 }
0x18d8   : > { %v3572_v8 = vpop.permute.xlu1 %3571 }
0x18d9   : > { %v3577_v63 = vsel %vm1154_vm3, %v3572_v8, 0  ;;  %v5719_v8 = vld [vmem:[#allocation10 + $0x60] sm:$0xff]  }
0x18db   : > { %v5820_v11 = vpop.eup %5819 }
0x18dc   : > { %v3411_v12 = vsel %vm1247_vm5, %v5820_v11, 0.0 }
0x18dd   : > { %3412 = vadd.xlane.f32.xlu0 %v3411_v12 }
0x18e0   : > { %v3404_v45 = vpop.xlane.xlu0 %3403 }
0x18e1   : > { %v3406_v13 = vsub.f32 %v3393_v51, %v3404_v45 }
0x18e3   : > { %v3409_v46 = vmul.f32 1.442695, %v3406_v13 }
0x18e5   : > { %5821 = vpow2.f32 %v3409_v46 }
0x18ef   : > { %v5822_v14 = vpop.eup %5821 }
0x18f0   : > { %v3414_v52 = vsel %vm1247_vm5, %v5822_v14, 0.0 }
0x18f1   : > { %3415 = vadd.xlane.f32.xlu0 %v3414_v52 }
0x1907   : > { %3471 = vrot.lane.b32.xlu0 %v7260_v39, %s6396_s29 }
0x190b   : > { %3569 = vrot.lane.b32.xlu0 %v7235_v62, %s6397_s3  ;;  %v3520_v62 = vpop.permute.xlu1 %3519 }
0x196a   : > { %v3413_v15 = vpop.xlane.xlu0 %3412 }
0x196b   : > { %5823 = vrcp.f32 %v3413_v15 }
0x1975   : > { %v5824_v57 = vpop.eup %5823 }
0x1976   : > { %v3418_v17 = vmul.f32 %v5824_v57, %v5820_v11 }
0x1978   : > { %v3421_v53 = vpack.c.bf16 %v3418_v17, %v3418_v17  ;;  %v5716_v17 = vld [vmem:[#allocation10 + $0x48] sm:$0xff]  }
0x197a   : > { %5262 = vmatmul.mubr.msk.bf16.vlgmr.msra.gmra.mrb[60].mxu1 %vm1247_vm5, %v3421_v53  ;;  %v5717_v53 = vld [vmem:[#allocation10 + $0x50] sm:$0xff]  }
0x197b   : > { %5272 = vmatpush3.bf16.xpose.msra.mxu1 %v3527_v18  ;;  %5273 = vmatprep.mubr.msk.bf16.mxu1 %vm6393_vm0, %v6392_v0  ;;  %v5718_v18 = vld [vmem:[#allocation10 + $0x58] sm:$0xff]  }
0x197c   : > { %5283 = vmatprep.subr.bf16.mxu1 %v6392_v0 }
0x197e   : > { %v3416_v19 = vpop.xlane.xlu0 %3415 }
0x197f   : > { %5825 = vrcp.f32 %v3416_v19  ;;  %v5720_v19 = vld [vmem:[#allocation10 + $0x68] sm:$0xff]  }
0x1982   : > { %v3472_v20 = vpop.permute.xlu0 %3471  ;;  %5274 = vmatmul.mubr.msk.bf16.vlgmr.msra.gmra.mrb[64].mxu1 %vm1154_vm3, %v3520_v62 }
0x1983   : > { %v3477_v49 = vsel %vm1275_vm4, %v3472_v20, 0  ;;  %5285 = vmatprep.mubr.msk.bf16.mxu1 %vm6393_vm0, %v6392_v0 }
0x1984   : > { %5266 = vmatpush3.bf16.msra.mxu0 %v3477_v49 }
0x1985   : > { %5277 = vmatprep.subr.bf16.mxu0 %v6392_v0 }
0x1986   : > { %v3570_v21 = vpop.permute.xlu0 %3569 }
0x1989   : > { %v5826_v54 = vpop.eup %5825 }
0x198a   : > { %v3420_v55 = vmul.f32 %v5826_v54, %v5822_v14 }
0x198c   : > { %v3422_v60 = vpack.c.bf16 %v3420_v55, %v3420_v55  ;;  %v5722_v55 = vld [vmem:[#allocation10 + $0x78] sm:$0xff]  }
0x198e   : > { %5268 = vmatmul.mubr.msk.bf16.vlgmr.msra.gmra.mrb[76].mxu0 %vm1247_vm5, %v3422_v60 }
0x198f   : > { %5278 = vmatpush3.bf16.xpose.msra.mxu0 %v3577_v63  ;;  %5279 = vmatprep.mubr.msk.bf16.mxu0 %vm6393_vm0, %v6392_v0 }
0x1990   : > { %5289 = vmatprep.subr.bf16.mxu0 %v6392_v0 }
0x1996   : > { %5280 = vmatmul.mubr.msk.bf16.vlgmr.msra.gmra.mrb[80].mxu0 %vm1154_vm3, %v3570_v21 }
0x1997   : > { %5291 = vmatprep.mubr.msk.bf16.mxu0 %vm6393_vm0, %v6392_v0 }
0x1a4d   : > { %v3465_v9 = vpop.f32.mrb[60].mxu1 }
0x1a4e   : > { %v5263_v40 = vpop.f32.mrb[61].mxu1 }
0x1a4f   : > { %v3468_v22 = vpop.f32.mrb[62].mxu1 }
0x1a50   : > { %v5264_v23 = vpop.f32.mrb[63].mxu1 }
0x1a55   : > { %v3563_v24 = vpop.f32.mrb[64].mxu1 }
0x1a56   : > { %v5275_v26 = vpop.f32.mrb[65].mxu1  ;;  %v3619_v28 = vsel %vm1247_vm5, %v3563_v24, -inf }
0x1a57   : > { %3620 = vmax.xlane.f32.xlu1 %v3619_v28  ;;  %v3566_v29 = vpop.f32.mrb[66].mxu1 }
0x1a58   : > { %v5276_v31 = vpop.f32.mrb[67].mxu1 }
0x1a61   : > { %v3513_v32 = vpop.f32.mrb[76].mxu0 }
0x1a62   : > { %v5593_v33 = vpack.i.bf16 %v3513_v32, %v3465_v9  ;;  %v5269_v7 = vpop.f32.mrb[77].mxu0 }
0x1a63   : > { %v3516_v34 = vpop.f32.mrb[78].mxu0 }
0x1a64   : > { %v5270_v35 = vpop.f32.mrb[79].mxu0 }
0x1a68   : > { %3643 = vrot.lane.b32.xlu1 %v7233_v61, %s6397_s3 }
0x1a69   : > { %v3613_v41 = vpop.f32.mrb[80].mxu0 }
0x1a6a   : > { %v5281_v42 = vpop.f32.mrb[81].mxu0  ;;  %v3622_v50 = vsel %vm1247_vm5, %v3613_v41, -inf }
0x1a6b   : > { %3623 = vmax.xlane.f32.xlu0 %v3622_v50  ;;  %v3616_v51 = vpop.f32.mrb[82].mxu0 }
0x1a6c   : > { %v5282_v56 = vpop.f32.mrb[83].mxu0  ;;  %5589 = vrot.lane.b32.xlu1 %v5588_v38, %s6397_s3 }
0x1a6d   : > { %v4822_v56 = vld [vmem:[#allocation12 + $0x1] ss:$0 sm:$0xff] }
0x1a70   : > { %5594 = vrot.lane.b32.xlu1 %v5593_v33, %s6396_s29 }
0x1ae4   : > { %v3621_v58 = vpop.xlane.xlu1 %3620 }
0x1ae5   : > { %v3625_v59 = vsub.f32 %v3563_v24, %v3621_v58 }
0x1ae7   : > { %v3627_v1 = vmul.f32 1.442695, %v3625_v59 }
0x1ae8   : > { %v3644_v2 = vpop.permute.xlu1 %3643 }
0x1ae9   : > { %5827 = vpow2.f32 %v3627_v1  ;;  %v3649_v61 = vsel %vm1275_vm4, %v3644_v2, 0 }
0x1aea   : > { %5284 = vmatpush3.bf16.msra.mxu1 %v3649_v61 }
0x1aeb   : > { %5295 = vmatprep.subr.bf16.mxu1 %v6392_v0 }
0x1aec   : > { %v5590_v22 = vpop.permute.xlu1 %5589 }
0x1aed   : > { %v5592_v24 = vunpack.i.h.bf16 %v5590_v22  ;;  %v5591_v26 = vunpack.i.l.bf16 %v5590_v22 }
0x1aef   : > { %v3764_v32 = vsel %vm1154_vm3, %v7282_v47, %v5592_v24  ;;  %v3763_v33 = vsel %vm1154_vm3, %v7280_v36, %v5591_v26 }
0x1af0   : > { %v5595_v23 = vpop.permute.xlu1 %5594 }
0x1af1   : > { %v5597_v28 = vunpack.i.h.bf16 %v5595_v23  ;;  %v5596_v29 = vunpack.i.l.bf16 %v5595_v23 }
0x1af3   : > { %v5828_v3 = vpop.eup %5827  ;;  %v3766_v35 = vsel %vm2057_vm6, %v3764_v32, %v5597_v28 }
0x1af4   : > { %v3631_v4 = vsel %vm1247_vm5, %v5828_v3, 0.0 }
0x1af5   : > { %3632 = vadd.xlane.f32.xlu0 %v3631_v4  ;;  %v5723_v4 = vld [vmem:[#allocation16 + $0x80] ss:$8 sps:$4 sm:$0xff]  }
0x1af8   : > { %v3624_v6 = vpop.xlane.xlu0 %3623 }
0x1af9   : > { %v3626_v10 = vsub.f32 %v3613_v41, %v3624_v6  ;;  %v3765_v41 = vsel %vm2057_vm6, %v3763_v33, %v5596_v29  ;;  %v5725_v6 = vld [vmem:[#allocation16 + $0x84] ss:$8 sps:$4 sm:$0xff]   ;;  %v4831_v33 = vld [vmem:[#allocation13 + $0x1] ss:$0 sm:$0xff] }
0x1afb   : > { %v3629_v27 = vmul.f32 1.442695, %v3626_v10  ;;  %v5728_v10 = vld [vmem:[#allocation16 + $0x94] ss:$8 sps:$4 sm:$0xff]  }
0x1afd   : > { %5829 = vpow2.f32 %v3629_v27  ;;  %v5726_v27 = vld [vmem:[#allocation16 + $0x90] ss:$8 sps:$4 sm:$0xff]  }
0x1b07   : > { %v5830_v37 = vpop.eup %5829 }
0x1b08   : > { %v3634_v38 = vsel %vm1247_vm5, %v5830_v37, 0.0 }
0x1b09   : > { %3635 = vadd.xlane.f32.xlu0 %v3634_v38 }
0x1b1f   : > { %3691 = vrot.lane.b32.xlu0 %v7260_v39, %s6397_s3  ;;  %v5715_v39 = vld [vmem:[#allocation10 + $0x40] sm:$0xff]  }
0x1b82   : > { %v3633_v11 = vpop.xlane.xlu0 %3632 }
0x1b83   : > { %5831 = vrcp.f32 %v3633_v11 }
0x1b8d   : > { %v5832_v12 = vpop.eup %5831 }
0x1b8e   : > { %v3638_v45 = vmul.f32 %v5832_v12, %v5828_v3 }
0x1b90   : > { %v3641_v13 = vpack.c.bf16 %v3638_v45, %v3638_v45 }
0x1b92   : > { %5286 = vmatmul.mubr.msk.bf16.vlgmr.msra.gmra.mrb[68].mxu1 %vm1247_vm5, %v3641_v13 }
0x1b93   : > { %5311 = vmatprep.mubr.msk.bf16.mxu1 %vm6393_vm0, %v6392_v0  ;;  %5296 = vmatpush3.bf16.msra.mxu1 %v5715_v39  ;;  %v5740_v39 = vld [vmem:[#allocation16 + $0xd4] ss:$8 sps:$4 sm:$0xff]  }
0x1b94   : > { %5297 = vmatprep.subr.bf16.mxu1 %v6392_v0 }
0x1b96   : > { %v3636_v46 = vpop.xlane.xlu0 %3635 }
0x1b97   : > { %5833 = vrcp.f32 %v3636_v46  ;;  %5298 = vmatpush3.bf16.msra.mxu1 %v5716_v17  ;;  %v5731_v46 = vld [vmem:[#allocation16 + $0xa4] ss:$8 sps:$4 sm:$0xff]   ;;  %v5738_v17 = vld [vmem:[#allocation16 + $0xd0] ss:$8 sps:$4 sm:$0xff]  }
0x1b98   : > { %5299 = vmatprep.subr.bf16.mxu1 %v6392_v0 }
0x1b9a   : > { %v3692_v14 = vpop.permute.xlu0 %3691 }
0x1b9b   : > { %v3697_v52 = vsel %vm1275_vm4, %v3692_v14, 0  ;;  %5300 = vmatpush3.bf16.msra.mxu1 %v5717_v53  ;;  %v5729_v14 = vld [vmem:[#allocation16 + $0xa0] ss:$8 sps:$4 sm:$0xff]   ;;  %v5743_v53 = vld [vmem:[#allocation16 + $0xe4] ss:$8 sps:$4 sm:$0xff]  }
0x1b9c   : > { %5290 = vmatpush3.bf16.msra.mxu0 %v3697_v52  ;;  %5301 = vmatprep.subr.bf16.mxu1 %v6392_v0  ;;  %v5734_v52 = vld [vmem:[#allocation16 + $0xb4] ss:$8 sps:$4 sm:$0xff]  }
0x1b9d   : > { %4039 = vmatprep.subr.bf16.mxu0 %v5725_v6 }
0x1b9f   : > { %5302 = vmatpush3.bf16.msra.mxu1 %v5718_v18  ;;  %v5741_v18 = vld [vmem:[#allocation16 + $0xe0] ss:$8 sps:$4 sm:$0xff]  }
0x1ba0   : > { %5303 = vmatprep.subr.bf16.mxu1 %v6392_v0 }
0x1ba1   : > { %v5834_v15 = vpop.eup %5833 }
0x1ba2   : > { %v3640_v57 = vmul.f32 %v5834_v15, %v5830_v37  ;;  %v5732_v15 = vld [vmem:[#allocation16 + $0xb0] ss:$8 sps:$4 sm:$0xff]  }
0x1ba3   : > { %5304 = vmatpush3.bf16.msra.mxu1 %v5719_v8  ;;  %v5746_v8 = vld [vmem:[#allocation16 + $0xf4] ss:$8 sps:$4 sm:$0xff]  }
0x1ba4   : > { %v3642_v16 = vpack.c.bf16 %v3640_v57, %v3640_v57  ;;  %5305 = vmatprep.subr.bf16.mxu1 %v6392_v0  ;;  %v5737_v57 = vld [vmem:[#allocation16 + $0xc4] ss:$8 sps:$4 sm:$0xff]  }
0x1ba6   : > { %5292 = vmatmul.mubr.msk.bf16.vlgmr.msra.gmra.mrb[84].mxu0 %vm1247_vm5, %v3642_v16  ;;  %v5735_v16 = vld [vmem:[#allocation16 + $0xc0] ss:$8 sps:$4 sm:$0xff]  }
0x1ba7   : > { %4071 = vmatprep.mubr.bf16.mxu0 %v6394_v30  ;;  %5306 = vmatpush3.bf16.msra.mxu1 %v5720_v19  ;;  %v5721_v30 = vld [vmem:[#allocation10 + $0x70] sm:$0xff]  }
0x1ba8   : > { %5307 = vmatprep.subr.bf16.mxu1 %v6392_v0  ;;  %4040 = vmatpush1.bf16.msra.mxu0 %v5723_v4  ;;  %v5744_v19 = vld [vmem:[#allocation16 + $0xf0] ss:$8 sps:$4 sm:$0xff]  }
0x1ba9   : > { %4041 = vmatprep.subr.bf16.mxu0 %v5728_v10 }
0x1bab   : > { %5308 = vmatpush3.bf16.msra.mxu1 %v5721_v30  ;;  %v5747_v30 = vld [vmem:[#allocation19 + $0xc0] sm:$0xff]  }
0x1bac   : > { %5309 = vmatprep.subr.bf16.mxu1 %v6392_v0  ;;  %4042 = vmatpush1.bf16.msra.mxu0 %v5726_v27 }
0x1bad   : > { %4043 = vmatprep.subr.bf16.mxu0 %v5731_v46 }
0x1baf   : > { %5310 = vmatpush3.bf16.msra.mxu1 %v5722_v55  ;;  %v5752_v55 = vld [vmem:[#allocation19 + $0x90] sm:$0xff]  }
0x1bb0   : > { %4044 = vmatpush1.bf16.msra.mxu0 %v5729_v14  ;;  %4998 = vmatprep.subr.bf16.mxu1 %v5747_v30  ;;  %v4312_v30 = vld [vmem:[#allocation25 + $0x10] sm:$0xff] }
0x1bb1   : > { %4045 = vmatprep.subr.bf16.mxu0 %v5734_v52 }
0x1bb4   : > { %4046 = vmatpush1.bf16.msra.mxu0 %v5732_v15 }
0x1bb5   : > { %4047 = vmatprep.subr.bf16.mxu0 %v5737_v57 }
0x1bb8   : > { %4048 = vmatpush1.bf16.msra.mxu0 %v5735_v16 }
0x1bb9   : > { %4049 = vmatprep.subr.bf16.mxu0 %v5740_v39 }
0x1bbc   : > { %4050 = vmatpush1.bf16.msra.mxu0 %v5738_v17 }
0x1bbd   : > { %4051 = vmatprep.subr.bf16.mxu0 %v5743_v53 }
0x1bc0   : > { %4052 = vmatpush1.bf16.msra.mxu0 %v5741_v18 }
0x1bc1   : > { %4053 = vmatprep.subr.bf16.mxu0 %v5746_v8  ;;  %v4310_v8 = vld [vmem:[#allocation25] sm:$0xff] }
0x1bc4   : > { %4054 = vmatpush1.bf16.msra.mxu0 %v5744_v19  ;;  %v4311_v19 = vld [vmem:[#allocation25 + $0x8] sm:$0xff] }
0x1c65   : > { %v3685_v62 = vpop.f32.mrb[68].mxu1 }
0x1c66   : > { %v5287_v20 = vpop.f32.mrb[69].mxu1 }
0x1c67   : > { %v3688_v49 = vpop.f32.mrb[70].mxu1  ;;  %v5749_v20 = vld [vmem:[#allocation19 + $0xc8] sm:$0xff]  }
0x1c68   : > { %v5288_v54 = vpop.f32.mrb[71].mxu1  ;;  %v5750_v49 = vld [vmem:[#allocation19 + $0x88] sm:$0xff]  }
0x1c69   : > { %v5751_v54 = vld [vmem:[#allocation19 + $0xd0] sm:$0xff]  }
0x1c79   : > { %v3733_v60 = vpop.f32.mrb[84].mxu0 }
0x1c7a   : > { %v5598_v63 = vpack.i.bf16 %v3733_v60, %v3685_v62  ;;  %v5293_v21 = vpop.f32.mrb[85].mxu0  ;;  %v5748_v62 = vld [vmem:[#allocation19 + $0x80] sm:$0xff]   ;;  %v5753_v60 = vld [vmem:[#allocation19 + $0xd8] sm:$0xff]  }
0x1c7b   : > { %v3736_v9 = vpop.f32.mrb[86].mxu0  ;;  %v5755_v21 = vld [vmem:[#allocation19 + $0xe0] sm:$0xff]  }
0x1c7c   : > { %5599 = vrot.lane.b32.xlu1 %v5598_v63, %s6395_s27  ;;  %v5294_v40 = vpop.f32.mrb[87].mxu0  ;;  %v5754_v63 = vld [vmem:[#allocation19 + $0x98] sm:$0xff]   ;;  %v5756_v9 = vld [vmem:[#allocation19 + $0xa0] sm:$0xff]  }
0x1c7d   : > { %v5757_v40 = vld [vmem:[#allocation19 + $0xe8] sm:$0xff]  }
0x1cee   : > { %v5600_v31 = vpop.permute.xlu1 %5599 }
0x1cef   : > { %v5602_v7 = vunpack.i.h.bf16 %v5600_v31  ;;  %v5601_v34 = vunpack.i.l.bf16 %v5600_v31 }
0x1cf1   : > { %v3768_v42 = vsel %vm2060_vm7, %v3766_v35, %v5602_v7  ;;  %v3767_v50 = vsel %vm2060_vm7, %v3765_v41, %v5601_v34  ;;  %v4832_v41 = vld [vmem:[#allocation15 + $0x1] ss:$0 sm:$0xff] }
0x1cf2   : > { %v3769_v51 = vpack.c.bf16 %v3768_v42, %v3767_v50 }
0x1cf4   : > { %5312 = vmatmul.mubr.bf16.vlgmr.msra.gmra.mrb[72].mxu1 %v3769_v51 }
0x1cf5   : > { %4999 = vmatpush3.bf16.msra.mxu1 %v5748_v62  ;;  %v6398_v62 = vmov 0.0|0.0  }
0x1cf6   : > { %5000 = vmatprep.subr.bf16.mxu1 %v5749_v20  ;;  %5350 = vmatprep.subr.bf16.mxu0 %v6398_v62  ;;  %v5351_v20 = vpack.c.bf16 %v4311_v19, %v4310_v8 }
0x1cf9   : > { %5001 = vmatpush3.bf16.msra.mxu1 %v5750_v49  ;;  %v4313_v49 = vld [vmem:[#allocation25 + $0x18] sm:$0xff] }
0x1cfa   : > { %5002 = vmatprep.subr.bf16.mxu1 %v5751_v54  ;;  %v5354_v54 = vpack.c.bf16 %v4313_v49, %v4312_v30 }
0x1cfd   : > { %5003 = vmatpush3.bf16.msra.mxu1 %v5752_v55 }
0x1cfe   : > { %5004 = vmatprep.subr.bf16.mxu1 %v5753_v60 }
0x1d01   : > { %5005 = vmatpush3.bf16.msra.mxu1 %v5754_v63 }
0x1d02   : > { %5006 = vmatprep.subr.bf16.mxu1 %v5755_v21 }
0x1d05   : > { %5007 = vmatpush3.bf16.msra.mxu1 %v5756_v9 }
0x1d06   : > { %5008 = vmatprep.subr.bf16.mxu1 %v5757_v40 }
0x1dc7   : > { %v3877_v58 = vpop.f32.mrb[72].mxu1 }
0x1dc8   : > { %v3878_v59 = vadd.f32 %v4822_v56, %v3877_v58  ;;  %v5313_v1 = vpop.f32.mrb[73].mxu1  ;;  %v5758_v58 = vld [vmem:[#allocation19 + $0xa8] sm:$0xff]  }
0x1dc9   : > { %v3880_v47 = vpop.f32.mrb[74].mxu1  ;;  %5009 = vmatpush3.bf16.msra.mxu1 %v5758_v58  ;;  %v5760_v1 = vld [vmem:[#allocation19 + $0xb0] sm:$0xff]  }
0x1dca   : > { %v3881_v2 = vadd.f32 %v4822_v56, %v3880_v47  ;;  %v5314_v61 = vpop.f32.mrb[75].mxu1  ;;  %v3884_v36 = vadd.f32 %v3878_v59, %v7201_v5  ;;  %v5759_v59 = vld [vmem:[#allocation19 + $0xf0] sm:$0xff]   ;;  %v5761_v47 = vld [vmem:[#allocation19 + $0xf8] sm:$0xff]  }
0x1dcb   : > { %5010 = vmatprep.subr.bf16.mxu1 %v5759_v59  ;;  %v3947_v61 = vld [vmem:[#allocation18 + $0x2] sm:$0x3] }
0x1dcc   : > { %3886 = vadd.xlane.f32.xlu0 %v3884_v36  ;;  %v3885_v3 = vadd.f32 %v3881_v2, %v7203_v25  ;;  %v5762_v2 = vld [vmem:[#allocation19 + $0xb8] sm:$0xff]  }
0x1dcd   : > { %5011 = vmatpush3.bf16.msra.mxu1 %v5760_v1  ;;  %v4325_v59 = vld [vmem:[#allocation25 + $0x78] sm:$0xff] }
0x1dce   : > { %3888 = vadd.xlane.f32.xlu1 %v3885_v3  ;;  %5012 = vmatprep.subr.bf16.mxu1 %v5761_v47 }
0x1dd1   : > { %5013 = vmatpush3.bf16.msra.mxu1 %v5762_v2 }
0x1e59   : > { %v3887_v37 = vpop.xlane.xlu0 %3886 }
0x1e5a   : > { %v3890_v38 = vmul.f32 0.0078125, %v3887_v37 }
0x1e5b   : > { %v3889_v11 = vpop.xlane.xlu1 %3888 }
0x1e5c   : > { %v3892_v12 = vsub.f32 %v3884_v36, %v3890_v38  ;;  %v3891_v45 = vmul.f32 0.0078125, %v3889_v11  ;;  %v3952_v36 = vrot.slane %v3947_v61, %v6995_v48  ;;  %v4849_v48 = vld [vmem:[#allocation21 + $0x1] ss:$0 sm:$0xff] }
0x1e5e   : > { %v7400_v13 = vsub.f32 %v3885_v3, %v3891_v45  ;;  %v3894_v5 = vmul.f32 %v3892_v12, %v3892_v12  ;;  %v3956_v3 = vrot.slane %v3947_v61, %v6990_v44 }
0x1e60   : > { %3896 = vadd.xlane.f32.xlu0 %v3894_v5  ;;  %v3895_v25 = vmul.f32 %v7400_v13, %v7400_v13 }
0x1e64   : > { %3898 = vadd.xlane.f32.xlu0 %v3895_v25 }
0x1eed   : > { %v3897_v22 = vpop.xlane.xlu0 %3896 }
0x1eee   : > { %v3900_v23 = vmul.f32 0.0078125, %v3897_v22 }
0x1ef0   : > { %v3902_v24 = vadd.f32 1e-05, %v3900_v23 }
0x1ef1   : > { %v3899_v26 = vpop.xlane.xlu0 %3898 }
0x1ef2   : > { %5835 = vrsqrt.f32 %v3902_v24  ;;  %v3901_v28 = vmul.f32 0.0078125, %v3899_v26  ;;  %v4314_v24 = vld [vmem:[#allocation25 + $0x20] sm:$0xff]  ;;  %v4315_v26 = vld [vmem:[#allocation25 + $0x28] sm:$0xff] }
0x1ef4   : > { %v3903_v29 = vadd.f32 1e-05, %v3901_v28  ;;  %v5357_v28 = vpack.c.bf16 %v4315_v26, %v4314_v24 }
0x1ef6   : > { %5837 = vrsqrt.f32 %v3903_v29  ;;  %v4316_v29 = vld [vmem:[#allocation25 + $0x30] sm:$0xff] }
0x1efc   : > { %v5836_v31 = vpop.eup %5835 }
0x1efd   : > { %v3906_v32 = vmul.f32 %v5836_v31, %v3892_v12  ;;  %v4317_v31 = vld [vmem:[#allocation25 + $0x38] sm:$0xff] }
0x1eff   : > { %v3916_v35 = vmul.f32 %v4831_v33, %v3906_v32  ;;  %v5360_v32 = vpack.c.bf16 %v4317_v31, %v4316_v29 }
0x1f00   : > { %v5838_v7 = vpop.eup %5837 }
0x1f01   : > { %v3907_v34 = vmul.f32 %v5838_v7, %v7400_v13  ;;  %v3926_v50 = vadd.f32 %v4832_v41, %v3916_v35  ;;  %v4319_v7 = vld [vmem:[#allocation25 + $0x48] sm:$0xff]  ;;  %v4320_v35 = vld [vmem:[#allocation25 + $0x50] sm:$0xff] }
0x1f03   : > { %v3917_v42 = vmul.f32 %v4831_v33, %v3907_v34  ;;  %v4318_v33 = vld [vmem:[#allocation25 + $0x40] sm:$0xff] }
0x1f04   : > { %v5363_v34 = vpack.c.bf16 %v4319_v7, %v4318_v33 }
0x1f05   : > { %v3927_v51 = vadd.f32 %v4832_v41, %v3917_v42  ;;  %v4321_v41 = vld [vmem:[#allocation25 + $0x58] sm:$0xff] }
0x1f06   : > { %v5366_v42 = vpack.c.bf16 %v4321_v41, %v4320_v35 }
0x1f07   : > { %v3928_v56 = vpack.c.bf16 %v3927_v51, %v3926_v50 }
0x1f09   : > { %4072 = vmatmul.mubr.bf16.vlgmr.msra.gmra.mrb[88].mxu0 %v3928_v56  ;;  %v4324_v56 = vld [vmem:[#allocation25 + $0x70] sm:$0xff] }
0x1f0a   : > { %5347 = vmatprep.mubr.msk.f32.mxu0 %vm6393_vm0, %v6392_v0  ;;  %5352 = vmatpush3.bf16.msra.mxu0 %v5351_v20  ;;  %v5372_v1 = vpack.c.bf16 %v4325_v59, %v4324_v56 }
0x1f0b   : > { %5353 = vmatprep.subr.bf16.mxu0 %v6398_v62 }
0x1f0e   : > { %5355 = vmatpush3.bf16.msra.mxu0 %v5354_v54 }
0x1f0f   : > { %5356 = vmatprep.subr.bf16.mxu0 %v6398_v62 }
0x1f12   : > { %5358 = vmatpush3.bf16.msra.mxu0 %v5357_v28 }
0x1f13   : > { %5359 = vmatprep.subr.bf16.mxu0 %v6398_v62 }
0x1f16   : > { %5361 = vmatpush3.bf16.msra.mxu0 %v5360_v32 }
0x1f17   : > { %5362 = vmatprep.subr.bf16.mxu0 %v6398_v62 }
0x1f1a   : > { %5364 = vmatpush3.bf16.msra.mxu0 %v5363_v34 }
0x1f1b   : > { %5365 = vmatprep.subr.bf16.mxu0 %v6398_v62 }
0x1f1e   : > { %5367 = vmatpush3.bf16.msra.mxu0 %v5366_v42 }
0x1f1f   : > { %5368 = vmatprep.subr.bf16.mxu0 %v6398_v62 }
0x1fdc   : > { %v4073_v4 = vpop.f32.mrb[88].mxu0 }
0x1fdd   : > { %v4074_v6 = vadd.f32 %v4073_v4, %v3952_v36  ;;  %v4075_v10 = vpop.f32.mrb[89].mxu0 }
0x1fde   : > { %v4076_v27 = vadd.f32 %v4075_v10, %v3956_v3  ;;  %v4077_v0 = vpop.f32.mrb[90].mxu0  ;;  %v4866_v10 = vld [vmem:[#allocation22 + $0x1] ss:$0 sm:$0xff] }
0x1fdf   : > { %v4078_v37 = vadd.f32 %v4077_v0, %v3952_v36  ;;  %v4079_v38 = vpop.f32.mrb[91].mxu0  ;;  %v4082_v12 = vmax.f32 %v4074_v6, 0.0 }
0x1fe0   : > { %v4080_v11 = vadd.f32 %v4079_v38, %v3956_v3  ;;  %v4083_v13 = vmax.f32 %v4076_v27, 0.0 }
0x1fe1   : > { %v4084_v45 = vmax.f32 %v4078_v37, 0.0  ;;  %v4867_v37 = vld [vmem:[#allocation24 + $0x1] ss:$0 sm:$0xff] }
0x1fe2   : > { %v4085_v5 = vmax.f32 %v4080_v11, 0.0 }
0x1fe3   : > { %v4086_v25 = vpack.c.bf16 %v4084_v45, %v4082_v12 }
0x1fe4   : > { %v4087_v46 = vpack.c.bf16 %v4085_v5, %v4083_v13 }
0x1fe6   : > { %4257 = vmatprep.mubr.bf16.mxu1 %v4087_v46 }
0x1fe7   : > { %4258 = vmatmul.mubr.bf16.vlgmr.msra.gmra.mrb[76].mxu1 %v4086_v25 }
0x20ba   : > { %v5014_v14 = vpop.f32.mrb[76].mxu1 }
0x20bb   : > { %v5015_v52 = vpop.f32.mrb[77].mxu1 }
0x20bc   : > { %v5016_v44 = vadd.f32 %v5015_v52, %v5014_v14  ;;  %v5017_v15 = vpop.f32.mrb[78].mxu1  ;;  %v6399_v14 = vmov 1966171168  }
0x20bd   : > { %v5018_v57 = vpop.f32.mrb[79].mxu1 }
0x20be   : > { %v4260_v16 = vadd.f32 %v5016_v44, %v4849_v48  ;;  %v5019_v39 = vadd.f32 %v5018_v57, %v5017_v15  ;;  %v4868_v44 = vld [vmem:[#allocation27] ss:$0 sm:$0xff] }
0x20c0   : > { %v4263_v17 = vadd.f32 %v5019_v39, %v4849_v48  ;;  %v4266_v53 = vadd.f32 %v4260_v16, %v3926_v50  ;;  %v4322_v50 = vld [vmem:[#allocation25 + $0x60] sm:$0xff]  ;;  %v4412_v48 = vunpack.c.l.s4 %v6399_v14 }
0x20c2   : > { %4268 = vadd.xlane.f32.xlu0 %v4266_v53  ;;  %v4267_v18 = vadd.f32 %v4263_v17, %v3927_v51  ;;  %v4323_v51 = vld [vmem:[#allocation25 + $0x68] sm:$0xff]  ;;  %v4413_v52 = vunpack.c.0.s8 %v4412_v48 }
0x20c3   : > { %v5369_v58 = vpack.c.bf16 %v4323_v51, %v4322_v50 }
0x20c4   : > { %4270 = vadd.xlane.f32.xlu1 %v4267_v18  ;;  %v4416_v15 = vsub.s32 %v4413_v52, %v6987_v43 }
0x20c5   : > { %5370 = vmatpush3.bf16.msra.mxu0 %v5369_v58 }
0x20c6   : > { %5371 = vmatprep.subr.bf16.mxu0 %v6398_v62 }
0x20c9   : > { %5373 = vmatpush3.bf16.msra.mxu0 %v5372_v1 }
0x214f   : > { %v4269_v55 = vpop.xlane.xlu0 %4268 }
0x2150   : > { %v4272_v60 = vmul.f32 0.0078125, %v4269_v55 }
0x2151   : > { %v4271_v63 = vpop.xlane.xlu1 %4270 }
0x2152   : > { %v4274_v21 = vsub.f32 %v4266_v53, %v4272_v60  ;;  %v4273_v9 = vmul.f32 0.0078125, %v4271_v63 }
0x2154   : > { %v4275_v40 = vsub.f32 %v4267_v18, %v4273_v9  ;;  %v4276_v22 = vmul.f32 %v4274_v21, %v4274_v21 }
0x2156   : > { %4278 = vadd.xlane.f32.xlu0 %v4276_v22  ;;  %v4277_v23 = vmul.f32 %v4275_v40, %v4275_v40 }
0x2158   : > { %4280 = vadd.xlane.f32.xlu1 %v4277_v23 }
0x21e3   : > { %v4279_v47 = vpop.xlane.xlu0 %4278 }
0x21e4   : > { %v4282_v2 = vmul.f32 0.0078125, %v4279_v47 }
0x21e5   : > { %v4281_v61 = vpop.xlane.xlu1 %4280 }
0x21e6   : > { %v4284_v36 = vadd.f32 1e-05, %v4282_v2  ;;  %v4283_v3 = vmul.f32 0.0078125, %v4281_v61 }
0x21e8   : > { %5839 = vrsqrt.f32 %v4284_v36  ;;  %v4285_v4 = vadd.f32 1e-05, %v4283_v3 }
0x21ea   : > { %5841 = vrsqrt.f32 %v4285_v4 }
0x21f2   : > { %v5840_v6 = vpop.eup %5839 }
0x21f3   : > { %v4288_v27 = vmul.f32 %v5840_v6, %v4274_v21 }
0x21f4   : > { %v5842_v0 = vpop.eup %5841 }
0x21f5   : > { %v4289_v38 = vmul.f32 %v5842_v0, %v4275_v40  ;;  %v4298_v11 = vmul.f32 %v4866_v10, %v4288_v27 }
0x21f7   : > { %v4299_v12 = vmul.f32 %v4866_v10, %v4289_v38  ;;  %v4308_v45 = vadd.f32 %v4867_v37, %v4298_v11 }
0x21f9   : > { %v4309_v13 = vadd.f32 %v4867_v37, %v4299_v12  ;;  %v4335_v5 = vrot.slane %v4308_v45, 7 }
0x21fb   : > { %v4336_v25 = vrot.slane %v4309_v13, 6 }
0x21fd   : > { %v4338_v46 = vsel %vm4337_vm8, %v4336_v25, %v4335_v5 }
0x21fe   : > { %5348 = vmatmul.mubr.f32.vlgmr.msra.gmra.mrb[92].mxu0 %v4338_v46 }
0x22d1   : > { %v4406_v57 = vpop.f32.mrb[92].mxu0 }
0x22d2   : > { %v4407_v16 = vadd.f32 %v4868_v44, %v4406_v57  ;;  %v5349_v39 = vpop.f32.mrb[93].mxu0 }
0x22d4   : > { %v4417_v17 = vrot.slane %v4407_v16, %v4416_v15 }
0x22d6   : > { %v4418_v53 = vcombine.high %v4417_v17, %v4417_v17  ;;  %4869 = vst.sshfl [vmem:[%s814_s2] sm:$0x1 pattern:$0x73625140] %v4417_v17 }
0x22d8   : > { %4870 = vst.sshfl [vmem:[%s814_s2 + $0x1] sm:$0x1 pattern:$0x73625140] %v4418_v53 }
0x22d9 PF: > { %s7491_s0 = sld [smem:[#allocation37_spill]] }
0x22df   : > { %s37_s27 = sadd.s32 1, %s7491_s0  }
0x22e0   : > { %p34_p7 = scmp.ge.s32.totalorder %s37_s27, 4  }
0x22e2   :  { %36 = sbr.rel (!%p34_p7) target bundleno = 20 (0x14), region = 203 }
0x22e9   :  { %4457 = vsyncpa [#allocation3], 1 }
0x22ea   :  { %4459 = vsyncpa [#allocation3 + $0x1], 1 }
0x22eb   :  { %4460 = vsyncpa [#allocation5], 1 }
0x22ec   :  { %4461 = vsyncpa [#allocation8], 1 }
0x22ed   :  { %4462 = vsyncpa [#allocation11], 1 }
0x22ee   :  { %4463 = vsyncpa [#allocation14], 1 }
0x22ef   :  { %4464 = vsyncpa [#allocation17], 1 }
0x22f0   :  { %4465 = vsyncpa [#allocation20], 1 }
0x22f1   :  { %4466 = vsyncpa [#allocation23], 1 }
0x22f2   :  { %4467 = vsyncpa [#allocation26], 1 }

</bundles_post_ra>
